<compile_context>
chip_gen: v7x
topology: tpu7x:2x2x1
jax: 0.10.0
libtpu: 0.0.40
codegen_flags: <defaults>
</compile_context>

<pallas_src>
import functools

import jax
import jax.numpy as jnp
from jax.experimental import pallas as pl
from jax.experimental.pallas import tpu as pltpu


# ------------------------------ fused kernel ------------------------------- #

def _one_hot_expand(nb, n_rep):
    """(nb, n_rep*nb) 0/1 matrix E with E[n, r*nb + n] = 1 (lane repeat)."""
    rows = jax.lax.broadcasted_iota(jnp.int32, (nb, n_rep * nb), 0)
    cols = jax.lax.broadcasted_iota(jnp.int32, (nb, n_rep * nb), 1)
    return (rows == cols % nb).astype(jnp.float32)


def _make_fused_kernel(num_blocks, n_layers, H, W, NB, mm_dtype):
    """Builds the fused whole-network kernel for a static block structure."""

    def kernel(*refs):
        # refs = [xa, xb, (wr, wc, b) * n_layers, out]
        xa_ref, xb_ref = refs[0], refs[1]
        out_ref = refs[-1]
        pref = refs[2:-1]
        layers = [(pref[3 * i], pref[3 * i + 1], pref[3 * i + 2])
                  for i in range(n_layers)]
        it = iter(layers)

        # One-hot lane-repeat matrices, built once and reused by every layer.
        e_w = _one_hot_expand(NB, W)
        e_h = e_w if H == W else _one_hot_expand(NB, H)

        def splat(vec, n_outer, e_mat):
            # vec: (O, n_outer*NB) -> (n_outer, O, n_rep*NB) with
            #   out[s, o, r*NB + n] = vec[o, s*NB + n]
            # Static 8-lane slices + one tiny K=NB matmul: no tile-crossing
            # value reshape, the lane expansion rides on MXU slack.
            o_dim = vec.shape[0]
            parts = [vec[:, s * NB:(s + 1) * NB] for s in range(n_outer)]
            st = jnp.concatenate(parts, axis=0)               # (n_outer*O, NB)
            ex = jnp.dot(st, e_mat, preferred_element_type=jnp.float32)
            return ex.reshape(n_outer, o_dim, e_mat.shape[1])

        def matmuls(sa, sb, wr_ref, wc_ref, b_ref):
            # sa: (H, C, W*NB), sb: (W, C, H*NB).  Leading-dim merges only.
            c = sa.shape[1]
            rhs_col = sa.reshape(H * c, W * NB).astype(mm_dtype)
            rhs_row = sb.reshape(W * c, H * NB).astype(mm_dtype)
            col = jnp.dot(wc_ref[...], rhs_col,
                          preferred_element_type=jnp.float32)   # (O, W*NB)
            row = jnp.dot(wr_ref[...], rhs_row,
                          preferred_element_type=jnp.float32)   # (O, H*NB)
            return row, col + b_ref[...]          # combined bias folded in col

        def e2e(sa, sb, lp, relu):
            row, colb = matmuls(sa, sb, *lp)
            oa = splat(row, H, e_w) + colb[None, :, :]          # (H, O, W*NB)
            ob = row[None, :, :] + splat(colb, W, e_h)          # (W, O, H*NB)
            if relu:
                oa = jnp.maximum(oa, 0.0)
                ob = jnp.maximum(ob, 0.0)
            return oa, ob

        sa = xa_ref[0].astype(jnp.float32)        # (H, C_in, W*NB)
        sb = xb_ref[0].astype(jnp.float32)        # (W, C_in, H*NB)

        # ---- Edge2EdgeResNet trunk ----
        sa, sb = e2e(sa, sb, next(it), relu=True)                 # init E2E
        for stage, nblk in enumerate(num_blocks):
            if stage > 0:                                         # channels x2
                sa, sb = e2e(sa, sb, next(it), relu=True)
            for _ in range(nblk):                                 # residual
                ra, rb = e2e(sa, sb, next(it), relu=True)
                ra, rb = e2e(ra, rb, next(it), relu=False)
                sa = jnp.maximum(sa + ra, 0.0)
                sb = jnp.maximum(sb + rb, 0.0)

        # ---- Edge2Edge head: lane-dense (H, O_pad, W*NB) unmasked store ----
        wr_ref, wc_ref, b_ref = next(it)
        row, colb = matmuls(sa, sb, wr_ref, wc_ref, b_ref)
        out = splat(row, H, e_w) + colb[None, :, :]
        out_ref[0] = out.astype(out_ref.dtype)

    return kernel


# ------------------------------- wrappers ---------------------------------- #

def _const_index_map(ndim):
    def idx(g):
        return (0,) * ndim
    return idx


def _round_up(x, m):
    return ((x + m - 1) // m) * m


def _pick_batch_pack(n, h):
    """Largest NB dividing n with NB*h <= 128, preferring an even grid (v7x)."""
    target = max(1, 128 // max(1, h))
    cands = [c for c in range(1, min(n, target) + 1) if n % c == 0]
    even = [c for c in cands if (n // c) % 2 == 0]
    return max(even) if even else max(cands)


def _flatten_e2e(wrow, wcol, brow, bcol, mm_dtype, o_pad=None):
    """Host-side lane-dense flattening: (O, W*C)/(O, H*C) with the contraction
    index ordering (spatial-major, channel-minor) matching the in-kernel
    leading-dim slab reshapes."""
    o = wrow.shape[0]
    wr = jnp.transpose(wrow[:, :, 0, :], (0, 2, 1)).reshape(o, -1)   # [o, w*C+c]
    wc = jnp.transpose(wcol[:, :, :, 0], (0, 2, 1)).reshape(o, -1)   # [o, i*C+c]
    b = (brow + bcol).reshape(o, 1)
    if o_pad is not None and o_pad > o:
        wr = jnp.pad(wr, ((0, o_pad - o), (0, 0)))
        wc = jnp.pad(wc, ((0, o_pad - o), (0, 0)))
        b = jnp.pad(b, ((0, o_pad - o), (0, 0)))
    return wr.astype(mm_dtype), wc.astype(mm_dtype), b.astype(jnp.float32)


def _flatten_layer_params(params, num_blocks, mm_dtype):
    """Flatten to per-layer (wr, wc, b) in execution order."""
    seq = [params["init"]]
    bi = 0
    for s, nb in enumerate(num_blocks):
        if s > 0:
            seq.append(params["trans"][s - 1])
        for _ in range(nb):
            p1, p2 = params["blocks"][bi]
            seq.extend([p1, p2])
            bi += 1

    head = params["head"]
    o_head = head[0].shape[0]
    o_pad = _round_up(max(o_head, 8), 8)      # full-sublane, unmasked store

    flat = []
    for p in seq:
        flat.extend(_flatten_e2e(*p, mm_dtype=mm_dtype))
    flat.extend(_flatten_e2e(*head, mm_dtype=mm_dtype, o_pad=o_pad))
    return flat, len(seq) + 1, o_head, o_pad


def antibody_graph_resnet_forward(x, params, num_blocks, *,
                                  matmul_dtype=jnp.float32, batch_pack=None):
    if isinstance(num_blocks, int):
        num_blocks = (num_blocks,)
    num_blocks = tuple(num_blocks)
    N, C_in, H, W = x.shape

    nb = batch_pack if batch_pack is not None else _pick_batch_pack(N, H)
    assert N % nb == 0
    G = N // nb

    flat_params, n_layers, o_head, o_pad = _flatten_layer_params(
        params, num_blocks, matmul_dtype)

    # One-time host-side packing of the input into the two lane-dense
    # orientations consumed in-kernel (replaces per-layer host transposes).
    xr = x.reshape(G, nb, C_in, H, W)
    xa = jnp.transpose(xr, (0, 3, 2, 4, 1)).reshape(G, H, C_in, W * nb)
    xb = jnp.transpose(xr, (0, 4, 2, 3, 1)).reshape(G, W, C_in, H * nb)

    inputs = [xa, xb] + flat_params
    in_specs = [
        pl.BlockSpec((1, H, C_in, W * nb), lambda g: (g, 0, 0, 0)),
        pl.BlockSpec((1, W, C_in, H * nb), lambda g: (g, 0, 0, 0)),
    ] + [
        # Grid-invariant weights/biases: single-buffered (no useless 2x VMEM).
        pl.BlockSpec(a.shape, _const_index_map(a.ndim),
                     pipeline_mode=pl.Buffered(1))
        for a in flat_params
    ]

    out_flat = pl.pallas_call(
        _make_fused_kernel(num_blocks, n_layers, H, W, nb, matmul_dtype),
        out_shape=jax.ShapeDtypeStruct((G, H, o_pad, W * nb), x.dtype),
        grid=(G,),
        in_specs=in_specs,
        out_specs=pl.BlockSpec((1, H, o_pad, W * nb), lambda g: (g, 0, 0, 0)),
        compiler_params=pltpu.CompilerParams(
            dimension_semantics=("parallel",)),
    )(*inputs)

    # Unpack (G, H, O_pad, W*NB) -> (N, O, H, W) on the host (tiny).
    out = out_flat.reshape(G, H, o_pad, W, nb)
    out = jnp.transpose(out, (0, 4, 2, 1, 3)).reshape(N, o_pad, H, W)
    return out[:, :o_head]


# ------------------------------- parameters -------------------------------- #

def init_e2e_params(key, in_c, out_c, H, W):
    k1, k2, k3, k4 = jax.random.split(key, 4)
    wrow = jax.random.normal(k1, (out_c, in_c, 1, W), jnp.float32) / jnp.sqrt(in_c * W)
    wcol = jax.random.normal(k2, (out_c, in_c, H, 1), jnp.float32) / jnp.sqrt(in_c * H)
    brow = 0.01 * jax.random.normal(k3, (out_c,), jnp.float32)
    bcol = 0.01 * jax.random.normal(k4, (out_c,), jnp.float32)
    return (wrow, wcol, brow, bcol)


def init_model_params(key, in_channels, num_dist_bins, graph_size,
                      num_blocks, init_channels):
    if isinstance(num_blocks, int):
        num_blocks = (num_blocks,)
    H, W = graph_size
    keys = iter(jax.random.split(key, 64))
    params = {"trans": [], "blocks": []}
    params["init"] = init_e2e_params(next(keys), in_channels, init_channels, H, W)
    channels = init_channels
    for s, nb in enumerate(num_blocks):
        if s > 0:
            params["trans"].append(
                init_e2e_params(next(keys), channels, channels * 2, H, W))
            channels *= 2
        for _ in range(nb):
            p1 = init_e2e_params(next(keys), channels, channels, H, W)
            p2 = init_e2e_params(next(keys), channels, channels, H, W)
            params["blocks"].append((p1, p2))
    # Final Edge2Edge head: init_channels * 2**(len(num_blocks)-1) -> num_dist_bins
    params["head"] = init_e2e_params(next(keys), channels, num_dist_bins, H, W)
    return params


# --------------------------- pure-JAX reference ----------------------------- #

def _edge2edge_ref(x, wrow, wcol, brow, bcol, relu, mm_dtype):
    wr = wrow[:, :, 0, :].astype(mm_dtype)
    wc = wcol[:, :, :, 0].astype(mm_dtype)
    xm = x.astype(mm_dtype)
    prec = jax.lax.Precision.HIGHEST if mm_dtype == jnp.float32 else None
    row = jnp.einsum("nciw,ocw->noi", xm, wr, precision=prec,
                     preferred_element_type=jnp.float32)
    col = jnp.einsum("nciw,oci->now", xm, wc, precision=prec,
                     preferred_element_type=jnp.float32)
    y = (row[:, :, :, None] + col[:, :, None, :]
         + (brow + bcol)[None, :, None, None])
    return jnp.maximum(y, 0.0) if relu else y


def _forward_ref(x, params, num_blocks, mm_dtype=jnp.float32):
    if isinstance(num_blocks, int):
        num_blocks = (num_blocks,)
    h = _edge2edge_ref(x, *params["init"], relu=True, mm_dtype=mm_dtype)
    bi = 0
    for s, nb in enumerate(num_blocks):
        if s > 0:
            h = _edge2edge_ref(h, *params["trans"][s - 1], relu=True,
                               mm_dtype=mm_dtype)
        for _ in range(nb):
            p1, p2 = params["blocks"][bi]
            r = _edge2edge_ref(h, *p1, relu=True, mm_dtype=mm_dtype)
            r = _edge2edge_ref(r, *p2, relu=False, mm_dtype=mm_dtype)
            h = jnp.maximum(h + r, 0.0)
            bi += 1
    return _edge2edge_ref(h, *params["head"], relu=False, mm_dtype=mm_dtype)


# ----------------------------------- main ----------------------------------- #

if __name__ == "__main__":
    key = jax.random.PRNGKey(0)
    kx, kp = jax.random.split(key)

    # Small synthetic shapes consistent with the module:
    #   feature.shape[0] -> in_channels, label.shape -> graph_size,
    #   dataset.num_dist_bins -> out_channels.
    # N=16 so 8 batch elements fill the 128-wide lane dim per grid step while
    # the grid stays (2,) (both v7x TensorCores busy).
    N, in_channels = 16, 4
    graph_size = (16, 16)
    num_blocks = (2,)
    init_channels = 8
    num_dist_bins = 10

    x = jax.random.normal(kx, (N, in_channels) + graph_size, jnp.float32)
    params = init_model_params(kp, in_channels, num_dist_bins, graph_size,
                               num_blocks, init_channels)

    # f32-operand path (closest to PyTorch fp32 semantics).
    fwd_f32 = jax.jit(functools.partial(antibody_graph_resnet_forward,
                                        num_blocks=num_blocks,
                                        matmul_dtype=jnp.float32))
    out = jax.block_until_ready(fwd_f32(x, params))
    assert out.shape == (N, num_dist_bins) + graph_size, out.shape
    assert out.dtype == jnp.float32
    assert bool(jnp.all(jnp.isfinite(out)))
    ref = _forward_ref(x, params, num_blocks, jnp.float32)
    err = float(jnp.max(jnp.abs(out - ref)))
    assert err < 5e-2, f"f32 path: max abs err vs reference: {err}"

    # bf16-operand path (recommended on v6e/v7x: native single-pass MXU, half
    # the weight DMA bytes), validated against a reference that applies the
    # same operand rounding; accumulation and element-wise math stay f32.
    fwd_bf16 = jax.jit(functools.partial(antibody_graph_resnet_forward,
                                         num_blocks=num_blocks,
                                         matmul_dtype=jnp.bfloat16))
    out16 = jax.block_until_ready(fwd_bf16(x, params))
    assert out16.shape == (N, num_dist_bins) + graph_size
    assert bool(jnp.all(jnp.isfinite(out16)))
    ref16 = _forward_ref(x, params, num_blocks, jnp.bfloat16)
    err16 = float(jnp.max(jnp.abs(out16 - ref16)))
    assert err16 < 5e-2, f"bf16 path: max abs err vs reference: {err16}"

    print("KERNEL_OK")
</pallas_src>

<mosaic_0001>
module attributes {stable_mosaic.version = 11 : i64} {
  func.func @kernel(%arg0: i32, %arg1: memref<1x16x4x128xf32, #tpu.memory_space<vmem>>, %arg2: memref<1x16x4x128xf32, #tpu.memory_space<vmem>>, %arg3: memref<8x64xf32, #tpu.memory_space<vmem>>, %arg4: memref<8x64xf32, #tpu.memory_space<vmem>>, %arg5: memref<8x1xf32, #tpu.memory_space<vmem>>, %arg6: memref<8x128xf32, #tpu.memory_space<vmem>>, %arg7: memref<8x128xf32, #tpu.memory_space<vmem>>, %arg8: memref<8x1xf32, #tpu.memory_space<vmem>>, %arg9: memref<8x128xf32, #tpu.memory_space<vmem>>, %arg10: memref<8x128xf32, #tpu.memory_space<vmem>>, %arg11: memref<8x1xf32, #tpu.memory_space<vmem>>, %arg12: memref<8x128xf32, #tpu.memory_space<vmem>>, %arg13: memref<8x128xf32, #tpu.memory_space<vmem>>, %arg14: memref<8x1xf32, #tpu.memory_space<vmem>>, %arg15: memref<8x128xf32, #tpu.memory_space<vmem>>, %arg16: memref<8x128xf32, #tpu.memory_space<vmem>>, %arg17: memref<8x1xf32, #tpu.memory_space<vmem>>, %arg18: memref<16x128xf32, #tpu.memory_space<vmem>>, %arg19: memref<16x128xf32, #tpu.memory_space<vmem>>, %arg20: memref<16x1xf32, #tpu.memory_space<vmem>>, %arg21: memref<1x16x16x128xf32, #tpu.memory_space<vmem>>) attributes {dimension_semantics = [#tpu.dimension_semantics<parallel>], iteration_bounds = array<i64: 2>, scalar_prefetch = 0 : i64, scratch_operands = 0 : i64, tpu.core_type = #tpu.core_type<tc>, window_params = [{transform_indices = @transform_0, window_bounds = array<i64: 1, 16, 4, 128>}, {transform_indices = @transform_1, window_bounds = array<i64: 1, 16, 4, 128>}, {pipeline_mode = #tpu.pipeline_mode<synchronous>, transform_indices = @transform_2, window_bounds = array<i64: 8, 64>}, {pipeline_mode = #tpu.pipeline_mode<synchronous>, transform_indices = @transform_3, window_bounds = array<i64: 8, 64>}, {pipeline_mode = #tpu.pipeline_mode<synchronous>, transform_indices = @transform_4, window_bounds = array<i64: 8, 1>}, {pipeline_mode = #tpu.pipeline_mode<synchronous>, transform_indices = @transform_5, window_bounds = array<i64: 8, 128>}, {pipeline_mode = #tpu.pipeline_mode<synchronous>, transform_indices = @transform_6, window_bounds = array<i64: 8, 128>}, {pipeline_mode = #tpu.pipeline_mode<synchronous>, transform_indices = @transform_7, window_bounds = array<i64: 8, 1>}, {pipeline_mode = #tpu.pipeline_mode<synchronous>, transform_indices = @transform_8, window_bounds = array<i64: 8, 128>}, {pipeline_mode = #tpu.pipeline_mode<synchronous>, transform_indices = @transform_9, window_bounds = array<i64: 8, 128>}, {pipeline_mode = #tpu.pipeline_mode<synchronous>, transform_indices = @transform_10, window_bounds = array<i64: 8, 1>}, {pipeline_mode = #tpu.pipeline_mode<synchronous>, transform_indices = @transform_11, window_bounds = array<i64: 8, 128>}, {pipeline_mode = #tpu.pipeline_mode<synchronous>, transform_indices = @transform_12, window_bounds = array<i64: 8, 128>}, {pipeline_mode = #tpu.pipeline_mode<synchronous>, transform_indices = @transform_13, window_bounds = array<i64: 8, 1>}, {pipeline_mode = #tpu.pipeline_mode<synchronous>, transform_indices = @transform_14, window_bounds = array<i64: 8, 128>}, {pipeline_mode = #tpu.pipeline_mode<synchronous>, transform_indices = @transform_15, window_bounds = array<i64: 8, 128>}, {pipeline_mode = #tpu.pipeline_mode<synchronous>, transform_indices = @transform_16, window_bounds = array<i64: 8, 1>}, {pipeline_mode = #tpu.pipeline_mode<synchronous>, transform_indices = @transform_17, window_bounds = array<i64: 16, 128>}, {pipeline_mode = #tpu.pipeline_mode<synchronous>, transform_indices = @transform_18, window_bounds = array<i64: 16, 128>}, {pipeline_mode = #tpu.pipeline_mode<synchronous>, transform_indices = @transform_19, window_bounds = array<i64: 16, 1>}, {transform_indices = @transform_20, window_bounds = array<i64: 1, 16, 16, 128>}]} {
    %0 = tpu.iota {dimensions = array<i32: 0>} : vector<8x128xi32>
    %1 = tpu.iota {dimensions = array<i32: 1>} : vector<8x128xi32>
    %c8_i32 = arith.constant 8 : i32
    %c0_i32 = arith.constant 0 : i32
    %2 = arith.cmpi eq, %c8_i32, %c0_i32 : i32
    %c1_i32 = arith.constant 1 : i32
    %3 = arith.select %2, %c1_i32, %c8_i32 : i32
    %4 = vector.broadcast %3 : i32 to vector<8x128xi32>
    %5 = arith.remsi %1, %4 : vector<8x128xi32>
    %c0_i32_0 = arith.constant 0 : i32
    %6 = vector.broadcast %c0_i32_0 : i32 to vector<8x128xi32>
    %7 = arith.cmpi ne, %5, %6 : vector<8x128xi32>
    %c0_i32_1 = arith.constant 0 : i32
    %8 = vector.broadcast %c0_i32_1 : i32 to vector<8x128xi32>
    %9 = arith.cmpi slt, %5, %8 : vector<8x128xi32>
    %c0_i32_2 = arith.constant 0 : i32
    %10 = arith.cmpi slt, %3, %c0_i32_2 : i32
    %11 = vector.broadcast %10 : i1 to vector<8x128xi1>
    %12 = vector.broadcast %11 : vector<8x128xi1> to vector<8x128xi1>
    %13 = arith.xori %9, %12 : vector<8x128xi1>
    %14 = arith.andi %13, %7 : vector<8x128xi1>
    %15 = vector.broadcast %3 : i32 to vector<8x128xi32>
    %16 = arith.addi %5, %15 : vector<8x128xi32>
    %17 = arith.select %14, %16, %5 : vector<8x128xi1>, vector<8x128xi32>
    %18 = arith.cmpi eq, %0, %17 : vector<8x128xi32>
    %19 = arith.extui %18 : vector<8x128xi1> to vector<8x128xi32>
    %20 = arith.sitofp %19 : vector<8x128xi32> to vector<8x128xf32>
    %c0 = arith.constant 0 : index
    %c0_3 = arith.constant 0 : index
    %c0_4 = arith.constant 0 : index
    %c0_5 = arith.constant 0 : index
    %21 = vector.load %arg1[%c0, %c0_3, %c0_4, %c0_5] : memref<1x16x4x128xf32, #tpu.memory_space<vmem>>, vector<1x16x4x128xf32>
    %22 = vector.shape_cast %21 : vector<1x16x4x128xf32> to vector<16x4x128xf32>
    %c0_6 = arith.constant 0 : index
    %c0_7 = arith.constant 0 : index
    %c0_8 = arith.constant 0 : index
    %c0_9 = arith.constant 0 : index
    %23 = vector.load %arg2[%c0_6, %c0_7, %c0_8, %c0_9] : memref<1x16x4x128xf32, #tpu.memory_space<vmem>>, vector<1x16x4x128xf32>
    %24 = vector.shape_cast %23 : vector<1x16x4x128xf32> to vector<16x4x128xf32>
    %25 = vector.shape_cast %22 : vector<16x4x128xf32> to vector<64x128xf32>
    %26 = vector.shape_cast %24 : vector<16x4x128xf32> to vector<64x128xf32>
    %c0_10 = arith.constant 0 : index
    %c0_11 = arith.constant 0 : index
    %27 = vector.load %arg4[%c0_10, %c0_11] : memref<8x64xf32, #tpu.memory_space<vmem>>, vector<8x64xf32>
    %cst = arith.constant dense<0.000000e+00> : vector<8x128xf32>
    %28 = tpu.matmul %27, %25, %cst {dimension_numbers = #tpu.dot_dimension_numbers<[1], [0], [0], [1], [0, 0, 1, 1], [], []>} : vector<8x64xf32>, vector<64x128xf32>, vector<8x128xf32> -> vector<8x128xf32>
    %c0_12 = arith.constant 0 : index
    %c0_13 = arith.constant 0 : index
    %29 = vector.load %arg3[%c0_12, %c0_13] : memref<8x64xf32, #tpu.memory_space<vmem>>, vector<8x64xf32>
    %cst_14 = arith.constant dense<0.000000e+00> : vector<8x128xf32>
    %30 = tpu.matmul %29, %26, %cst_14 {dimension_numbers = #tpu.dot_dimension_numbers<[1], [0], [0], [1], [0, 0, 1, 1], [], []>} : vector<8x64xf32>, vector<64x128xf32>, vector<8x128xf32> -> vector<8x128xf32>
    %c0_15 = arith.constant 0 : index
    %c0_16 = arith.constant 0 : index
    %31 = vector.load %arg5[%c0_15, %c0_16] : memref<8x1xf32, #tpu.memory_space<vmem>>, vector<8x1xf32>
    %32 = vector.broadcast %31 : vector<8x1xf32> to vector<8x128xf32>
    %33 = arith.addf %28, %32 : vector<8x128xf32>
    %34 = vector.extract_strided_slice %30 {offsets = [0, 0], sizes = [8, 8], strides = [1, 1]} : vector<8x128xf32> to vector<8x8xf32>
    %35 = vector.extract_strided_slice %30 {offsets = [0, 8], sizes = [8, 8], strides = [1, 1]} : vector<8x128xf32> to vector<8x8xf32>
    %36 = vector.extract_strided_slice %30 {offsets = [0, 16], sizes = [8, 8], strides = [1, 1]} : vector<8x128xf32> to vector<8x8xf32>
    %37 = vector.extract_strided_slice %30 {offsets = [0, 24], sizes = [8, 8], strides = [1, 1]} : vector<8x128xf32> to vector<8x8xf32>
    %38 = vector.extract_strided_slice %30 {offsets = [0, 32], sizes = [8, 8], strides = [1, 1]} : vector<8x128xf32> to vector<8x8xf32>
    %39 = vector.extract_strided_slice %30 {offsets = [0, 40], sizes = [8, 8], strides = [1, 1]} : vector<8x128xf32> to vector<8x8xf32>
    %40 = vector.extract_strided_slice %30 {offsets = [0, 48], sizes = [8, 8], strides = [1, 1]} : vector<8x128xf32> to vector<8x8xf32>
    %41 = vector.extract_strided_slice %30 {offsets = [0, 56], sizes = [8, 8], strides = [1, 1]} : vector<8x128xf32> to vector<8x8xf32>
    %42 = vector.extract_strided_slice %30 {offsets = [0, 64], sizes = [8, 8], strides = [1, 1]} : vector<8x128xf32> to vector<8x8xf32>
    %43 = vector.extract_strided_slice %30 {offsets = [0, 72], sizes = [8, 8], strides = [1, 1]} : vector<8x128xf32> to vector<8x8xf32>
    %44 = vector.extract_strided_slice %30 {offsets = [0, 80], sizes = [8, 8], strides = [1, 1]} : vector<8x128xf32> to vector<8x8xf32>
    %45 = vector.extract_strided_slice %30 {offsets = [0, 88], sizes = [8, 8], strides = [1, 1]} : vector<8x128xf32> to vector<8x8xf32>
    %46 = vector.extract_strided_slice %30 {offsets = [0, 96], sizes = [8, 8], strides = [1, 1]} : vector<8x128xf32> to vector<8x8xf32>
    %47 = vector.extract_strided_slice %30 {offsets = [0, 104], sizes = [8, 8], strides = [1, 1]} : vector<8x128xf32> to vector<8x8xf32>
    %48 = vector.extract_strided_slice %30 {offsets = [0, 112], sizes = [8, 8], strides = [1, 1]} : vector<8x128xf32> to vector<8x8xf32>
    %49 = vector.extract_strided_slice %30 {offsets = [0, 120], sizes = [8, 8], strides = [1, 1]} : vector<8x128xf32> to vector<8x8xf32>
    %50 = tpu.concatenate %34, %35, %36, %37, %38, %39, %40, %41, %42, %43, %44, %45, %46, %47, %48, %49 in 0 : vector<8x8xf32>, vector<8x8xf32>, vector<8x8xf32>, vector<8x8xf32>, vector<8x8xf32>, vector<8x8xf32>, vector<8x8xf32>, vector<8x8xf32>, vector<8x8xf32>, vector<8x8xf32>, vector<8x8xf32>, vector<8x8xf32>, vector<8x8xf32>, vector<8x8xf32>, vector<8x8xf32>, vector<8x8xf32> -> vector<128x8xf32>
    %cst_17 = arith.constant dense<0.000000e+00> : vector<128x128xf32>
    %51 = tpu.matmul %50, %20, %cst_17 {dimension_numbers = #tpu.dot_dimension_numbers<[1], [0], [0], [1], [0, 0, 1, 1], [], []>} : vector<128x8xf32>, vector<8x128xf32>, vector<128x128xf32> -> vector<128x128xf32>
    %52 = vector.shape_cast %51 : vector<128x128xf32> to vector<16x8x128xf32>
    %53 = vector.shape_cast %33 : vector<8x128xf32> to vector<1x8x128xf32>
    %54 = vector.broadcast %53 : vector<1x8x128xf32> to vector<16x8x128xf32>
    %55 = arith.addf %52, %54 : vector<16x8x128xf32>
    %56 = vector.shape_cast %30 : vector<8x128xf32> to vector<1x8x128xf32>
    %57 = vector.extract_strided_slice %33 {offsets = [0, 0], sizes = [8, 8], strides = [1, 1]} : vector<8x128xf32> to vector<8x8xf32>
    %58 = vector.extract_strided_slice %33 {offsets = [0, 8], sizes = [8, 8], strides = [1, 1]} : vector<8x128xf32> to vector<8x8xf32>
    %59 = vector.extract_strided_slice %33 {offsets = [0, 16], sizes = [8, 8], strides = [1, 1]} : vector<8x128xf32> to vector<8x8xf32>
    %60 = vector.extract_strided_slice %33 {offsets = [0, 24], sizes = [8, 8], strides = [1, 1]} : vector<8x128xf32> to vector<8x8xf32>
    %61 = vector.extract_strided_slice %33 {offsets = [0, 32], sizes = [8, 8], strides = [1, 1]} : vector<8x128xf32> to vector<8x8xf32>
    %62 = vector.extract_strided_slice %33 {offsets = [0, 40], sizes = [8, 8], strides = [1, 1]} : vector<8x128xf32> to vector<8x8xf32>
    %63 = vector.extract_strided_slice %33 {offsets = [0, 48], sizes = [8, 8], strides = [1, 1]} : vector<8x128xf32> to vector<8x8xf32>
    %64 = vector.extract_strided_slice %33 {offsets = [0, 56], sizes = [8, 8], strides = [1, 1]} : vector<8x128xf32> to vector<8x8xf32>
    %65 = vector.extract_strided_slice %33 {offsets = [0, 64], sizes = [8, 8], strides = [1, 1]} : vector<8x128xf32> to vector<8x8xf32>
    %66 = vector.extract_strided_slice %33 {offsets = [0, 72], sizes = [8, 8], strides = [1, 1]} : vector<8x128xf32> to vector<8x8xf32>
    %67 = vector.extract_strided_slice %33 {offsets = [0, 80], sizes = [8, 8], strides = [1, 1]} : vector<8x128xf32> to vector<8x8xf32>
    %68 = vector.extract_strided_slice %33 {offsets = [0, 88], sizes = [8, 8], strides = [1, 1]} : vector<8x128xf32> to vector<8x8xf32>
    %69 = vector.extract_strided_slice %33 {offsets = [0, 96], sizes = [8, 8], strides = [1, 1]} : vector<8x128xf32> to vector<8x8xf32>
    %70 = vector.extract_strided_slice %33 {offsets = [0, 104], sizes = [8, 8], strides = [1, 1]} : vector<8x128xf32> to vector<8x8xf32>
    %71 = vector.extract_strided_slice %33 {offsets = [0, 112], sizes = [8, 8], strides = [1, 1]} : vector<8x128xf32> to vector<8x8xf32>
    %72 = vector.extract_strided_slice %33 {offsets = [0, 120], sizes = [8, 8], strides = [1, 1]} : vector<8x128xf32> to vector<8x8xf32>
    %73 = tpu.concatenate %57, %58, %59, %60, %61, %62, %63, %64, %65, %66, %67, %68, %69, %70, %71, %72 in 0 : vector<8x8xf32>, vector<8x8xf32>, vector<8x8xf32>, vector<8x8xf32>, vector<8x8xf32>, vector<8x8xf32>, vector<8x8xf32>, vector<8x8xf32>, vector<8x8xf32>, vector<8x8xf32>, vector<8x8xf32>, vector<8x8xf32>, vector<8x8xf32>, vector<8x8xf32>, vector<8x8xf32>, vector<8x8xf32> -> vector<128x8xf32>
    %cst_18 = arith.constant dense<0.000000e+00> : vector<128x128xf32>
    %74 = tpu.matmul %73, %20, %cst_18 {dimension_numbers = #tpu.dot_dimension_numbers<[1], [0], [0], [1], [0, 0, 1, 1], [], []>} : vector<128x8xf32>, vector<8x128xf32>, vector<128x128xf32> -> vector<128x128xf32>
    %75 = vector.shape_cast %74 : vector<128x128xf32> to vector<16x8x128xf32>
    %76 = vector.broadcast %56 : vector<1x8x128xf32> to vector<16x8x128xf32>
    %77 = arith.addf %76, %75 : vector<16x8x128xf32>
    %cst_19 = arith.constant 0.000000e+00 : f32
    %78 = vector.broadcast %cst_19 : f32 to vector<16x8x128xf32>
    %79 = arith.maximumf %55, %78 : vector<16x8x128xf32>
    %cst_20 = arith.constant 0.000000e+00 : f32
    %80 = vector.broadcast %cst_20 : f32 to vector<16x8x128xf32>
    %81 = arith.maximumf %77, %80 : vector<16x8x128xf32>
    %82 = vector.shape_cast %79 : vector<16x8x128xf32> to vector<128x128xf32>
    %83 = vector.shape_cast %81 : vector<16x8x128xf32> to vector<128x128xf32>
    %c0_21 = arith.constant 0 : index
    %c0_22 = arith.constant 0 : index
    %84 = vector.load %arg7[%c0_21, %c0_22] : memref<8x128xf32, #tpu.memory_space<vmem>>, vector<8x128xf32>
    %cst_23 = arith.constant dense<0.000000e+00> : vector<8x128xf32>
    %85 = tpu.matmul %84, %82, %cst_23 {dimension_numbers = #tpu.dot_dimension_numbers<[1], [0], [0], [1], [0, 0, 1, 1], [], []>} : vector<8x128xf32>, vector<128x128xf32>, vector<8x128xf32> -> vector<8x128xf32>
    %c0_24 = arith.constant 0 : index
    %c0_25 = arith.constant 0 : index
    %86 = vector.load %arg6[%c0_24, %c0_25] : memref<8x128xf32, #tpu.memory_space<vmem>>, vector<8x128xf32>
    %cst_26 = arith.constant dense<0.000000e+00> : vector<8x128xf32>
    %87 = tpu.matmul %86, %83, %cst_26 {dimension_numbers = #tpu.dot_dimension_numbers<[1], [0], [0], [1], [0, 0, 1, 1], [], []>} : vector<8x128xf32>, vector<128x128xf32>, vector<8x128xf32> -> vector<8x128xf32>
    %c0_27 = arith.constant 0 : index
    %c0_28 = arith.constant 0 : index
    %88 = vector.load %arg8[%c0_27, %c0_28] : memref<8x1xf32, #tpu.memory_space<vmem>>, vector<8x1xf32>
    %89 = vector.broadcast %88 : vector<8x1xf32> to vector<8x128xf32>
    %90 = arith.addf %85, %89 : vector<8x128xf32>
    %91 = vector.extract_strided_slice %87 {offsets = [0, 0], sizes = [8, 8], strides = [1, 1]} : vector<8x128xf32> to vector<8x8xf32>
    %92 = vector.extract_strided_slice %87 {offsets = [0, 8], sizes = [8, 8], strides = [1, 1]} : vector<8x128xf32> to vector<8x8xf32>
    %93 = vector.extract_strided_slice %87 {offsets = [0, 16], sizes = [8, 8], strides = [1, 1]} : vector<8x128xf32> to vector<8x8xf32>
    %94 = vector.extract_strided_slice %87 {offsets = [0, 24], sizes = [8, 8], strides = [1, 1]} : vector<8x128xf32> to vector<8x8xf32>
    %95 = vector.extract_strided_slice %87 {offsets = [0, 32], sizes = [8, 8], strides = [1, 1]} : vector<8x128xf32> to vector<8x8xf32>
    %96 = vector.extract_strided_slice %87 {offsets = [0, 40], sizes = [8, 8], strides = [1, 1]} : vector<8x128xf32> to vector<8x8xf32>
    %97 = vector.extract_strided_slice %87 {offsets = [0, 48], sizes = [8, 8], strides = [1, 1]} : vector<8x128xf32> to vector<8x8xf32>
    %98 = vector.extract_strided_slice %87 {offsets = [0, 56], sizes = [8, 8], strides = [1, 1]} : vector<8x128xf32> to vector<8x8xf32>
    %99 = vector.extract_strided_slice %87 {offsets = [0, 64], sizes = [8, 8], strides = [1, 1]} : vector<8x128xf32> to vector<8x8xf32>
    %100 = vector.extract_strided_slice %87 {offsets = [0, 72], sizes = [8, 8], strides = [1, 1]} : vector<8x128xf32> to vector<8x8xf32>
    %101 = vector.extract_strided_slice %87 {offsets = [0, 80], sizes = [8, 8], strides = [1, 1]} : vector<8x128xf32> to vector<8x8xf32>
    %102 = vector.extract_strided_slice %87 {offsets = [0, 88], sizes = [8, 8], strides = [1, 1]} : vector<8x128xf32> to vector<8x8xf32>
    %103 = vector.extract_strided_slice %87 {offsets = [0, 96], sizes = [8, 8], strides = [1, 1]} : vector<8x128xf32> to vector<8x8xf32>
    %104 = vector.extract_strided_slice %87 {offsets = [0, 104], sizes = [8, 8], strides = [1, 1]} : vector<8x128xf32> to vector<8x8xf32>
    %105 = vector.extract_strided_slice %87 {offsets = [0, 112], sizes = [8, 8], strides = [1, 1]} : vector<8x128xf32> to vector<8x8xf32>
    %106 = vector.extract_strided_slice %87 {offsets = [0, 120], sizes = [8, 8], strides = [1, 1]} : vector<8x128xf32> to vector<8x8xf32>
    %107 = tpu.concatenate %91, %92, %93, %94, %95, %96, %97, %98, %99, %100, %101, %102, %103, %104, %105, %106 in 0 : vector<8x8xf32>, vector<8x8xf32>, vector<8x8xf32>, vector<8x8xf32>, vector<8x8xf32>, vector<8x8xf32>, vector<8x8xf32>, vector<8x8xf32>, vector<8x8xf32>, vector<8x8xf32>, vector<8x8xf32>, vector<8x8xf32>, vector<8x8xf32>, vector<8x8xf32>, vector<8x8xf32>, vector<8x8xf32> -> vector<128x8xf32>
    %cst_29 = arith.constant dense<0.000000e+00> : vector<128x128xf32>
    %108 = tpu.matmul %107, %20, %cst_29 {dimension_numbers = #tpu.dot_dimension_numbers<[1], [0], [0], [1], [0, 0, 1, 1], [], []>} : vector<128x8xf32>, vector<8x128xf32>, vector<128x128xf32> -> vector<128x128xf32>
    %109 = vector.shape_cast %108 : vector<128x128xf32> to vector<16x8x128xf32>
    %110 = vector.shape_cast %90 : vector<8x128xf32> to vector<1x8x128xf32>
    %111 = vector.broadcast %110 : vector<1x8x128xf32> to vector<16x8x128xf32>
    %112 = arith.addf %109, %111 : vector<16x8x128xf32>
    %113 = vector.shape_cast %87 : vector<8x128xf32> to vector<1x8x128xf32>
    %114 = vector.extract_strided_slice %90 {offsets = [0, 0], sizes = [8, 8], strides = [1, 1]} : vector<8x128xf32> to vector<8x8xf32>
    %115 = vector.extract_strided_slice %90 {offsets = [0, 8], sizes = [8, 8], strides = [1, 1]} : vector<8x128xf32> to vector<8x8xf32>
    %116 = vector.extract_strided_slice %90 {offsets = [0, 16], sizes = [8, 8], strides = [1, 1]} : vector<8x128xf32> to vector<8x8xf32>
    %117 = vector.extract_strided_slice %90 {offsets = [0, 24], sizes = [8, 8], strides = [1, 1]} : vector<8x128xf32> to vector<8x8xf32>
    %118 = vector.extract_strided_slice %90 {offsets = [0, 32], sizes = [8, 8], strides = [1, 1]} : vector<8x128xf32> to vector<8x8xf32>
    %119 = vector.extract_strided_slice %90 {offsets = [0, 40], sizes = [8, 8], strides = [1, 1]} : vector<8x128xf32> to vector<8x8xf32>
    %120 = vector.extract_strided_slice %90 {offsets = [0, 48], sizes = [8, 8], strides = [1, 1]} : vector<8x128xf32> to vector<8x8xf32>
    %121 = vector.extract_strided_slice %90 {offsets = [0, 56], sizes = [8, 8], strides = [1, 1]} : vector<8x128xf32> to vector<8x8xf32>
    %122 = vector.extract_strided_slice %90 {offsets = [0, 64], sizes = [8, 8], strides = [1, 1]} : vector<8x128xf32> to vector<8x8xf32>
    %123 = vector.extract_strided_slice %90 {offsets = [0, 72], sizes = [8, 8], strides = [1, 1]} : vector<8x128xf32> to vector<8x8xf32>
    %124 = vector.extract_strided_slice %90 {offsets = [0, 80], sizes = [8, 8], strides = [1, 1]} : vector<8x128xf32> to vector<8x8xf32>
    %125 = vector.extract_strided_slice %90 {offsets = [0, 88], sizes = [8, 8], strides = [1, 1]} : vector<8x128xf32> to vector<8x8xf32>
    %126 = vector.extract_strided_slice %90 {offsets = [0, 96], sizes = [8, 8], strides = [1, 1]} : vector<8x128xf32> to vector<8x8xf32>
    %127 = vector.extract_strided_slice %90 {offsets = [0, 104], sizes = [8, 8], strides = [1, 1]} : vector<8x128xf32> to vector<8x8xf32>
    %128 = vector.extract_strided_slice %90 {offsets = [0, 112], sizes = [8, 8], strides = [1, 1]} : vector<8x128xf32> to vector<8x8xf32>
    %129 = vector.extract_strided_slice %90 {offsets = [0, 120], sizes = [8, 8], strides = [1, 1]} : vector<8x128xf32> to vector<8x8xf32>
    %130 = tpu.concatenate %114, %115, %116, %117, %118, %119, %120, %121, %122, %123, %124, %125, %126, %127, %128, %129 in 0 : vector<8x8xf32>, vector<8x8xf32>, vector<8x8xf32>, vector<8x8xf32>, vector<8x8xf32>, vector<8x8xf32>, vector<8x8xf32>, vector<8x8xf32>, vector<8x8xf32>, vector<8x8xf32>, vector<8x8xf32>, vector<8x8xf32>, vector<8x8xf32>, vector<8x8xf32>, vector<8x8xf32>, vector<8x8xf32> -> vector<128x8xf32>
    %cst_30 = arith.constant dense<0.000000e+00> : vector<128x128xf32>
    %131 = tpu.matmul %130, %20, %cst_30 {dimension_numbers = #tpu.dot_dimension_numbers<[1], [0], [0], [1], [0, 0, 1, 1], [], []>} : vector<128x8xf32>, vector<8x128xf32>, vector<128x128xf32> -> vector<128x128xf32>
    %132 = vector.shape_cast %131 : vector<128x128xf32> to vector<16x8x128xf32>
    %133 = vector.broadcast %113 : vector<1x8x128xf32> to vector<16x8x128xf32>
    %134 = arith.addf %133, %132 : vector<16x8x128xf32>
    %cst_31 = arith.constant 0.000000e+00 : f32
    %135 = vector.broadcast %cst_31 : f32 to vector<16x8x128xf32>
    %136 = arith.maximumf %112, %135 : vector<16x8x128xf32>
    %cst_32 = arith.constant 0.000000e+00 : f32
    %137 = vector.broadcast %cst_32 : f32 to vector<16x8x128xf32>
    %138 = arith.maximumf %134, %137 : vector<16x8x128xf32>
    %139 = vector.shape_cast %136 : vector<16x8x128xf32> to vector<128x128xf32>
    %140 = vector.shape_cast %138 : vector<16x8x128xf32> to vector<128x128xf32>
    %c0_33 = arith.constant 0 : index
    %c0_34 = arith.constant 0 : index
    %141 = vector.load %arg10[%c0_33, %c0_34] : memref<8x128xf32, #tpu.memory_space<vmem>>, vector<8x128xf32>
    %cst_35 = arith.constant dense<0.000000e+00> : vector<8x128xf32>
    %142 = tpu.matmul %141, %139, %cst_35 {dimension_numbers = #tpu.dot_dimension_numbers<[1], [0], [0], [1], [0, 0, 1, 1], [], []>} : vector<8x128xf32>, vector<128x128xf32>, vector<8x128xf32> -> vector<8x128xf32>
    %c0_36 = arith.constant 0 : index
    %c0_37 = arith.constant 0 : index
    %143 = vector.load %arg9[%c0_36, %c0_37] : memref<8x128xf32, #tpu.memory_space<vmem>>, vector<8x128xf32>
    %cst_38 = arith.constant dense<0.000000e+00> : vector<8x128xf32>
    %144 = tpu.matmul %143, %140, %cst_38 {dimension_numbers = #tpu.dot_dimension_numbers<[1], [0], [0], [1], [0, 0, 1, 1], [], []>} : vector<8x128xf32>, vector<128x128xf32>, vector<8x128xf32> -> vector<8x128xf32>
    %c0_39 = arith.constant 0 : index
    %c0_40 = arith.constant 0 : index
    %145 = vector.load %arg11[%c0_39, %c0_40] : memref<8x1xf32, #tpu.memory_space<vmem>>, vector<8x1xf32>
    %146 = vector.broadcast %145 : vector<8x1xf32> to vector<8x128xf32>
    %147 = arith.addf %142, %146 : vector<8x128xf32>
    %148 = vector.extract_strided_slice %144 {offsets = [0, 0], sizes = [8, 8], strides = [1, 1]} : vector<8x128xf32> to vector<8x8xf32>
    %149 = vector.extract_strided_slice %144 {offsets = [0, 8], sizes = [8, 8], strides = [1, 1]} : vector<8x128xf32> to vector<8x8xf32>
    %150 = vector.extract_strided_slice %144 {offsets = [0, 16], sizes = [8, 8], strides = [1, 1]} : vector<8x128xf32> to vector<8x8xf32>
    %151 = vector.extract_strided_slice %144 {offsets = [0, 24], sizes = [8, 8], strides = [1, 1]} : vector<8x128xf32> to vector<8x8xf32>
    %152 = vector.extract_strided_slice %144 {offsets = [0, 32], sizes = [8, 8], strides = [1, 1]} : vector<8x128xf32> to vector<8x8xf32>
    %153 = vector.extract_strided_slice %144 {offsets = [0, 40], sizes = [8, 8], strides = [1, 1]} : vector<8x128xf32> to vector<8x8xf32>
    %154 = vector.extract_strided_slice %144 {offsets = [0, 48], sizes = [8, 8], strides = [1, 1]} : vector<8x128xf32> to vector<8x8xf32>
    %155 = vector.extract_strided_slice %144 {offsets = [0, 56], sizes = [8, 8], strides = [1, 1]} : vector<8x128xf32> to vector<8x8xf32>
    %156 = vector.extract_strided_slice %144 {offsets = [0, 64], sizes = [8, 8], strides = [1, 1]} : vector<8x128xf32> to vector<8x8xf32>
    %157 = vector.extract_strided_slice %144 {offsets = [0, 72], sizes = [8, 8], strides = [1, 1]} : vector<8x128xf32> to vector<8x8xf32>
    %158 = vector.extract_strided_slice %144 {offsets = [0, 80], sizes = [8, 8], strides = [1, 1]} : vector<8x128xf32> to vector<8x8xf32>
    %159 = vector.extract_strided_slice %144 {offsets = [0, 88], sizes = [8, 8], strides = [1, 1]} : vector<8x128xf32> to vector<8x8xf32>
    %160 = vector.extract_strided_slice %144 {offsets = [0, 96], sizes = [8, 8], strides = [1, 1]} : vector<8x128xf32> to vector<8x8xf32>
    %161 = vector.extract_strided_slice %144 {offsets = [0, 104], sizes = [8, 8], strides = [1, 1]} : vector<8x128xf32> to vector<8x8xf32>
    %162 = vector.extract_strided_slice %144 {offsets = [0, 112], sizes = [8, 8], strides = [1, 1]} : vector<8x128xf32> to vector<8x8xf32>
    %163 = vector.extract_strided_slice %144 {offsets = [0, 120], sizes = [8, 8], strides = [1, 1]} : vector<8x128xf32> to vector<8x8xf32>
    %164 = tpu.concatenate %148, %149, %150, %151, %152, %153, %154, %155, %156, %157, %158, %159, %160, %161, %162, %163 in 0 : vector<8x8xf32>, vector<8x8xf32>, vector<8x8xf32>, vector<8x8xf32>, vector<8x8xf32>, vector<8x8xf32>, vector<8x8xf32>, vector<8x8xf32>, vector<8x8xf32>, vector<8x8xf32>, vector<8x8xf32>, vector<8x8xf32>, vector<8x8xf32>, vector<8x8xf32>, vector<8x8xf32>, vector<8x8xf32> -> vector<128x8xf32>
    %cst_41 = arith.constant dense<0.000000e+00> : vector<128x128xf32>
    %165 = tpu.matmul %164, %20, %cst_41 {dimension_numbers = #tpu.dot_dimension_numbers<[1], [0], [0], [1], [0, 0, 1, 1], [], []>} : vector<128x8xf32>, vector<8x128xf32>, vector<128x128xf32> -> vector<128x128xf32>
    %166 = vector.shape_cast %165 : vector<128x128xf32> to vector<16x8x128xf32>
    %167 = vector.shape_cast %147 : vector<8x128xf32> to vector<1x8x128xf32>
    %168 = vector.broadcast %167 : vector<1x8x128xf32> to vector<16x8x128xf32>
    %169 = arith.addf %166, %168 : vector<16x8x128xf32>
    %170 = vector.shape_cast %144 : vector<8x128xf32> to vector<1x8x128xf32>
    %171 = vector.extract_strided_slice %147 {offsets = [0, 0], sizes = [8, 8], strides = [1, 1]} : vector<8x128xf32> to vector<8x8xf32>
    %172 = vector.extract_strided_slice %147 {offsets = [0, 8], sizes = [8, 8], strides = [1, 1]} : vector<8x128xf32> to vector<8x8xf32>
    %173 = vector.extract_strided_slice %147 {offsets = [0, 16], sizes = [8, 8], strides = [1, 1]} : vector<8x128xf32> to vector<8x8xf32>
    %174 = vector.extract_strided_slice %147 {offsets = [0, 24], sizes = [8, 8], strides = [1, 1]} : vector<8x128xf32> to vector<8x8xf32>
    %175 = vector.extract_strided_slice %147 {offsets = [0, 32], sizes = [8, 8], strides = [1, 1]} : vector<8x128xf32> to vector<8x8xf32>
    %176 = vector.extract_strided_slice %147 {offsets = [0, 40], sizes = [8, 8], strides = [1, 1]} : vector<8x128xf32> to vector<8x8xf32>
    %177 = vector.extract_strided_slice %147 {offsets = [0, 48], sizes = [8, 8], strides = [1, 1]} : vector<8x128xf32> to vector<8x8xf32>
    %178 = vector.extract_strided_slice %147 {offsets = [0, 56], sizes = [8, 8], strides = [1, 1]} : vector<8x128xf32> to vector<8x8xf32>
    %179 = vector.extract_strided_slice %147 {offsets = [0, 64], sizes = [8, 8], strides = [1, 1]} : vector<8x128xf32> to vector<8x8xf32>
    %180 = vector.extract_strided_slice %147 {offsets = [0, 72], sizes = [8, 8], strides = [1, 1]} : vector<8x128xf32> to vector<8x8xf32>
    %181 = vector.extract_strided_slice %147 {offsets = [0, 80], sizes = [8, 8], strides = [1, 1]} : vector<8x128xf32> to vector<8x8xf32>
    %182 = vector.extract_strided_slice %147 {offsets = [0, 88], sizes = [8, 8], strides = [1, 1]} : vector<8x128xf32> to vector<8x8xf32>
    %183 = vector.extract_strided_slice %147 {offsets = [0, 96], sizes = [8, 8], strides = [1, 1]} : vector<8x128xf32> to vector<8x8xf32>
    %184 = vector.extract_strided_slice %147 {offsets = [0, 104], sizes = [8, 8], strides = [1, 1]} : vector<8x128xf32> to vector<8x8xf32>
    %185 = vector.extract_strided_slice %147 {offsets = [0, 112], sizes = [8, 8], strides = [1, 1]} : vector<8x128xf32> to vector<8x8xf32>
    %186 = vector.extract_strided_slice %147 {offsets = [0, 120], sizes = [8, 8], strides = [1, 1]} : vector<8x128xf32> to vector<8x8xf32>
    %187 = tpu.concatenate %171, %172, %173, %174, %175, %176, %177, %178, %179, %180, %181, %182, %183, %184, %185, %186 in 0 : vector<8x8xf32>, vector<8x8xf32>, vector<8x8xf32>, vector<8x8xf32>, vector<8x8xf32>, vector<8x8xf32>, vector<8x8xf32>, vector<8x8xf32>, vector<8x8xf32>, vector<8x8xf32>, vector<8x8xf32>, vector<8x8xf32>, vector<8x8xf32>, vector<8x8xf32>, vector<8x8xf32>, vector<8x8xf32> -> vector<128x8xf32>
    %cst_42 = arith.constant dense<0.000000e+00> : vector<128x128xf32>
    %188 = tpu.matmul %187, %20, %cst_42 {dimension_numbers = #tpu.dot_dimension_numbers<[1], [0], [0], [1], [0, 0, 1, 1], [], []>} : vector<128x8xf32>, vector<8x128xf32>, vector<128x128xf32> -> vector<128x128xf32>
    %189 = vector.shape_cast %188 : vector<128x128xf32> to vector<16x8x128xf32>
    %190 = vector.broadcast %170 : vector<1x8x128xf32> to vector<16x8x128xf32>
    %191 = arith.addf %190, %189 : vector<16x8x128xf32>
    %192 = arith.addf %79, %169 : vector<16x8x128xf32>
    %cst_43 = arith.constant 0.000000e+00 : f32
    %193 = vector.broadcast %cst_43 : f32 to vector<16x8x128xf32>
    %194 = arith.maximumf %192, %193 : vector<16x8x128xf32>
    %195 = arith.addf %81, %191 : vector<16x8x128xf32>
    %cst_44 = arith.constant 0.000000e+00 : f32
    %196 = vector.broadcast %cst_44 : f32 to vector<16x8x128xf32>
    %197 = arith.maximumf %195, %196 : vector<16x8x128xf32>
    %198 = vector.shape_cast %194 : vector<16x8x128xf32> to vector<128x128xf32>
    %199 = vector.shape_cast %197 : vector<16x8x128xf32> to vector<128x128xf32>
    %c0_45 = arith.constant 0 : index
    %c0_46 = arith.constant 0 : index
    %200 = vector.load %arg13[%c0_45, %c0_46] : memref<8x128xf32, #tpu.memory_space<vmem>>, vector<8x128xf32>
    %cst_47 = arith.constant dense<0.000000e+00> : vector<8x128xf32>
    %201 = tpu.matmul %200, %198, %cst_47 {dimension_numbers = #tpu.dot_dimension_numbers<[1], [0], [0], [1], [0, 0, 1, 1], [], []>} : vector<8x128xf32>, vector<128x128xf32>, vector<8x128xf32> -> vector<8x128xf32>
    %c0_48 = arith.constant 0 : index
    %c0_49 = arith.constant 0 : index
    %202 = vector.load %arg12[%c0_48, %c0_49] : memref<8x128xf32, #tpu.memory_space<vmem>>, vector<8x128xf32>
    %cst_50 = arith.constant dense<0.000000e+00> : vector<8x128xf32>
    %203 = tpu.matmul %202, %199, %cst_50 {dimension_numbers = #tpu.dot_dimension_numbers<[1], [0], [0], [1], [0, 0, 1, 1], [], []>} : vector<8x128xf32>, vector<128x128xf32>, vector<8x128xf32> -> vector<8x128xf32>
    %c0_51 = arith.constant 0 : index
    %c0_52 = arith.constant 0 : index
    %204 = vector.load %arg14[%c0_51, %c0_52] : memref<8x1xf32, #tpu.memory_space<vmem>>, vector<8x1xf32>
    %205 = vector.broadcast %204 : vector<8x1xf32> to vector<8x128xf32>
    %206 = arith.addf %201, %205 : vector<8x128xf32>
    %207 = vector.extract_strided_slice %203 {offsets = [0, 0], sizes = [8, 8], strides = [1, 1]} : vector<8x128xf32> to vector<8x8xf32>
    %208 = vector.extract_strided_slice %203 {offsets = [0, 8], sizes = [8, 8], strides = [1, 1]} : vector<8x128xf32> to vector<8x8xf32>
    %209 = vector.extract_strided_slice %203 {offsets = [0, 16], sizes = [8, 8], strides = [1, 1]} : vector<8x128xf32> to vector<8x8xf32>
    %210 = vector.extract_strided_slice %203 {offsets = [0, 24], sizes = [8, 8], strides = [1, 1]} : vector<8x128xf32> to vector<8x8xf32>
    %211 = vector.extract_strided_slice %203 {offsets = [0, 32], sizes = [8, 8], strides = [1, 1]} : vector<8x128xf32> to vector<8x8xf32>
    %212 = vector.extract_strided_slice %203 {offsets = [0, 40], sizes = [8, 8], strides = [1, 1]} : vector<8x128xf32> to vector<8x8xf32>
    %213 = vector.extract_strided_slice %203 {offsets = [0, 48], sizes = [8, 8], strides = [1, 1]} : vector<8x128xf32> to vector<8x8xf32>
    %214 = vector.extract_strided_slice %203 {offsets = [0, 56], sizes = [8, 8], strides = [1, 1]} : vector<8x128xf32> to vector<8x8xf32>
    %215 = vector.extract_strided_slice %203 {offsets = [0, 64], sizes = [8, 8], strides = [1, 1]} : vector<8x128xf32> to vector<8x8xf32>
    %216 = vector.extract_strided_slice %203 {offsets = [0, 72], sizes = [8, 8], strides = [1, 1]} : vector<8x128xf32> to vector<8x8xf32>
    %217 = vector.extract_strided_slice %203 {offsets = [0, 80], sizes = [8, 8], strides = [1, 1]} : vector<8x128xf32> to vector<8x8xf32>
    %218 = vector.extract_strided_slice %203 {offsets = [0, 88], sizes = [8, 8], strides = [1, 1]} : vector<8x128xf32> to vector<8x8xf32>
    %219 = vector.extract_strided_slice %203 {offsets = [0, 96], sizes = [8, 8], strides = [1, 1]} : vector<8x128xf32> to vector<8x8xf32>
    %220 = vector.extract_strided_slice %203 {offsets = [0, 104], sizes = [8, 8], strides = [1, 1]} : vector<8x128xf32> to vector<8x8xf32>
    %221 = vector.extract_strided_slice %203 {offsets = [0, 112], sizes = [8, 8], strides = [1, 1]} : vector<8x128xf32> to vector<8x8xf32>
    %222 = vector.extract_strided_slice %203 {offsets = [0, 120], sizes = [8, 8], strides = [1, 1]} : vector<8x128xf32> to vector<8x8xf32>
    %223 = tpu.concatenate %207, %208, %209, %210, %211, %212, %213, %214, %215, %216, %217, %218, %219, %220, %221, %222 in 0 : vector<8x8xf32>, vector<8x8xf32>, vector<8x8xf32>, vector<8x8xf32>, vector<8x8xf32>, vector<8x8xf32>, vector<8x8xf32>, vector<8x8xf32>, vector<8x8xf32>, vector<8x8xf32>, vector<8x8xf32>, vector<8x8xf32>, vector<8x8xf32>, vector<8x8xf32>, vector<8x8xf32>, vector<8x8xf32> -> vector<128x8xf32>
    %cst_53 = arith.constant dense<0.000000e+00> : vector<128x128xf32>
    %224 = tpu.matmul %223, %20, %cst_53 {dimension_numbers = #tpu.dot_dimension_numbers<[1], [0], [0], [1], [0, 0, 1, 1], [], []>} : vector<128x8xf32>, vector<8x128xf32>, vector<128x128xf32> -> vector<128x128xf32>
    %225 = vector.shape_cast %224 : vector<128x128xf32> to vector<16x8x128xf32>
    %226 = vector.shape_cast %206 : vector<8x128xf32> to vector<1x8x128xf32>
    %227 = vector.broadcast %226 : vector<1x8x128xf32> to vector<16x8x128xf32>
    %228 = arith.addf %225, %227 : vector<16x8x128xf32>
    %229 = vector.shape_cast %203 : vector<8x128xf32> to vector<1x8x128xf32>
    %230 = vector.extract_strided_slice %206 {offsets = [0, 0], sizes = [8, 8], strides = [1, 1]} : vector<8x128xf32> to vector<8x8xf32>
    %231 = vector.extract_strided_slice %206 {offsets = [0, 8], sizes = [8, 8], strides = [1, 1]} : vector<8x128xf32> to vector<8x8xf32>
    %232 = vector.extract_strided_slice %206 {offsets = [0, 16], sizes = [8, 8], strides = [1, 1]} : vector<8x128xf32> to vector<8x8xf32>
    %233 = vector.extract_strided_slice %206 {offsets = [0, 24], sizes = [8, 8], strides = [1, 1]} : vector<8x128xf32> to vector<8x8xf32>
    %234 = vector.extract_strided_slice %206 {offsets = [0, 32], sizes = [8, 8], strides = [1, 1]} : vector<8x128xf32> to vector<8x8xf32>
    %235 = vector.extract_strided_slice %206 {offsets = [0, 40], sizes = [8, 8], strides = [1, 1]} : vector<8x128xf32> to vector<8x8xf32>
    %236 = vector.extract_strided_slice %206 {offsets = [0, 48], sizes = [8, 8], strides = [1, 1]} : vector<8x128xf32> to vector<8x8xf32>
    %237 = vector.extract_strided_slice %206 {offsets = [0, 56], sizes = [8, 8], strides = [1, 1]} : vector<8x128xf32> to vector<8x8xf32>
    %238 = vector.extract_strided_slice %206 {offsets = [0, 64], sizes = [8, 8], strides = [1, 1]} : vector<8x128xf32> to vector<8x8xf32>
    %239 = vector.extract_strided_slice %206 {offsets = [0, 72], sizes = [8, 8], strides = [1, 1]} : vector<8x128xf32> to vector<8x8xf32>
    %240 = vector.extract_strided_slice %206 {offsets = [0, 80], sizes = [8, 8], strides = [1, 1]} : vector<8x128xf32> to vector<8x8xf32>
    %241 = vector.extract_strided_slice %206 {offsets = [0, 88], sizes = [8, 8], strides = [1, 1]} : vector<8x128xf32> to vector<8x8xf32>
    %242 = vector.extract_strided_slice %206 {offsets = [0, 96], sizes = [8, 8], strides = [1, 1]} : vector<8x128xf32> to vector<8x8xf32>
    %243 = vector.extract_strided_slice %206 {offsets = [0, 104], sizes = [8, 8], strides = [1, 1]} : vector<8x128xf32> to vector<8x8xf32>
    %244 = vector.extract_strided_slice %206 {offsets = [0, 112], sizes = [8, 8], strides = [1, 1]} : vector<8x128xf32> to vector<8x8xf32>
    %245 = vector.extract_strided_slice %206 {offsets = [0, 120], sizes = [8, 8], strides = [1, 1]} : vector<8x128xf32> to vector<8x8xf32>
    %246 = tpu.concatenate %230, %231, %232, %233, %234, %235, %236, %237, %238, %239, %240, %241, %242, %243, %244, %245 in 0 : vector<8x8xf32>, vector<8x8xf32>, vector<8x8xf32>, vector<8x8xf32>, vector<8x8xf32>, vector<8x8xf32>, vector<8x8xf32>, vector<8x8xf32>, vector<8x8xf32>, vector<8x8xf32>, vector<8x8xf32>, vector<8x8xf32>, vector<8x8xf32>, vector<8x8xf32>, vector<8x8xf32>, vector<8x8xf32> -> vector<128x8xf32>
    %cst_54 = arith.constant dense<0.000000e+00> : vector<128x128xf32>
    %247 = tpu.matmul %246, %20, %cst_54 {dimension_numbers = #tpu.dot_dimension_numbers<[1], [0], [0], [1], [0, 0, 1, 1], [], []>} : vector<128x8xf32>, vector<8x128xf32>, vector<128x128xf32> -> vector<128x128xf32>
    %248 = vector.shape_cast %247 : vector<128x128xf32> to vector<16x8x128xf32>
    %249 = vector.broadcast %229 : vector<1x8x128xf32> to vector<16x8x128xf32>
    %250 = arith.addf %249, %248 : vector<16x8x128xf32>
    %cst_55 = arith.constant 0.000000e+00 : f32
    %251 = vector.broadcast %cst_55 : f32 to vector<16x8x128xf32>
    %252 = arith.maximumf %228, %251 : vector<16x8x128xf32>
    %cst_56 = arith.constant 0.000000e+00 : f32
    %253 = vector.broadcast %cst_56 : f32 to vector<16x8x128xf32>
    %254 = arith.maximumf %250, %253 : vector<16x8x128xf32>
    %255 = vector.shape_cast %252 : vector<16x8x128xf32> to vector<128x128xf32>
    %256 = vector.shape_cast %254 : vector<16x8x128xf32> to vector<128x128xf32>
    %c0_57 = arith.constant 0 : index
    %c0_58 = arith.constant 0 : index
    %257 = vector.load %arg16[%c0_57, %c0_58] : memref<8x128xf32, #tpu.memory_space<vmem>>, vector<8x128xf32>
    %cst_59 = arith.constant dense<0.000000e+00> : vector<8x128xf32>
    %258 = tpu.matmul %257, %255, %cst_59 {dimension_numbers = #tpu.dot_dimension_numbers<[1], [0], [0], [1], [0, 0, 1, 1], [], []>} : vector<8x128xf32>, vector<128x128xf32>, vector<8x128xf32> -> vector<8x128xf32>
    %c0_60 = arith.constant 0 : index
    %c0_61 = arith.constant 0 : index
    %259 = vector.load %arg15[%c0_60, %c0_61] : memref<8x128xf32, #tpu.memory_space<vmem>>, vector<8x128xf32>
    %cst_62 = arith.constant dense<0.000000e+00> : vector<8x128xf32>
    %260 = tpu.matmul %259, %256, %cst_62 {dimension_numbers = #tpu.dot_dimension_numbers<[1], [0], [0], [1], [0, 0, 1, 1], [], []>} : vector<8x128xf32>, vector<128x128xf32>, vector<8x128xf32> -> vector<8x128xf32>
    %c0_63 = arith.constant 0 : index
    %c0_64 = arith.constant 0 : index
    %261 = vector.load %arg17[%c0_63, %c0_64] : memref<8x1xf32, #tpu.memory_space<vmem>>, vector<8x1xf32>
    %262 = vector.broadcast %261 : vector<8x1xf32> to vector<8x128xf32>
    %263 = arith.addf %258, %262 : vector<8x128xf32>
    %264 = vector.extract_strided_slice %260 {offsets = [0, 0], sizes = [8, 8], strides = [1, 1]} : vector<8x128xf32> to vector<8x8xf32>
    %265 = vector.extract_strided_slice %260 {offsets = [0, 8], sizes = [8, 8], strides = [1, 1]} : vector<8x128xf32> to vector<8x8xf32>
    %266 = vector.extract_strided_slice %260 {offsets = [0, 16], sizes = [8, 8], strides = [1, 1]} : vector<8x128xf32> to vector<8x8xf32>
    %267 = vector.extract_strided_slice %260 {offsets = [0, 24], sizes = [8, 8], strides = [1, 1]} : vector<8x128xf32> to vector<8x8xf32>
    %268 = vector.extract_strided_slice %260 {offsets = [0, 32], sizes = [8, 8], strides = [1, 1]} : vector<8x128xf32> to vector<8x8xf32>
    %269 = vector.extract_strided_slice %260 {offsets = [0, 40], sizes = [8, 8], strides = [1, 1]} : vector<8x128xf32> to vector<8x8xf32>
    %270 = vector.extract_strided_slice %260 {offsets = [0, 48], sizes = [8, 8], strides = [1, 1]} : vector<8x128xf32> to vector<8x8xf32>
    %271 = vector.extract_strided_slice %260 {offsets = [0, 56], sizes = [8, 8], strides = [1, 1]} : vector<8x128xf32> to vector<8x8xf32>
    %272 = vector.extract_strided_slice %260 {offsets = [0, 64], sizes = [8, 8], strides = [1, 1]} : vector<8x128xf32> to vector<8x8xf32>
    %273 = vector.extract_strided_slice %260 {offsets = [0, 72], sizes = [8, 8], strides = [1, 1]} : vector<8x128xf32> to vector<8x8xf32>
    %274 = vector.extract_strided_slice %260 {offsets = [0, 80], sizes = [8, 8], strides = [1, 1]} : vector<8x128xf32> to vector<8x8xf32>
    %275 = vector.extract_strided_slice %260 {offsets = [0, 88], sizes = [8, 8], strides = [1, 1]} : vector<8x128xf32> to vector<8x8xf32>
    %276 = vector.extract_strided_slice %260 {offsets = [0, 96], sizes = [8, 8], strides = [1, 1]} : vector<8x128xf32> to vector<8x8xf32>
    %277 = vector.extract_strided_slice %260 {offsets = [0, 104], sizes = [8, 8], strides = [1, 1]} : vector<8x128xf32> to vector<8x8xf32>
    %278 = vector.extract_strided_slice %260 {offsets = [0, 112], sizes = [8, 8], strides = [1, 1]} : vector<8x128xf32> to vector<8x8xf32>
    %279 = vector.extract_strided_slice %260 {offsets = [0, 120], sizes = [8, 8], strides = [1, 1]} : vector<8x128xf32> to vector<8x8xf32>
    %280 = tpu.concatenate %264, %265, %266, %267, %268, %269, %270, %271, %272, %273, %274, %275, %276, %277, %278, %279 in 0 : vector<8x8xf32>, vector<8x8xf32>, vector<8x8xf32>, vector<8x8xf32>, vector<8x8xf32>, vector<8x8xf32>, vector<8x8xf32>, vector<8x8xf32>, vector<8x8xf32>, vector<8x8xf32>, vector<8x8xf32>, vector<8x8xf32>, vector<8x8xf32>, vector<8x8xf32>, vector<8x8xf32>, vector<8x8xf32> -> vector<128x8xf32>
    %cst_65 = arith.constant dense<0.000000e+00> : vector<128x128xf32>
    %281 = tpu.matmul %280, %20, %cst_65 {dimension_numbers = #tpu.dot_dimension_numbers<[1], [0], [0], [1], [0, 0, 1, 1], [], []>} : vector<128x8xf32>, vector<8x128xf32>, vector<128x128xf32> -> vector<128x128xf32>
    %282 = vector.shape_cast %281 : vector<128x128xf32> to vector<16x8x128xf32>
    %283 = vector.shape_cast %263 : vector<8x128xf32> to vector<1x8x128xf32>
    %284 = vector.broadcast %283 : vector<1x8x128xf32> to vector<16x8x128xf32>
    %285 = arith.addf %282, %284 : vector<16x8x128xf32>
    %286 = vector.shape_cast %260 : vector<8x128xf32> to vector<1x8x128xf32>
    %287 = vector.extract_strided_slice %263 {offsets = [0, 0], sizes = [8, 8], strides = [1, 1]} : vector<8x128xf32> to vector<8x8xf32>
    %288 = vector.extract_strided_slice %263 {offsets = [0, 8], sizes = [8, 8], strides = [1, 1]} : vector<8x128xf32> to vector<8x8xf32>
    %289 = vector.extract_strided_slice %263 {offsets = [0, 16], sizes = [8, 8], strides = [1, 1]} : vector<8x128xf32> to vector<8x8xf32>
    %290 = vector.extract_strided_slice %263 {offsets = [0, 24], sizes = [8, 8], strides = [1, 1]} : vector<8x128xf32> to vector<8x8xf32>
    %291 = vector.extract_strided_slice %263 {offsets = [0, 32], sizes = [8, 8], strides = [1, 1]} : vector<8x128xf32> to vector<8x8xf32>
    %292 = vector.extract_strided_slice %263 {offsets = [0, 40], sizes = [8, 8], strides = [1, 1]} : vector<8x128xf32> to vector<8x8xf32>
    %293 = vector.extract_strided_slice %263 {offsets = [0, 48], sizes = [8, 8], strides = [1, 1]} : vector<8x128xf32> to vector<8x8xf32>
    %294 = vector.extract_strided_slice %263 {offsets = [0, 56], sizes = [8, 8], strides = [1, 1]} : vector<8x128xf32> to vector<8x8xf32>
    %295 = vector.extract_strided_slice %263 {offsets = [0, 64], sizes = [8, 8], strides = [1, 1]} : vector<8x128xf32> to vector<8x8xf32>
    %296 = vector.extract_strided_slice %263 {offsets = [0, 72], sizes = [8, 8], strides = [1, 1]} : vector<8x128xf32> to vector<8x8xf32>
    %297 = vector.extract_strided_slice %263 {offsets = [0, 80], sizes = [8, 8], strides = [1, 1]} : vector<8x128xf32> to vector<8x8xf32>
    %298 = vector.extract_strided_slice %263 {offsets = [0, 88], sizes = [8, 8], strides = [1, 1]} : vector<8x128xf32> to vector<8x8xf32>
    %299 = vector.extract_strided_slice %263 {offsets = [0, 96], sizes = [8, 8], strides = [1, 1]} : vector<8x128xf32> to vector<8x8xf32>
    %300 = vector.extract_strided_slice %263 {offsets = [0, 104], sizes = [8, 8], strides = [1, 1]} : vector<8x128xf32> to vector<8x8xf32>
    %301 = vector.extract_strided_slice %263 {offsets = [0, 112], sizes = [8, 8], strides = [1, 1]} : vector<8x128xf32> to vector<8x8xf32>
    %302 = vector.extract_strided_slice %263 {offsets = [0, 120], sizes = [8, 8], strides = [1, 1]} : vector<8x128xf32> to vector<8x8xf32>
    %303 = tpu.concatenate %287, %288, %289, %290, %291, %292, %293, %294, %295, %296, %297, %298, %299, %300, %301, %302 in 0 : vector<8x8xf32>, vector<8x8xf32>, vector<8x8xf32>, vector<8x8xf32>, vector<8x8xf32>, vector<8x8xf32>, vector<8x8xf32>, vector<8x8xf32>, vector<8x8xf32>, vector<8x8xf32>, vector<8x8xf32>, vector<8x8xf32>, vector<8x8xf32>, vector<8x8xf32>, vector<8x8xf32>, vector<8x8xf32> -> vector<128x8xf32>
    %cst_66 = arith.constant dense<0.000000e+00> : vector<128x128xf32>
    %304 = tpu.matmul %303, %20, %cst_66 {dimension_numbers = #tpu.dot_dimension_numbers<[1], [0], [0], [1], [0, 0, 1, 1], [], []>} : vector<128x8xf32>, vector<8x128xf32>, vector<128x128xf32> -> vector<128x128xf32>
    %305 = vector.shape_cast %304 : vector<128x128xf32> to vector<16x8x128xf32>
    %306 = vector.broadcast %286 : vector<1x8x128xf32> to vector<16x8x128xf32>
    %307 = arith.addf %306, %305 : vector<16x8x128xf32>
    %308 = arith.addf %194, %285 : vector<16x8x128xf32>
    %cst_67 = arith.constant 0.000000e+00 : f32
    %309 = vector.broadcast %cst_67 : f32 to vector<16x8x128xf32>
    %310 = arith.maximumf %308, %309 : vector<16x8x128xf32>
    %311 = arith.addf %197, %307 : vector<16x8x128xf32>
    %cst_68 = arith.constant 0.000000e+00 : f32
    %312 = vector.broadcast %cst_68 : f32 to vector<16x8x128xf32>
    %313 = arith.maximumf %311, %312 : vector<16x8x128xf32>
    %314 = vector.shape_cast %310 : vector<16x8x128xf32> to vector<128x128xf32>
    %315 = vector.shape_cast %313 : vector<16x8x128xf32> to vector<128x128xf32>
    %c0_69 = arith.constant 0 : index
    %c0_70 = arith.constant 0 : index
    %316 = vector.load %arg19[%c0_69, %c0_70] : memref<16x128xf32, #tpu.memory_space<vmem>>, vector<16x128xf32>
    %cst_71 = arith.constant dense<0.000000e+00> : vector<16x128xf32>
    %317 = tpu.matmul %316, %314, %cst_71 {dimension_numbers = #tpu.dot_dimension_numbers<[1], [0], [0], [1], [0, 0, 1, 1], [], []>} : vector<16x128xf32>, vector<128x128xf32>, vector<16x128xf32> -> vector<16x128xf32>
    %c0_72 = arith.constant 0 : index
    %c0_73 = arith.constant 0 : index
    %318 = vector.load %arg18[%c0_72, %c0_73] : memref<16x128xf32, #tpu.memory_space<vmem>>, vector<16x128xf32>
    %cst_74 = arith.constant dense<0.000000e+00> : vector<16x128xf32>
    %319 = tpu.matmul %318, %315, %cst_74 {dimension_numbers = #tpu.dot_dimension_numbers<[1], [0], [0], [1], [0, 0, 1, 1], [], []>} : vector<16x128xf32>, vector<128x128xf32>, vector<16x128xf32> -> vector<16x128xf32>
    %c0_75 = arith.constant 0 : index
    %c0_76 = arith.constant 0 : index
    %320 = vector.load %arg20[%c0_75, %c0_76] : memref<16x1xf32, #tpu.memory_space<vmem>>, vector<16x1xf32>
    %321 = vector.broadcast %320 : vector<16x1xf32> to vector<16x128xf32>
    %322 = arith.addf %317, %321 : vector<16x128xf32>
    %323 = vector.extract_strided_slice %319 {offsets = [0, 0], sizes = [16, 8], strides = [1, 1]} : vector<16x128xf32> to vector<16x8xf32>
    %324 = vector.extract_strided_slice %319 {offsets = [0, 8], sizes = [16, 8], strides = [1, 1]} : vector<16x128xf32> to vector<16x8xf32>
    %325 = vector.extract_strided_slice %319 {offsets = [0, 16], sizes = [16, 8], strides = [1, 1]} : vector<16x128xf32> to vector<16x8xf32>
    %326 = vector.extract_strided_slice %319 {offsets = [0, 24], sizes = [16, 8], strides = [1, 1]} : vector<16x128xf32> to vector<16x8xf32>
    %327 = vector.extract_strided_slice %319 {offsets = [0, 32], sizes = [16, 8], strides = [1, 1]} : vector<16x128xf32> to vector<16x8xf32>
    %328 = vector.extract_strided_slice %319 {offsets = [0, 40], sizes = [16, 8], strides = [1, 1]} : vector<16x128xf32> to vector<16x8xf32>
    %329 = vector.extract_strided_slice %319 {offsets = [0, 48], sizes = [16, 8], strides = [1, 1]} : vector<16x128xf32> to vector<16x8xf32>
    %330 = vector.extract_strided_slice %319 {offsets = [0, 56], sizes = [16, 8], strides = [1, 1]} : vector<16x128xf32> to vector<16x8xf32>
    %331 = vector.extract_strided_slice %319 {offsets = [0, 64], sizes = [16, 8], strides = [1, 1]} : vector<16x128xf32> to vector<16x8xf32>
    %332 = vector.extract_strided_slice %319 {offsets = [0, 72], sizes = [16, 8], strides = [1, 1]} : vector<16x128xf32> to vector<16x8xf32>
    %333 = vector.extract_strided_slice %319 {offsets = [0, 80], sizes = [16, 8], strides = [1, 1]} : vector<16x128xf32> to vector<16x8xf32>
    %334 = vector.extract_strided_slice %319 {offsets = [0, 88], sizes = [16, 8], strides = [1, 1]} : vector<16x128xf32> to vector<16x8xf32>
    %335 = vector.extract_strided_slice %319 {offsets = [0, 96], sizes = [16, 8], strides = [1, 1]} : vector<16x128xf32> to vector<16x8xf32>
    %336 = vector.extract_strided_slice %319 {offsets = [0, 104], sizes = [16, 8], strides = [1, 1]} : vector<16x128xf32> to vector<16x8xf32>
    %337 = vector.extract_strided_slice %319 {offsets = [0, 112], sizes = [16, 8], strides = [1, 1]} : vector<16x128xf32> to vector<16x8xf32>
    %338 = vector.extract_strided_slice %319 {offsets = [0, 120], sizes = [16, 8], strides = [1, 1]} : vector<16x128xf32> to vector<16x8xf32>
    %339 = tpu.concatenate %323, %324, %325, %326, %327, %328, %329, %330, %331, %332, %333, %334, %335, %336, %337, %338 in 0 : vector<16x8xf32>, vector<16x8xf32>, vector<16x8xf32>, vector<16x8xf32>, vector<16x8xf32>, vector<16x8xf32>, vector<16x8xf32>, vector<16x8xf32>, vector<16x8xf32>, vector<16x8xf32>, vector<16x8xf32>, vector<16x8xf32>, vector<16x8xf32>, vector<16x8xf32>, vector<16x8xf32>, vector<16x8xf32> -> vector<256x8xf32>
    %cst_77 = arith.constant dense<0.000000e+00> : vector<256x128xf32>
    %340 = tpu.matmul %339, %20, %cst_77 {dimension_numbers = #tpu.dot_dimension_numbers<[1], [0], [0], [1], [0, 0, 1, 1], [], []>} : vector<256x8xf32>, vector<8x128xf32>, vector<256x128xf32> -> vector<256x128xf32>
    %341 = vector.shape_cast %340 : vector<256x128xf32> to vector<16x16x128xf32>
    %342 = vector.shape_cast %322 : vector<16x128xf32> to vector<1x16x128xf32>
    %343 = vector.broadcast %342 : vector<1x16x128xf32> to vector<16x16x128xf32>
    %344 = arith.addf %341, %343 : vector<16x16x128xf32>
    %c0_78 = arith.constant 0 : index
    %c0_79 = arith.constant 0 : index
    %c0_80 = arith.constant 0 : index
    %c0_81 = arith.constant 0 : index
    %345 = vector.load %arg21[%c0_78, %c0_79, %c0_80, %c0_81] : memref<1x16x16x128xf32, #tpu.memory_space<vmem>>, vector<1x16x16x128xf32>
    %346 = vector.shape_cast %345 : vector<1x16x16x128xf32> to vector<16x16x128xf32>
    %347 = vector.shape_cast %344 : vector<16x16x128xf32> to vector<1x16x16x128xf32>
    tpu.vector_store %arg21[%c0_78, %c0_79, %c0_80, %c0_81], %347 {strides = array<i32>} : memref<1x16x16x128xf32, #tpu.memory_space<vmem>>, vector<1x16x16x128xf32>,
    return
  }
  func.func @transform_0(%arg0: i32) -> (i32, i32, i32, i32) {
    %c0_i32 = arith.constant 0 : i32
    %c0_i32_0 = arith.constant 0 : i32
    %c0_i32_1 = arith.constant 0 : i32
    %c0_i32_2 = arith.constant 0 : i32
    return %arg0, %c0_i32, %c0_i32_0, %c0_i32_1 : i32, i32, i32, i32
  }
  func.func @transform_1(%arg0: i32) -> (i32, i32, i32, i32) {
    %c0_i32 = arith.constant 0 : i32
    %c0_i32_0 = arith.constant 0 : i32
    %c0_i32_1 = arith.constant 0 : i32
    %c0_i32_2 = arith.constant 0 : i32
    return %arg0, %c0_i32, %c0_i32_0, %c0_i32_1 : i32, i32, i32, i32
  }
  func.func @transform_2(%arg0: i32) -> (i32, i32) {
    %c0_i32 = arith.constant 0 : i32
    %c0_i32_0 = arith.constant 0 : i32
    %c0_i32_1 = arith.constant 0 : i32
    return %c0_i32, %c0_i32_0 : i32, i32
  }
  func.func @transform_3(%arg0: i32) -> (i32, i32) {
    %c0_i32 = arith.constant 0 : i32
    %c0_i32_0 = arith.constant 0 : i32
    %c0_i32_1 = arith.constant 0 : i32
    return %c0_i32, %c0_i32_0 : i32, i32
  }
  func.func @transform_4(%arg0: i32) -> (i32, i32) {
    %c0_i32 = arith.constant 0 : i32
    %c0_i32_0 = arith.constant 0 : i32
    %c0_i32_1 = arith.constant 0 : i32
    return %c0_i32, %c0_i32_0 : i32, i32
  }
  func.func @transform_5(%arg0: i32) -> (i32, i32) {
    %c0_i32 = arith.constant 0 : i32
    %c0_i32_0 = arith.constant 0 : i32
    %c0_i32_1 = arith.constant 0 : i32
    return %c0_i32, %c0_i32_0 : i32, i32
  }
  func.func @transform_6(%arg0: i32) -> (i32, i32) {
    %c0_i32 = arith.constant 0 : i32
    %c0_i32_0 = arith.constant 0 : i32
    %c0_i32_1 = arith.constant 0 : i32
    return %c0_i32, %c0_i32_0 : i32, i32
  }
  func.func @transform_7(%arg0: i32) -> (i32, i32) {
    %c0_i32 = arith.constant 0 : i32
    %c0_i32_0 = arith.constant 0 : i32
    %c0_i32_1 = arith.constant 0 : i32
    return %c0_i32, %c0_i32_0 : i32, i32
  }
  func.func @transform_8(%arg0: i32) -> (i32, i32) {
    %c0_i32 = arith.constant 0 : i32
    %c0_i32_0 = arith.constant 0 : i32
    %c0_i32_1 = arith.constant 0 : i32
    return %c0_i32, %c0_i32_0 : i32, i32
  }
  func.func @transform_9(%arg0: i32) -> (i32, i32) {
    %c0_i32 = arith.constant 0 : i32
    %c0_i32_0 = arith.constant 0 : i32
    %c0_i32_1 = arith.constant 0 : i32
    return %c0_i32, %c0_i32_0 : i32, i32
  }
  func.func @transform_10(%arg0: i32) -> (i32, i32) {
    %c0_i32 = arith.constant 0 : i32
    %c0_i32_0 = arith.constant 0 : i32
    %c0_i32_1 = arith.constant 0 : i32
    return %c0_i32, %c0_i32_0 : i32, i32
  }
  func.func @transform_11(%arg0: i32) -> (i32, i32) {
    %c0_i32 = arith.constant 0 : i32
    %c0_i32_0 = arith.constant 0 : i32
    %c0_i32_1 = arith.constant 0 : i32
    return %c0_i32, %c0_i32_0 : i32, i32
  }
  func.func @transform_12(%arg0: i32) -> (i32, i32) {
    %c0_i32 = arith.constant 0 : i32
    %c0_i32_0 = arith.constant 0 : i32
    %c0_i32_1 = arith.constant 0 : i32
    return %c0_i32, %c0_i32_0 : i32, i32
  }
  func.func @transform_13(%arg0: i32) -> (i32, i32) {
    %c0_i32 = arith.constant 0 : i32
    %c0_i32_0 = arith.constant 0 : i32
    %c0_i32_1 = arith.constant 0 : i32
    return %c0_i32, %c0_i32_0 : i32, i32
  }
  func.func @transform_14(%arg0: i32) -> (i32, i32) {
    %c0_i32 = arith.constant 0 : i32
    %c0_i32_0 = arith.constant 0 : i32
    %c0_i32_1 = arith.constant 0 : i32
    return %c0_i32, %c0_i32_0 : i32, i32
  }
  func.func @transform_15(%arg0: i32) -> (i32, i32) {
    %c0_i32 = arith.constant 0 : i32
    %c0_i32_0 = arith.constant 0 : i32
    %c0_i32_1 = arith.constant 0 : i32
    return %c0_i32, %c0_i32_0 : i32, i32
  }
  func.func @transform_16(%arg0: i32) -> (i32, i32) {
    %c0_i32 = arith.constant 0 : i32
    %c0_i32_0 = arith.constant 0 : i32
    %c0_i32_1 = arith.constant 0 : i32
    return %c0_i32, %c0_i32_0 : i32, i32
  }
  func.func @transform_17(%arg0: i32) -> (i32, i32) {
    %c0_i32 = arith.constant 0 : i32
    %c0_i32_0 = arith.constant 0 : i32
    %c0_i32_1 = arith.constant 0 : i32
    return %c0_i32, %c0_i32_0 : i32, i32
  }
  func.func @transform_18(%arg0: i32) -> (i32, i32) {
    %c0_i32 = arith.constant 0 : i32
    %c0_i32_0 = arith.constant 0 : i32
    %c0_i32_1 = arith.constant 0 : i32
    return %c0_i32, %c0_i32_0 : i32, i32
  }
  func.func @transform_19(%arg0: i32) -> (i32, i32) {
    %c0_i32 = arith.constant 0 : i32
    %c0_i32_0 = arith.constant 0 : i32
    %c0_i32_1 = arith.constant 0 : i32
    return %c0_i32, %c0_i32_0 : i32, i32
  }
  func.func @transform_20(%arg0: i32) -> (i32, i32, i32, i32) {
    %c0_i32 = arith.constant 0 : i32
    %c0_i32_0 = arith.constant 0 : i32
    %c0_i32_1 = arith.constant 0 : i32
    %c0_i32_2 = arith.constant 0 : i32
    return %arg0, %c0_i32, %c0_i32_0, %c0_i32_1 : i32, i32, i32, i32
  }
}

</mosaic_0001>

<bundles_post_ra>
// kernel: antibody_graph_resnet_forward.1
= control target key start
LH: loop header
LB: loop body
LE: loop exit
PB: predicated region body
PF: predicated region fallthrough
CT: control target
= control target key end

     0   :  { %s7884_s0 = inlined_call_operand.vmem [shape: f32[2,16,4,128], index: 0, kind: input, shape index: {}]   ;;  %s7885_s1 = inlined_call_operand.vmem [shape: f32[2,16,4,128], index: 1, kind: input, shape index: {}]   ;;  %s7886_s2 = inlined_call_operand.vmem [shape: f32[8,64], index: 2, kind: input, shape index: {}]   ;;  %s7887_s3 = inlined_call_operand.vmem [shape: f32[8,64], index: 3, kind: input, shape index: {}]   ;;  %s7888_s4 = inlined_call_operand.vmem [shape: f32[8,1], index: 4, kind: input, shape index: {}]   ;;  %s7889_s5 = inlined_call_operand.vmem [shape: f32[8,128], index: 5, kind: input, shape index: {}]   ;;  %s7890_s6 = inlined_call_operand.vmem [shape: f32[8,128], index: 6, kind: input, shape index: {}]   ;;  %s7891_s7 = inlined_call_operand.vmem [shape: f32[8,1], index: 7, kind: input, shape index: {}]   ;;  %s7892_s8 = inlined_call_operand.vmem [shape: f32[8,128], index: 8, kind: input, shape index: {}]   ;;  %s7893_s9 = inlined_call_operand.vmem [shape: f32[8,128], index: 9, kind: input, shape index: {}]   ;;  %s7894_s10 = inlined_call_operand.vmem [shape: f32[8,1], index: 10, kind: input, shape index: {}]   ;;  %s7895_s11 = inlined_call_operand.vmem [shape: f32[8,128], index: 11, kind: input, shape index: {}]   ;;  %s7896_s12 = inlined_call_operand.vmem [shape: f32[8,128], index: 12, kind: input, shape index: {}]   ;;  %s7897_s13 = inlined_call_operand.vmem [shape: f32[8,1], index: 13, kind: input, shape index: {}]   ;;  %s7898_s14 = inlined_call_operand.vmem [shape: f32[8,128], index: 14, kind: input, shape index: {}]   ;;  %s7899_s15 = inlined_call_operand.vmem [shape: f32[8,128], index: 15, kind: input, shape index: {}]   ;;  %s7900_s16 = inlined_call_operand.vmem [shape: f32[8,1], index: 16, kind: input, shape index: {}]   ;;  %s7901_s17 = inlined_call_operand.vmem [shape: f32[16,128], index: 17, kind: input, shape index: {}]   ;;  %s7902_s18 = inlined_call_operand.vmem [shape: f32[16,128], index: 18, kind: input, shape index: {}]   ;;  %s7903_s19 = inlined_call_operand.vmem [shape: f32[16,1], index: 19, kind: input, shape index: {}]   ;;  %s7904_s20 = inlined_call_operand.vmem [shape: f32[2,16,16,128], index: 20, kind: output, shape index: {}]  }
   0x1   :  { %7980 = sst [smem:[#allocation2_spill]] %s7884_s0 }
   0x2   :  { %7981 = sst [smem:[#allocation3_spill]] %s7885_s1  ;;  %s6399_s1 = smov 0  }
   0x3   :  { %7982 = sst [smem:[#allocation4_spill]] %s7886_s2 }
   0x4   :  { %7983 = sst [smem:[#allocation5_spill]] %s7887_s3 }
   0x5   :  { %7984 = sst [smem:[#allocation6_spill]] %s7888_s4 }
   0x6   :  { %7985 = sst [smem:[#allocation7_spill]] %s7889_s5 }
   0x7   :  { %7986 = sst [smem:[#allocation8_spill]] %s7890_s6 }
   0x8   :  { %7987 = sst [smem:[#allocation9_spill]] %s7891_s7 }
   0x9   :  { %7988 = sst [smem:[#allocation10_spill]] %s7892_s8 }
   0xa   :  { %7989 = sst [smem:[#allocation11_spill]] %s7893_s9 }
   0xb   :  { %7990 = sst [smem:[#allocation12_spill]] %s7894_s10 }
   0xc LB: > { %s4625_s22 = sadd.s32 4294967295, %s6272_s1   ;;  %p4629_p0 = scmp.ge.s32.totalorder %s6272_s1, 1  ;;  %s6272_s1 = sphi %s6399_s1, %s30_s1  }
   0xd   : > { %p572_p1 = scmp.lt.s32.totalorder %s6272_s1, 3 }
   0xf   : > { %p573_p2 = pnand %p4629_p0, %p572_p1 }
  0x10   : > { %p635_p3 = scmp.lt.s32.totalorder (!%p573_p2), %s4625_s22, 1  ;;  %v6274_v0 = vmov (!%p573_p2), 0.0|0.0   ;;  %vm6275_vm0 = vmmov (!%p573_p2), 0   ;;  %v6276_v1 = vmov (!%p573_p2), 0.0   ;;  %s7991_s2 = sld [smem:[#allocation6_spill]] (!%p573_p2)  ;;  %v6277_v3 = vmov (!%p573_p2), 0  }
  0x11   : > { %576 = sbr.rel (%p573_p2) target bundleno = 3540 (0xdd4), region = 100  ;;  %5950 = vmatprep.subr.bf16.mxu1 (!%p573_p2), %v6274_v0  ;;  %5275 = vmatprep.mubr.msk.f32.mxu1 (!%p573_p2), %vm6275_vm0, %v6276_v1  ;;  %s7992_s27 = sld [smem:[#allocation2_spill]] (!%p573_p2)  ;;  %vm735_vm1 = vcmask (!%p573_p2), 523264   ;;  %v650_v30 = vlaneseq (!%p573_p2)  ;;  %v6278_v35 = vmov (!%p573_p2), 1.0   ;;  %vm951_vm3 = vcmask (!%p573_p2), 64512   ;;  %v4057_v34 = vld [vmem:[%s7903_s19 + $0x8] sm:$0xff] (!%p573_p2) }
  0x12   : > { %5938 = vmatprep.subr.bf16.mxu0 (!%p573_p2), %v6274_v0  ;;  %5256 = vmatprep.mubr.msk.f32.mxu0 (!%p573_p2), %vm6275_vm0, %v6276_v1  ;;  %s7993_s30 = sld [smem:[#allocation3_spill]] (!%p573_p2)  ;;  %s7994_s24 = sld [smem:[#allocation5_spill]] (!%p573_p2) }
  0x13   : > { %6248 = vset.pattern.permute.xlu0 (!%p573_p2), %v6277_v3  ;;  %6249 = vset.pattern.permute.xlu1 (!%p573_p2), %v6277_v3  ;;  %s7995_s3 = sld [smem:[#allocation4_spill]] (!%p573_p2)  ;;  %v651_v31 = vshrl.u32 (!%p573_p2), %v650_v30, 7  ;;  %v653_v32 = vand.u32 (!%p573_p2), 127, %v650_v30  ;;  %s7947_s26 = smov (!%p573_p2), 112  }
  0x14   : > { %s7936_s4 = smov (!%p573_p2), 96   ;;  %s7932_s29 = smov (!%p573_p2), 88  }
  0x15   : > { %v658_v33 = vand.u32 (!%p573_p2), 7, %v653_v32  ;;  %s7905_s21 = smov (!%p573_p2), 64   ;;  %s7907_s23 = smov (!%p573_p2), 56  }
  0x16   : > { %v809_v2 = vld [vmem:[%s7991_s2] sm:$0xff] (!%p573_p2)  ;;  %s7928_s2 = smov (!%p573_p2), 40   ;;  %s8001_s5 = sld [smem:[#allocation7_spill]] (!%p573_p2) }
  0x17   : > { %812 = vperm.xlu0 (!%p573_p2), %6248, %v809_v2   ;;  %vm6437_vm2 = vcmp.eq.s32.totalorder (!%p573_p2), %v651_v31, %v658_v33  ;;  %s8002_s6 = sld [smem:[#allocation8_spill]] (!%p573_p2)  ;;  %s8008_s7 = sld [smem:[#allocation9_spill]] (!%p573_p2) }
  0x18   : > { %s8065_s22 = smov (!%p635_p3, %s4625_s22), 1  ;;  %v701_v24 = vld [vmem:[%s7994_s24] sm:$0xff]  ;;  %s7945_s24 = smov 48  }
  0x19   : > { %s4844_s25 = sshll.u32 %s8065_s22, 6  ;;  %v702_v29 = vld [vmem:[%s7995_s3] sm:$0xff]  ;;  %s7915_s3 = smov 24  }
  0x1a   : > { %s639_s28 = scalar_lea.vmem %s7992_s27, %s4844_s25  ;;  %s644_s0 = scalar_lea.vmem %s7993_s30, %s4844_s25 }
  0x1b   : > { %v6250_v4 = vld [vmem:[%s639_s28] sm:$0xff]   ;;  %v6251_v5 = vld [vmem:[%s639_s28 + $0x8] sm:$0xff]   ;;  %v6252_v7 = vld [vmem:[%s639_s28 + $0x10] sm:$0xff]   ;;  %s7911_s27 = smov 120   ;;  %s7930_s30 = smov 80  }
  0x1c   : > { %v5951_v6 = vpack.c.bf16 %v6251_v5, %v6250_v4  ;;  %v6253_v8 = vld [vmem:[%s639_s28 + $0x18] sm:$0xff]   ;;  %v6254_v10 = vld [vmem:[%s639_s28 + $0x20] sm:$0xff]   ;;  %v6255_v11 = vld [vmem:[%s639_s28 + $0x28] sm:$0xff]   ;;  %s7943_s25 = smov 32   ;;  %s8015_s10 = sld [smem:[#allocation12_spill]] }
  0x1d   : > { %v5954_v9 = vpack.c.bf16 %v6253_v8, %v6252_v7  ;;  %v6256_v12 = vld [vmem:[%s639_s28 + $0x30] sm:$0xff]   ;;  %v6257_v13 = vld [vmem:[%s639_s28 + $0x38] sm:$0xff]   ;;  %v5957_v14 = vpack.c.bf16 %v6255_v11, %v6254_v10  ;;  %v6258_v15 = vld [vmem:[%s644_s0] sm:$0xff]   ;;  %s7934_s28 = smov 104   ;;  %s8016_s9 = sld [smem:[#allocation11_spill]] }
  0x1e   : > { %5952 = vmatpush3.bf16.msra.mxu1 %v5951_v6  ;;  %v6259_v16 = vld [vmem:[%s644_s0 + $0x8] sm:$0xff]   ;;  %v6260_v18 = vld [vmem:[%s644_s0 + $0x10] sm:$0xff]   ;;  %v6261_v19 = vld [vmem:[%s644_s0 + $0x18] sm:$0xff]   ;;  %v5960_v20 = vpack.c.bf16 %v6257_v13, %v6256_v12  ;;  %s8017_s8 = sld [smem:[#allocation10_spill]] }
  0x1f   : > { %5953 = vmatprep.subr.bf16.mxu1 %v6274_v0  ;;  %v5939_v17 = vpack.c.bf16 %v6259_v16, %v6258_v15  ;;  %v5942_v21 = vpack.c.bf16 %v6261_v19, %v6260_v18  ;;  %v6262_v22 = vld [vmem:[%s644_s0 + $0x20] sm:$0xff]   ;;  %v6263_v23 = vld [vmem:[%s644_s0 + $0x28] sm:$0xff]   ;;  %v6264_v26 = vld [vmem:[%s644_s0 + $0x30] sm:$0xff]  }
  0x20   : > { %v5945_v25 = vpack.c.bf16 %v6263_v23, %v6262_v22  ;;  %v6265_v27 = vld [vmem:[%s644_s0 + $0x38] sm:$0xff]   ;;  %s7913_s0 = smov 72  }
  0x21   : > { %5940 = vmatpush3.bf16.msra.mxu0 %v5939_v17  ;;  %v5948_v28 = vpack.c.bf16 %v6265_v27, %v6264_v26 }
  0x22   : > { %5955 = vmatpush3.bf16.msra.mxu1 %v5954_v9  ;;  %5941 = vmatprep.subr.bf16.mxu0 %v6274_v0 }
  0x23   : > { %5956 = vmatprep.subr.bf16.mxu1 %v6274_v0 }
  0x25   : > { %5943 = vmatpush3.bf16.msra.mxu0 %v5942_v21 }
  0x26   : > { %5958 = vmatpush3.bf16.msra.mxu1 %v5957_v14  ;;  %5944 = vmatprep.subr.bf16.mxu0 %v6274_v0 }
  0x27   : > { %5959 = vmatprep.subr.bf16.mxu1 %v6274_v0 }
  0x29   : > { %5946 = vmatpush3.bf16.msra.mxu0 %v5945_v25 }
  0x2a   : > { %5961 = vmatpush3.bf16.msra.mxu1 %v5960_v20  ;;  %5947 = vmatprep.subr.bf16.mxu0 %v6274_v0 }
  0x2b   : > { %5304 = vmatprep.subr.msk.mxu1 %vm6437_vm2, %v6278_v35 }
  0x2d   : > { %5276 = vmatmul.mubr.msk.f32.vlgmr.msra.gmra.mrb[0].mxu1 %vm735_vm1, %v701_v24  ;;  %5949 = vmatpush3.bf16.msra.mxu0 %v5948_v28 }
  0x2e   : > { %5278 = vmatprep.subr.msk.mxu0 %vm6437_vm2, %v6278_v35  ;;  %5305 = vmatpush3.msk.msra.mxu1 %vm6437_vm2, %v6278_v35 }
  0x2f   : > { %5986 = vmatprep.subr.bf16.mxu1 %v6274_v0 }
  0x30   : > { %5257 = vmatmul.mubr.msk.f32.vlgmr.msra.gmra.mrb[0].mxu0 %vm735_vm1, %v702_v29 }
  0x31   : > { %5279 = vmatpush3.msk.msra.mxu0 %vm6437_vm2, %v6278_v35 }
  0x32   : > { %5962 = vmatprep.subr.bf16.mxu0 %v6274_v0 }
  0x96   : > { %v813_v36 = vpop.permute.xlu0 %812 }
 0x100   : > { %v916_v37 = vpop.f32.mrb[0].mxu1 }
 0x101   : > { %v6455_v38 = vadd.f32 %v916_v37, %v813_v36  ;;  %v5277_v39 = vpop.f32.mrb[1].mxu1 }
 0x103   : > { %1148 = vrot.lane.b32.xlu1 %v6455_v38, %s7947_s26  ;;  %1146 = vrot.lane.b32.xlu0 %v6455_v38, %s7911_s27  ;;  %v6467_v40 = vpop.f32.mrb[0].mxu0 }
 0x104   : > { %5306 = vmatprep.mubr.msk.f32.mxu1 %vm951_vm3, %v6455_v38  ;;  %5280 = vmatprep.mubr.msk.f32.mxu0 %vm951_vm3, %v6467_v40  ;;  %v5258_v41 = vpop.f32.mrb[1].mxu0 }
 0x107   : > { %1150 = vrot.lane.b32.xlu1 %v6455_v38, %s7934_s28  ;;  %1152 = vrot.lane.b32.xlu0 %v6455_v38, %s7936_s4 }
 0x10b   : > { %1154 = vrot.lane.b32.xlu1 %v6455_v38, %s7932_s29  ;;  %1156 = vrot.lane.b32.xlu0 %v6455_v38, %s7930_s30 }
 0x10f   : > { %1158 = vrot.lane.b32.xlu1 %v6455_v38, %s7913_s0  ;;  %1160 = vrot.lane.b32.xlu0 %v6455_v38, %s7905_s21  ;;  %s7917_s21 = smov 16  }
 0x113   : > { %1162 = vrot.lane.b32.xlu1 %v6455_v38, %s7907_s23  ;;  %1164 = vrot.lane.b32.xlu0 %v6455_v38, %s7945_s24  ;;  %s7909_s23 = smov 8  }
 0x117   : > { %1166 = vrot.lane.b32.xlu1 %v6455_v38, %s7928_s2  ;;  %1168 = vrot.lane.b32.xlu0 %v6455_v38, %s7943_s25 }
 0x11b   : > { %1170 = vrot.lane.b32.xlu1 %v6455_v38, %s7915_s3  ;;  %1172 = vrot.lane.b32.xlu0 %v6455_v38, %s7917_s21 }
 0x11f   : > { %1174 = vrot.lane.b32.xlu1 %v6455_v38, %s7909_s23  ;;  %921 = vrot.lane.b32.xlu0 %v6467_v40, %s7911_s27  ;;  %s7998_s23 = smov 64   ;;  %s7999_s27 = smov 56  }
 0x123   : > { %923 = vrot.lane.b32.xlu1 %v6467_v40, %s7947_s26  ;;  %925 = vrot.lane.b32.xlu0 %v6467_v40, %s7934_s28 }
 0x127   : > { %927 = vrot.lane.b32.xlu1 %v6467_v40, %s7936_s4  ;;  %929 = vrot.lane.b32.xlu0 %v6467_v40, %s7932_s29 }
 0x12b   : > { %931 = vrot.lane.b32.xlu1 %v6467_v40, %s7930_s30  ;;  %933 = vrot.lane.b32.xlu0 %v6467_v40, %s7913_s0  ;;  %s8000_s0 = smov 8  }
 0x12f   : > { %935 = vrot.lane.b32.xlu1 %v6467_v40, %s7998_s23  ;;  %937 = vrot.lane.b32.xlu0 %v6467_v40, %s7999_s27 }
 0x133   : > { %939 = vrot.lane.b32.xlu1 %v6467_v40, %s7945_s24  ;;  %941 = vrot.lane.b32.xlu0 %v6467_v40, %s7928_s2  ;;  %s8003_s2 = smov 120  }
 0x137   : > { %943 = vrot.lane.b32.xlu1 %v6467_v40, %s7943_s25  ;;  %945 = vrot.lane.b32.xlu0 %v6467_v40, %s7915_s3  ;;  %s8005_s3 = smov 40  }
 0x13b   : > { %947 = vrot.lane.b32.xlu1 %v6467_v40, %s7917_s21  ;;  %949 = vrot.lane.b32.xlu0 %v6467_v40, %s8000_s0  ;;  %s8004_s21 = smov 72  }
 0x175   : > { %v1149_v42 = vpop.permute.xlu1 %1148  ;;  %v1147_v43 = vpop.permute.xlu0 %1146 }
 0x176   : > { %5307 = vmatmul.mubr.msk.f32.vlgmr.msra.gmra.mrb[2].mxu1 %vm951_vm3, %v1147_v43 }
 0x177   : > { %5309 = vmatprep.mubr.msk.f32.mxu1 %vm951_vm3, %v1149_v42 }
 0x179   : > { %v1151_v44 = vpop.permute.xlu1 %1150  ;;  %v1153_v45 = vpop.permute.xlu0 %1152 }
 0x17a   : > { %5310 = vmatmul.mubr.msk.f32.gmra.mrb[4].mxu1 %vm951_vm3, %v1151_v44 }
 0x17b   : > { %5312 = vmatprep.mubr.msk.f32.mxu1 %vm951_vm3, %v1153_v45 }
 0x17d   : > { %v1155_v46 = vpop.permute.xlu1 %1154  ;;  %v1157_v47 = vpop.permute.xlu0 %1156 }
 0x17e   : > { %5313 = vmatmul.mubr.msk.f32.gmra.mrb[6].mxu1 %vm951_vm3, %v1155_v46 }
 0x17f   : > { %5315 = vmatprep.mubr.msk.f32.mxu1 %vm951_vm3, %v1157_v47 }
 0x181   : > { %v1159_v48 = vpop.permute.xlu1 %1158  ;;  %v1161_v49 = vpop.permute.xlu0 %1160 }
 0x182   : > { %5316 = vmatmul.mubr.msk.f32.gmra.mrb[8].mxu1 %vm951_vm3, %v1159_v48 }
 0x183   : > { %5318 = vmatprep.mubr.msk.f32.mxu1 %vm951_vm3, %v1161_v49 }
 0x185   : > { %v1163_v50 = vpop.permute.xlu1 %1162  ;;  %v1165_v51 = vpop.permute.xlu0 %1164 }
 0x186   : > { %5319 = vmatmul.mubr.msk.f32.gmra.mrb[10].mxu1 %vm951_vm3, %v1163_v50 }
 0x187   : > { %5321 = vmatprep.mubr.msk.f32.mxu1 %vm951_vm3, %v1165_v51 }
 0x189   : > { %v1167_v52 = vpop.permute.xlu1 %1166  ;;  %v1169_v53 = vpop.permute.xlu0 %1168 }
 0x18a   : > { %5322 = vmatmul.mubr.msk.f32.gmra.mrb[12].mxu1 %vm951_vm3, %v1167_v52 }
 0x18b   : > { %5324 = vmatprep.mubr.msk.f32.mxu1 %vm951_vm3, %v1169_v53 }
 0x18d   : > { %v1171_v54 = vpop.permute.xlu1 %1170  ;;  %v1173_v55 = vpop.permute.xlu0 %1172 }
 0x18e   : > { %5325 = vmatmul.mubr.msk.f32.gmra.mrb[14].mxu1 %vm951_vm3, %v1171_v54 }
 0x18f   : > { %5327 = vmatprep.mubr.msk.f32.mxu1 %vm951_vm3, %v1173_v55 }
 0x191   : > { %v1175_v56 = vpop.permute.xlu1 %1174  ;;  %v922_v57 = vpop.permute.xlu0 %921 }
 0x192   : > { %5281 = vmatmul.mubr.msk.f32.vlgmr.msra.gmra.mrb[2].mxu0 %vm951_vm3, %v922_v57  ;;  %5328 = vmatmul.mubr.msk.f32.gmra.mrb[16].mxu1 %vm951_vm3, %v1175_v56 }
 0x193   : > { %5397 = vmatprep.mubr.msk.f32.mxu1 %vm6275_vm0, %v6276_v1 }
 0x195   : > { %v924_v58 = vpop.permute.xlu1 %923  ;;  %v926_v59 = vpop.permute.xlu0 %925 }
 0x196   : > { %5283 = vmatprep.mubr.msk.f32.mxu0 %vm951_vm3, %v924_v58 }
 0x197   : > { %5284 = vmatmul.mubr.msk.f32.gmra.mrb[4].mxu0 %vm951_vm3, %v926_v59 }
 0x199   : > { %v928_v60 = vpop.permute.xlu1 %927  ;;  %v930_v61 = vpop.permute.xlu0 %929 }
 0x19a   : > { %5286 = vmatprep.mubr.msk.f32.mxu0 %vm951_vm3, %v928_v60 }
 0x19b   : > { %5287 = vmatmul.mubr.msk.f32.gmra.mrb[6].mxu0 %vm951_vm3, %v930_v61 }
 0x19d   : > { %v932_v62 = vpop.permute.xlu1 %931  ;;  %v934_v63 = vpop.permute.xlu0 %933 }
 0x19e   : > { %5289 = vmatprep.mubr.msk.f32.mxu0 %vm951_vm3, %v932_v62 }
 0x19f   : > { %5290 = vmatmul.mubr.msk.f32.gmra.mrb[8].mxu0 %vm951_vm3, %v934_v63 }
 0x1a1   : > { %v936_v2 = vpop.permute.xlu1 %935  ;;  %v938_v3 = vpop.permute.xlu0 %937 }
 0x1a2   : > { %5292 = vmatprep.mubr.msk.f32.mxu0 %vm951_vm3, %v936_v2 }
 0x1a3   : > { %5293 = vmatmul.mubr.msk.f32.gmra.mrb[10].mxu0 %vm951_vm3, %v938_v3 }
 0x1a5   : > { %v940_v4 = vpop.permute.xlu1 %939  ;;  %v942_v5 = vpop.permute.xlu0 %941 }
 0x1a6   : > { %5295 = vmatprep.mubr.msk.f32.mxu0 %vm951_vm3, %v940_v4 }
 0x1a7   : > { %5296 = vmatmul.mubr.msk.f32.gmra.mrb[12].mxu0 %vm951_vm3, %v942_v5 }
 0x1a9   : > { %v944_v6 = vpop.permute.xlu1 %943  ;;  %v946_v7 = vpop.permute.xlu0 %945 }
 0x1aa   : > { %5298 = vmatprep.mubr.msk.f32.mxu0 %vm951_vm3, %v944_v6 }
 0x1ab   : > { %5299 = vmatmul.mubr.msk.f32.gmra.mrb[14].mxu0 %vm951_vm3, %v946_v7 }
 0x1ad   : > { %v948_v8 = vpop.permute.xlu1 %947  ;;  %v950_v9 = vpop.permute.xlu0 %949 }
 0x1ae   : > { %5301 = vmatprep.mubr.msk.f32.mxu0 %vm951_vm3, %v948_v8 }
 0x1af   : > { %5302 = vmatmul.mubr.msk.f32.gmra.mrb[16].mxu0 %vm951_vm3, %v950_v9 }
 0x1b0   : > { %5362 = vmatprep.mubr.msk.f32.mxu0 %vm6275_vm0, %v6276_v1 }
 0x249   : > { %v5308_v10 = vpop.f32.mrb[2].mxu1 }
 0x24a   : > { %v6558_v11 = vadd.f32 %v5308_v10, %v6467_v40  ;;  %v1274_v12 = vpop.f32.mrb[3].mxu1 }
 0x24b   : > { %v6561_v13 = vadd.f32 %v1274_v12, %v6467_v40 }
 0x24c   : > { %v1386_v14 = vmax.f32 %v6558_v11, 0.0 }
 0x24d   : > { %v1385_v15 = vmax.f32 %v6561_v13, 0.0  ;;  %v5311_v16 = vpop.f32.mrb[4].mxu1 }
 0x24e   : > { %v6566_v17 = vadd.f32 %v5311_v16, %v6467_v40  ;;  %v1284_v18 = vpop.f32.mrb[5].mxu1 }
 0x24f   : > { %v5963_v19 = vpack.c.bf16 %v1386_v14, %v1385_v15  ;;  %v6573_v20 = vadd.f32 %v1284_v18, %v6467_v40 }
 0x250   : > { %v1388_v21 = vmax.f32 %v6566_v17, 0.0 }
 0x251   : > { %v1387_v22 = vmax.f32 %v6573_v20, 0.0  ;;  %v5314_v23 = vpop.f32.mrb[6].mxu1  ;;  %5964 = vmatpush3.bf16.msra.mxu0 %v5963_v19 }
 0x252   : > { %v6578_v24 = vadd.f32 %v5314_v23, %v6467_v40  ;;  %v1294_v25 = vpop.f32.mrb[7].mxu1  ;;  %5965 = vmatprep.subr.bf16.mxu0 %v6274_v0 }
 0x253   : > { %v5966_v26 = vpack.c.bf16 %v1388_v21, %v1387_v22  ;;  %v6586_v27 = vadd.f32 %v1294_v25, %v6467_v40 }
 0x254   : > { %v1390_v28 = vmax.f32 %v6578_v24, 0.0 }
 0x255   : > { %v1389_v29 = vmax.f32 %v6586_v27, 0.0  ;;  %v5317_v30 = vpop.f32.mrb[8].mxu1  ;;  %5967 = vmatpush3.bf16.msra.mxu0 %v5966_v26 }
 0x256   : > { %v6591_v31 = vadd.f32 %v5317_v30, %v6467_v40  ;;  %v1304_v32 = vpop.f32.mrb[9].mxu1  ;;  %5968 = vmatprep.subr.bf16.mxu0 %v6274_v0 }
 0x257   : > { %v5969_v33 = vpack.c.bf16 %v1390_v28, %v1389_v29  ;;  %v6599_v36 = vadd.f32 %v1304_v32, %v6467_v40  ;;  %v1402_v32 = vld [vmem:[%s8001_s5] sm:$0xff]  ;;  %s8014_s5 = smov 32  }
 0x258   : > { %v1392_v37 = vmax.f32 %v6591_v31, 0.0 }
 0x259   : > { %v1391_v39 = vmax.f32 %v6599_v36, 0.0  ;;  %v5320_v41 = vpop.f32.mrb[10].mxu1  ;;  %5970 = vmatpush3.bf16.msra.mxu0 %v5969_v33 }
 0x25a   : > { %v6604_v42 = vadd.f32 %v5320_v41, %v6467_v40  ;;  %v1314_v43 = vpop.f32.mrb[11].mxu1  ;;  %5971 = vmatprep.subr.bf16.mxu0 %v6274_v0 }
 0x25b   : > { %v5972_v44 = vpack.c.bf16 %v1392_v37, %v1391_v39  ;;  %v6612_v45 = vadd.f32 %v1314_v43, %v6467_v40 }
 0x25c   : > { %v1394_v46 = vmax.f32 %v6604_v42, 0.0 }
 0x25d   : > { %v7957_v47 = vmax.f32 %v6612_v45, 0.0  ;;  %v5323_v48 = vpop.f32.mrb[12].mxu1  ;;  %5973 = vmatpush3.bf16.msra.mxu0 %v5972_v44 }
 0x25e   : > { %v6617_v49 = vadd.f32 %v5323_v48, %v6467_v40  ;;  %v1324_v50 = vpop.f32.mrb[13].mxu1  ;;  %5974 = vmatprep.subr.bf16.mxu0 %v6274_v0 }
 0x25f   : > { %v5975_v51 = vpack.c.bf16 %v1394_v46, %v7957_v47  ;;  %v6625_v52 = vadd.f32 %v1324_v50, %v6467_v40 }
 0x260   : > { %v7956_v53 = vmax.f32 %v6617_v49, 0.0 }
 0x261   : > { %v7955_v54 = vmax.f32 %v6625_v52, 0.0  ;;  %v5326_v55 = vpop.f32.mrb[14].mxu1  ;;  %5976 = vmatpush3.bf16.msra.mxu0 %v5975_v51 }
 0x262   : > { %v6630_v56 = vadd.f32 %v5326_v55, %v6467_v40  ;;  %v1334_v57 = vpop.f32.mrb[15].mxu1  ;;  %5977 = vmatprep.subr.bf16.mxu0 %v6274_v0 }
 0x263   : > { %v5978_v58 = vpack.c.bf16 %v7956_v53, %v7955_v54  ;;  %v6638_v59 = vadd.f32 %v1334_v57, %v6467_v40 }
 0x264   : > { %v7954_v60 = vmax.f32 %v6630_v56, 0.0 }
 0x265   : > { %v7953_v61 = vmax.f32 %v6638_v59, 0.0  ;;  %v5282_v62 = vpop.f32.mrb[2].mxu0  ;;  %v5329_v63 = vpop.f32.mrb[16].mxu1  ;;  %5979 = vmatpush3.bf16.msra.mxu0 %v5978_v58 }
 0x266   : > { %v6643_v2 = vadd.f32 %v5282_v62, %v6455_v38  ;;  %v6646_v3 = vadd.f32 %v5329_v63, %v6467_v40  ;;  %v1050_v4 = vpop.f32.mrb[3].mxu0  ;;  %v1344_v5 = vpop.f32.mrb[17].mxu1  ;;  %5980 = vmatprep.subr.bf16.mxu0 %v6274_v0 }
 0x267   : > { %v5981_v6 = vpack.c.bf16 %v7954_v60, %v7953_v61  ;;  %v6654_v7 = vadd.f32 %v1050_v4, %v6455_v38  ;;  %v6657_v8 = vadd.f32 %v1344_v5, %v6467_v40 }
 0x268   : > { %v7950_v9 = vmax.f32 %v6643_v2, 0.0  ;;  %v7952_v10 = vmax.f32 %v6646_v3, 0.0 }
 0x269   : > { %v7949_v12 = vmax.f32 %v6654_v7, 0.0  ;;  %v7951_v16 = vmax.f32 %v6657_v8, 0.0  ;;  %5982 = vmatpush3.bf16.msra.mxu0 %v5981_v6 }
 0x26a   : > { %v5285_v18 = vpop.f32.mrb[4].mxu0  ;;  %5983 = vmatprep.subr.bf16.mxu0 %v6274_v0 }
 0x26b   : > { %v5987_v19 = vpack.c.bf16 %v7950_v9, %v7949_v12  ;;  %v5984_v40 = vpack.c.bf16 %v7952_v10, %v7951_v16  ;;  %v6673_v23 = vadd.f32 %v5285_v18, %v6455_v38  ;;  %v1060_v25 = vpop.f32.mrb[5].mxu0 }
 0x26c   : > { %v6676_v26 = vadd.f32 %v1060_v25, %v6455_v38 }
 0x26d   : > { %v7942_v30 = vmax.f32 %v6673_v23, 0.0  ;;  %5985 = vmatpush3.bf16.msra.mxu0 %v5984_v40  ;;  %5988 = vmatpush3.bf16.msra.mxu1 %v5987_v19 }
 0x26e   : > { %v7927_v33 = vmax.f32 %v6676_v26, 0.0  ;;  %v5288_v41 = vpop.f32.mrb[6].mxu0  ;;  %5989 = vmatprep.subr.bf16.mxu1 %v6274_v0  ;;  %5400 = vmatprep.subr.msk.mxu0 %vm6437_vm2, %v6278_v35 }
 0x26f   : > { %v6688_v43 = vadd.f32 %v5288_v41, %v6455_v38  ;;  %v1070_v44 = vpop.f32.mrb[7].mxu0 }
 0x270   : > { %v5990_v48 = vpack.c.bf16 %v7942_v30, %v7927_v33  ;;  %v6695_v50 = vadd.f32 %v1070_v44, %v6455_v38  ;;  %5363 = vmatmul.mubr.f32.vlgmr.msra.gmra.mrb[18].mxu0 %v1402_v32 }
 0x271   : > { %v7924_v51 = vmax.f32 %v6688_v43, 0.0  ;;  %5401 = vmatpush3.msk.msra.mxu0 %vm6437_vm2, %v6278_v35 }
 0x272   : > { %v7923_v55 = vmax.f32 %v6695_v50, 0.0  ;;  %v5291_v57 = vpop.f32.mrb[8].mxu0  ;;  %5991 = vmatpush3.bf16.msra.mxu1 %v5990_v48  ;;  %6010 = vmatprep.subr.bf16.mxu0 %v6274_v0 }
 0x273   : > { %v6704_v58 = vadd.f32 %v5291_v57, %v6455_v38  ;;  %v1080_v62 = vpop.f32.mrb[9].mxu0  ;;  %5992 = vmatprep.subr.bf16.mxu1 %v6274_v0 }
 0x274   : > { %v5993_v63 = vpack.c.bf16 %v7924_v51, %v7923_v55  ;;  %v6712_v4 = vadd.f32 %v1080_v62, %v6455_v38 }
 0x275   : > { %v7920_v5 = vmax.f32 %v6704_v58, 0.0 }
 0x276   : > { %v7919_v6 = vmax.f32 %v6712_v4, 0.0  ;;  %v5294_v18 = vpop.f32.mrb[10].mxu0  ;;  %5994 = vmatpush3.bf16.msra.mxu1 %v5993_v63 }
 0x277   : > { %v6717_v19 = vadd.f32 %v5294_v18, %v6455_v38  ;;  %v1090_v40 = vpop.f32.mrb[11].mxu0  ;;  %5995 = vmatprep.subr.bf16.mxu1 %v6274_v0 }
 0x278   : > { %v5996_v25 = vpack.c.bf16 %v7920_v5, %v7919_v6  ;;  %v6725_v32 = vadd.f32 %v1090_v40, %v6455_v38 }
 0x279   : > { %v7922_v41 = vmax.f32 %v6717_v19, 0.0 }
 0x27a   : > { %v7921_v44 = vmax.f32 %v6725_v32, 0.0  ;;  %v5297_v48 = vpop.f32.mrb[12].mxu0  ;;  %5997 = vmatpush3.bf16.msra.mxu1 %v5996_v25 }
 0x27b   : > { %v6730_v57 = vadd.f32 %v5297_v48, %v6455_v38  ;;  %v1100_v62 = vpop.f32.mrb[13].mxu0  ;;  %5998 = vmatprep.subr.bf16.mxu1 %v6274_v0 }
 0x27c   : > { %v5999_v63 = vpack.c.bf16 %v7922_v41, %v7921_v44  ;;  %v6738_v18 = vadd.f32 %v1100_v62, %v6455_v38 }
 0x27d   : > { %v7926_v40 = vmax.f32 %v6730_v57, 0.0 }
 0x27e   : > { %v7925_v6 = vmax.f32 %v6738_v18, 0.0  ;;  %v5300_v5 = vpop.f32.mrb[14].mxu0  ;;  %6000 = vmatpush3.bf16.msra.mxu1 %v5999_v63 }
 0x27f   : > { %v6743_v25 = vadd.f32 %v5300_v5, %v6455_v38  ;;  %v1110_v48 = vpop.f32.mrb[15].mxu0  ;;  %6001 = vmatprep.subr.bf16.mxu1 %v6274_v0 }
 0x280   : > { %v6002_v44 = vpack.c.bf16 %v7926_v40, %v7925_v6  ;;  %v6751_v62 = vadd.f32 %v1110_v48, %v6455_v38 }
 0x281   : > { %v7941_v41 = vmax.f32 %v6743_v25, 0.0 }
 0x282   : > { %v7940_v55 = vmax.f32 %v6751_v62, 0.0  ;;  %v5303_v51 = vpop.f32.mrb[16].mxu0  ;;  %6003 = vmatpush3.bf16.msra.mxu1 %v6002_v44  ;;  %v1401_v44 = vld [vmem:[%s8002_s6] sm:$0xff] }
 0x283   : > { %v6756_v5 = vadd.f32 %v5303_v51, %v6455_v38  ;;  %v1120_v63 = vpop.f32.mrb[17].mxu0  ;;  %6004 = vmatprep.subr.bf16.mxu1 %v6274_v0 }
 0x284   : > { %v6005_v6 = vpack.c.bf16 %v7941_v41, %v7940_v55  ;;  %v6764_v48 = vadd.f32 %v1120_v63, %v6455_v38  ;;  %v1473_v63 = vld [vmem:[%s8008_s7] sm:$0xff] }
 0x285   : > { %v7939_v40 = vmax.f32 %v6756_v5, 0.0 }
 0x286   : > { %v7938_v33 = vmax.f32 %v6764_v48, 0.0  ;;  %6006 = vmatpush3.bf16.msra.mxu1 %v6005_v6 }
 0x287   : > { %6007 = vmatprep.subr.bf16.mxu1 %v6274_v0 }
 0x288   : > { %v6008_v51 = vpack.c.bf16 %v7939_v40, %v7938_v33 }
 0x28a   : > { %6009 = vmatpush3.bf16.msra.mxu1 %v6008_v51 }
 0x28b   : > { %5426 = vmatprep.subr.msk.mxu1 %vm6437_vm2, %v6278_v35 }
 0x28d   : > { %5398 = vmatmul.mubr.f32.vlgmr.msra.gmra.mrb[18].mxu1 %v1401_v44 }
 0x28e   : > { %5427 = vmatpush3.msk.msra.mxu1 %vm6437_vm2, %v6278_v35 }
 0x28f   : > { %6034 = vmatprep.subr.bf16.mxu1 %v6274_v0 }
 0x343   : > { %v6783_v38 = vpop.f32.mrb[18].mxu0 }
 0x344   : > { %1552 = vrot.lane.b32.xlu0 %v6783_v38, %s7947_s26  ;;  %1550 = vrot.lane.b32.xlu1 %v6783_v38, %s8003_s2  ;;  %v5364_v6 = vpop.f32.mrb[19].mxu0 }
 0x345   : > { %5402 = vmatprep.mubr.msk.f32.mxu0 %vm951_vm3, %v6783_v38 }
 0x348   : > { %1556 = vrot.lane.b32.xlu0 %v6783_v38, %s7936_s4  ;;  %1554 = vrot.lane.b32.xlu1 %v6783_v38, %s7934_s28  ;;  %s8009_s28 = smov 96   ;;  %s8010_s4 = smov 104  }
 0x34c   : > { %1560 = vrot.lane.b32.xlu0 %v6783_v38, %s7930_s30  ;;  %1558 = vrot.lane.b32.xlu1 %v6783_v38, %s7932_s29  ;;  %s8006_s30 = smov 16   ;;  %s8007_s29 = smov 24  }
 0x350   : > { %1564 = vrot.lane.b32.xlu0 %v6783_v38, %s7998_s23  ;;  %1562 = vrot.lane.b32.xlu1 %v6783_v38, %s8004_s21 }
 0x354   : > { %1568 = vrot.lane.b32.xlu0 %v6783_v38, %s7945_s24  ;;  %1566 = vrot.lane.b32.xlu1 %v6783_v38, %s7999_s27  ;;  %s8012_s24 = smov 88  }
 0x358   : > { %1572 = vrot.lane.b32.xlu0 %v6783_v38, %s7943_s25  ;;  %1570 = vrot.lane.b32.xlu1 %v6783_v38, %s8005_s3  ;;  %s8011_s25 = smov 80  }
 0x35c   : > { %1576 = vrot.lane.b32.xlu0 %v6783_v38, %s8006_s30  ;;  %1574 = vrot.lane.b32.xlu1 %v6783_v38, %s8007_s29 }
 0x360   : > { %1476 = vperm.xlu0 %6248, %v1473_v63   ;;  %1578 = vrot.lane.b32.xlu1 %v6783_v38, %s8000_s0  ;;  %v1545_v51 = vpop.f32.mrb[18].mxu1 }
 0x361   : > { %v5399_v44 = vpop.f32.mrb[19].mxu1 }
 0x3b6   : > { %v1553_v6 = vpop.permute.xlu0 %1552  ;;  %v1551_v33 = vpop.permute.xlu1 %1550 }
 0x3b7   : > { %5403 = vmatmul.mubr.msk.f32.vlgmr.msra.gmra.mrb[20].mxu0 %vm951_vm3, %v1551_v33 }
 0x3b8   : > { %5405 = vmatprep.mubr.msk.f32.mxu0 %vm951_vm3, %v1553_v6 }
 0x3ba   : > { %v1557_v40 = vpop.permute.xlu0 %1556  ;;  %v1555_v55 = vpop.permute.xlu1 %1554 }
 0x3bb   : > { %5406 = vmatmul.mubr.msk.f32.gmra.mrb[22].mxu0 %vm951_vm3, %v1555_v55 }
 0x3bc   : > { %5408 = vmatprep.mubr.msk.f32.mxu0 %vm951_vm3, %v1557_v40 }
 0x3be   : > { %v1561_v41 = vpop.permute.xlu0 %1560  ;;  %v1559_v30 = vpop.permute.xlu1 %1558 }
 0x3bf   : > { %5409 = vmatmul.mubr.msk.f32.gmra.mrb[24].mxu0 %vm951_vm3, %v1559_v30 }
 0x3c0   : > { %5411 = vmatprep.mubr.msk.f32.mxu0 %vm951_vm3, %v1561_v41 }
 0x3c2   : > { %v1565_v63 = vpop.permute.xlu0 %1564  ;;  %v1563_v44 = vpop.permute.xlu1 %1562 }
 0x3c3   : > { %5412 = vmatmul.mubr.msk.f32.gmra.mrb[26].mxu0 %vm951_vm3, %v1563_v44 }
 0x3c4   : > { %5414 = vmatprep.mubr.msk.f32.mxu0 %vm951_vm3, %v1565_v63 }
 0x3c6   : > { %v1569_v33 = vpop.permute.xlu0 %1568  ;;  %v1567_v6 = vpop.permute.xlu1 %1566 }
 0x3c7   : > { %5415 = vmatmul.mubr.msk.f32.gmra.mrb[28].mxu0 %vm951_vm3, %v1567_v6 }
 0x3c8   : > { %5417 = vmatprep.mubr.msk.f32.mxu0 %vm951_vm3, %v1569_v33 }
 0x3ca   : > { %v1573_v55 = vpop.permute.xlu0 %1572  ;;  %v1571_v40 = vpop.permute.xlu1 %1570 }
 0x3cb   : > { %5418 = vmatmul.mubr.msk.f32.gmra.mrb[30].mxu0 %vm951_vm3, %v1571_v40 }
 0x3cc   : > { %5420 = vmatprep.mubr.msk.f32.mxu0 %vm951_vm3, %v1573_v55 }
 0x3ce   : > { %v1577_v30 = vpop.permute.xlu0 %1576  ;;  %v1575_v41 = vpop.permute.xlu1 %1574 }
 0x3cf   : > { %5421 = vmatmul.mubr.msk.f32.gmra.mrb[32].mxu0 %vm951_vm3, %v1575_v41 }
 0x3d0   : > { %5423 = vmatprep.mubr.msk.f32.mxu0 %vm951_vm3, %v1577_v30 }
 0x3d2   : > { %v1579_v44 = vpop.permute.xlu1 %1578 }
 0x3d3   : > { %5424 = vmatmul.mubr.msk.f32.gmra.mrb[34].mxu0 %vm951_vm3, %v1579_v44 }
 0x3d4   : > { %5484 = vmatprep.mubr.msk.f32.mxu0 %vm6275_vm0, %v6276_v1 }
 0x3df   : > { %v1477_v63 = vpop.permute.xlu0 %1476 }
 0x3e0   : > { %v6837_v33 = vadd.f32 %v1545_v51, %v1477_v63  ;;  %v2101_v51 = vld [vmem:[%s8015_s10] sm:$0xff] }
 0x3e2   : > { %1776 = vrot.lane.b32.xlu0 %v6837_v33, %s7947_s26  ;;  %5428 = vmatprep.mubr.msk.f32.mxu1 %vm951_vm3, %v6837_v33  ;;  %s8013_s26 = smov 48  }
 0x3e3   : > { %1774 = vrot.lane.b32.xlu1 %v6837_v33, %s8003_s2 }
 0x3e6   : > { %1780 = vrot.lane.b32.xlu0 %v6837_v33, %s8009_s28 }
 0x3e7   : > { %1778 = vrot.lane.b32.xlu1 %v6837_v33, %s8010_s4 }
 0x3ea   : > { %1784 = vrot.lane.b32.xlu0 %v6837_v33, %s8011_s25 }
 0x3eb   : > { %1782 = vrot.lane.b32.xlu1 %v6837_v33, %s8012_s24 }
 0x3ee   : > { %1788 = vrot.lane.b32.xlu0 %v6837_v33, %s7998_s23 }
 0x3ef   : > { %1786 = vrot.lane.b32.xlu1 %v6837_v33, %s8004_s21 }
 0x3f2   : > { %1792 = vrot.lane.b32.xlu0 %v6837_v33, %s8013_s26 }
 0x3f3   : > { %1790 = vrot.lane.b32.xlu1 %v6837_v33, %s7999_s27 }
 0x3f6   : > { %1796 = vrot.lane.b32.xlu0 %v6837_v33, %s8014_s5 }
 0x3f7   : > { %1794 = vrot.lane.b32.xlu1 %v6837_v33, %s8005_s3 }
 0x3fa   : > { %1800 = vrot.lane.b32.xlu0 %v6837_v33, %s8006_s30 }
 0x3fb   : > { %1798 = vrot.lane.b32.xlu1 %v6837_v33, %s8007_s29 }
 0x3fe   : > { %2104 = vperm.xlu0 %6248, %v2101_v51  }
 0x3ff   : > { %1802 = vrot.lane.b32.xlu1 %v6837_v33, %s8000_s0 }
 0x454   : > { %v1777_v6 = vpop.permute.xlu0 %1776 }
 0x455   : > { %v1775_v55 = vpop.permute.xlu1 %1774 }
 0x456   : > { %5429 = vmatmul.mubr.msk.f32.vlgmr.msra.gmra.mrb[20].mxu1 %vm951_vm3, %v1775_v55 }
 0x457   : > { %5431 = vmatprep.mubr.msk.f32.mxu1 %vm951_vm3, %v1777_v6 }
 0x458   : > { %v1781_v40 = vpop.permute.xlu0 %1780 }
 0x459   : > { %v1779_v30 = vpop.permute.xlu1 %1778 }
 0x45a   : > { %5432 = vmatmul.mubr.msk.f32.gmra.mrb[22].mxu1 %vm951_vm3, %v1779_v30 }
 0x45b   : > { %5434 = vmatprep.mubr.msk.f32.mxu1 %vm951_vm3, %v1781_v40 }
 0x45c   : > { %v1785_v41 = vpop.permute.xlu0 %1784 }
 0x45d   : > { %v1783_v44 = vpop.permute.xlu1 %1782 }
 0x45e   : > { %5435 = vmatmul.mubr.msk.f32.gmra.mrb[24].mxu1 %vm951_vm3, %v1783_v44 }
 0x45f   : > { %5437 = vmatprep.mubr.msk.f32.mxu1 %vm951_vm3, %v1785_v41 }
 0x460   : > { %v1789_v63 = vpop.permute.xlu0 %1788 }
 0x461   : > { %v1787_v51 = vpop.permute.xlu1 %1786 }
 0x462   : > { %5438 = vmatmul.mubr.msk.f32.gmra.mrb[26].mxu1 %vm951_vm3, %v1787_v51 }
 0x463   : > { %5440 = vmatprep.mubr.msk.f32.mxu1 %vm951_vm3, %v1789_v63 }
 0x464   : > { %v1793_v55 = vpop.permute.xlu0 %1792 }
 0x465   : > { %v1791_v6 = vpop.permute.xlu1 %1790 }
 0x466   : > { %5441 = vmatmul.mubr.msk.f32.gmra.mrb[28].mxu1 %vm951_vm3, %v1791_v6 }
 0x467   : > { %5443 = vmatprep.mubr.msk.f32.mxu1 %vm951_vm3, %v1793_v55 }
 0x468   : > { %v1797_v30 = vpop.permute.xlu0 %1796 }
 0x469   : > { %v1795_v40 = vpop.permute.xlu1 %1794 }
 0x46a   : > { %5444 = vmatmul.mubr.msk.f32.gmra.mrb[30].mxu1 %vm951_vm3, %v1795_v40 }
 0x46b   : > { %5446 = vmatprep.mubr.msk.f32.mxu1 %vm951_vm3, %v1797_v30 }
 0x46c   : > { %v1801_v44 = vpop.permute.xlu0 %1800 }
 0x46d   : > { %v1799_v41 = vpop.permute.xlu1 %1798 }
 0x46e   : > { %5447 = vmatmul.mubr.msk.f32.gmra.mrb[32].mxu1 %vm951_vm3, %v1799_v41 }
 0x46f   : > { %5449 = vmatprep.mubr.msk.f32.mxu1 %vm951_vm3, %v1801_v44 }
 0x471   : > { %v1803_v51 = vpop.permute.xlu1 %1802 }
 0x472   : > { %5450 = vmatmul.mubr.msk.f32.gmra.mrb[34].mxu1 %vm951_vm3, %v1803_v51 }
 0x473   : > { %5519 = vmatprep.mubr.msk.f32.mxu1 %vm6275_vm0, %v6276_v1 }
 0x48a   : > { %v5404_v63 = vpop.f32.mrb[20].mxu0 }
 0x48b   : > { %v1758_v55 = vadd.f32 %v5404_v63, %v6837_v33  ;;  %v1678_v6 = vpop.f32.mrb[21].mxu0 }
 0x48c   : > { %v1757_v40 = vadd.f32 %v1678_v6, %v6837_v33 }
 0x48d   : > { %v1998_v12 = vmax.f32 %v1758_v55, 0.0 }
 0x48e   : > { %v1997_v30 = vmax.f32 %v1757_v40, 0.0  ;;  %v5407_v9 = vpop.f32.mrb[22].mxu0 }
 0x48f   : > { %v1760_v16 = vadd.f32 %v5407_v9, %v6837_v33  ;;  %v1688_v41 = vpop.f32.mrb[23].mxu0 }
 0x490   : > { %v6035_v10 = vpack.c.bf16 %v1998_v12, %v1997_v30  ;;  %v1759_v44 = vadd.f32 %v1688_v41, %v6837_v33 }
 0x491   : > { %v2000_v61 = vmax.f32 %v1760_v16, 0.0 }
 0x492   : > { %v1999_v51 = vmax.f32 %v1759_v44, 0.0  ;;  %v5410_v60 = vpop.f32.mrb[24].mxu0  ;;  %6036 = vmatpush3.bf16.msra.mxu1 %v6035_v10 }
 0x493   : > { %v1762_v54 = vadd.f32 %v5410_v60, %v6837_v33  ;;  %v1698_v53 = vpop.f32.mrb[25].mxu0  ;;  %6037 = vmatprep.subr.bf16.mxu1 %v6274_v0 }
 0x494   : > { %v6038_v63 = vpack.c.bf16 %v2000_v61, %v1999_v51  ;;  %v1761_v55 = vadd.f32 %v1698_v53, %v6837_v33 }
 0x495   : > { %v2002_v6 = vmax.f32 %v1762_v54, 0.0 }
 0x496   : > { %v2001_v40 = vmax.f32 %v1761_v55, 0.0  ;;  %v5413_v47 = vpop.f32.mrb[26].mxu0  ;;  %6039 = vmatpush3.bf16.msra.mxu1 %v6038_v63 }
 0x497   : > { %v1764_v9 = vadd.f32 %v5413_v47, %v6837_v33  ;;  %v1708_v12 = vpop.f32.mrb[27].mxu0  ;;  %6040 = vmatprep.subr.bf16.mxu1 %v6274_v0 }
 0x498   : > { %v6041_v16 = vpack.c.bf16 %v2002_v6, %v2001_v40  ;;  %v1763_v10 = vadd.f32 %v1708_v12, %v6837_v33 }
 0x499   : > { %v2004_v30 = vmax.f32 %v1764_v9, 0.0 }
 0x49a   : > { %v2003_v60 = vmax.f32 %v1763_v10, 0.0  ;;  %v5416_v41 = vpop.f32.mrb[28].mxu0  ;;  %6042 = vmatpush3.bf16.msra.mxu1 %v6041_v16 }
 0x49b   : > { %v1766_v61 = vadd.f32 %v5416_v41, %v6837_v33  ;;  %v1718_v44 = vpop.f32.mrb[29].mxu0  ;;  %6043 = vmatprep.subr.bf16.mxu1 %v6274_v0 }
 0x49c   : > { %v6044_v53 = vpack.c.bf16 %v2004_v30, %v2003_v60  ;;  %v1765_v54 = vadd.f32 %v1718_v44, %v6837_v33 }
 0x49d   : > { %v2006_v51 = vmax.f32 %v1766_v61, 0.0 }
 0x49e   : > { %v2005_v47 = vmax.f32 %v1765_v54, 0.0  ;;  %v5419_v63 = vpop.f32.mrb[30].mxu0  ;;  %6045 = vmatpush3.bf16.msra.mxu1 %v6044_v53 }
 0x49f   : > { %v1768_v55 = vadd.f32 %v5419_v63, %v6837_v33  ;;  %v1728_v6 = vpop.f32.mrb[31].mxu0  ;;  %6046 = vmatprep.subr.bf16.mxu1 %v6274_v0 }
 0x4a0   : > { %v6047_v40 = vpack.c.bf16 %v2006_v51, %v2005_v47  ;;  %v1767_v9 = vadd.f32 %v1728_v6, %v6837_v33 }
 0x4a1   : > { %v2008_v12 = vmax.f32 %v1768_v55, 0.0 }
 0x4a2   : > { %v2007_v16 = vmax.f32 %v1767_v9, 0.0  ;;  %v5422_v10 = vpop.f32.mrb[32].mxu0  ;;  %6048 = vmatpush3.bf16.msra.mxu1 %v6047_v40 }
 0x4a3   : > { %v1770_v30 = vadd.f32 %v5422_v10, %v6837_v33  ;;  %v1738_v60 = vpop.f32.mrb[33].mxu0  ;;  %6049 = vmatprep.subr.bf16.mxu1 %v6274_v0 }
 0x4a4   : > { %v6050_v41 = vpack.c.bf16 %v2008_v12, %v2007_v16  ;;  %v1769_v61 = vadd.f32 %v1738_v60, %v6837_v33  ;;  %v2029_v12 = vld [vmem:[%s8016_s9] sm:$0xff]  ;;  %s8018_s9 = smov 112  }
 0x4a5   : > { %v2010_v44 = vmax.f32 %v1770_v30, 0.0 }
 0x4a6   : > { %v2009_v53 = vmax.f32 %v1769_v61, 0.0  ;;  %v5425_v54 = vpop.f32.mrb[34].mxu0  ;;  %6051 = vmatpush3.bf16.msra.mxu1 %v6050_v41 }
 0x4a7   : > { %v1772_v51 = vadd.f32 %v5425_v54, %v6837_v33  ;;  %v1748_v47 = vpop.f32.mrb[35].mxu0  ;;  %6052 = vmatprep.subr.bf16.mxu1 %v6274_v0 }
 0x4a8   : > { %v6053_v63 = vpack.c.bf16 %v2010_v44, %v2009_v53  ;;  %v1771_v55 = vadd.f32 %v1748_v47, %v6837_v33 }
 0x4a9   : > { %v2012_v6 = vmax.f32 %v1772_v51, 0.0 }
 0x4aa   : > { %v2011_v40 = vmax.f32 %v1771_v55, 0.0  ;;  %6054 = vmatpush3.bf16.msra.mxu1 %v6053_v63 }
 0x4ab   : > { %6055 = vmatprep.subr.bf16.mxu1 %v6274_v0 }
 0x4ac   : > { %v6056_v9 = vpack.c.bf16 %v2012_v6, %v2011_v40 }
 0x4ae   : > { %6057 = vmatpush3.bf16.msra.mxu1 %v6056_v9 }
 0x4af   : > { %5548 = vmatprep.subr.msk.mxu1 %vm6437_vm2, %v6278_v35 }
 0x4b1   : > { %5520 = vmatmul.mubr.f32.vlgmr.msra.gmra.mrb[36].mxu1 %v2029_v12 }
 0x4b2   : > { %5549 = vmatpush3.msk.msra.mxu1 %vm6437_vm2, %v6278_v35 }
 0x4b3   : > { %6082 = vmatprep.subr.bf16.mxu1 %v6274_v0 }
 0x529   : > { %v5430_v33 = vpop.f32.mrb[20].mxu1 }
 0x52a   : > { %v1982_v16 = vadd.f32 %v5430_v33, %v6783_v38  ;;  %v1902_v10 = vpop.f32.mrb[21].mxu1 }
 0x52b   : > { %v1981_v30 = vadd.f32 %v1902_v10, %v6783_v38 }
 0x52c   : > { %v2014_v60 = vmax.f32 %v1982_v16, 0.0 }
 0x52d   : > { %v2013_v41 = vmax.f32 %v1981_v30, 0.0  ;;  %v5433_v61 = vpop.f32.mrb[22].mxu1 }
 0x52e   : > { %v1984_v44 = vadd.f32 %v5433_v61, %v6783_v38  ;;  %v1912_v53 = vpop.f32.mrb[23].mxu1 }
 0x52f   : > { %v6011_v54 = vpack.c.bf16 %v2014_v60, %v2013_v41  ;;  %v1983_v51 = vadd.f32 %v1912_v53, %v6783_v38 }
 0x530   : > { %v2016_v47 = vmax.f32 %v1984_v44, 0.0 }
 0x531   : > { %v2015_v63 = vmax.f32 %v1983_v51, 0.0  ;;  %v5436_v55 = vpop.f32.mrb[24].mxu1  ;;  %6012 = vmatpush3.bf16.msra.mxu0 %v6011_v54 }
 0x532   : > { %v1986_v6 = vadd.f32 %v5436_v55, %v6783_v38  ;;  %v1922_v40 = vpop.f32.mrb[25].mxu1  ;;  %6013 = vmatprep.subr.bf16.mxu0 %v6274_v0 }
 0x533   : > { %v6014_v9 = vpack.c.bf16 %v2016_v47, %v2015_v63  ;;  %v1985_v12 = vadd.f32 %v1922_v40, %v6783_v38 }
 0x534   : > { %v2018_v33 = vmax.f32 %v1986_v6, 0.0 }
 0x535   : > { %v2017_v16 = vmax.f32 %v1985_v12, 0.0  ;;  %v5439_v10 = vpop.f32.mrb[26].mxu1  ;;  %6015 = vmatpush3.bf16.msra.mxu0 %v6014_v9 }
 0x536   : > { %v1988_v30 = vadd.f32 %v5439_v10, %v6783_v38  ;;  %v1932_v60 = vpop.f32.mrb[27].mxu1  ;;  %6016 = vmatprep.subr.bf16.mxu0 %v6274_v0 }
 0x537   : > { %v6017_v41 = vpack.c.bf16 %v2018_v33, %v2017_v16  ;;  %v1987_v61 = vadd.f32 %v1932_v60, %v6783_v38 }
 0x538   : > { %v2020_v44 = vmax.f32 %v1988_v30, 0.0 }
 0x539   : > { %v2019_v53 = vmax.f32 %v1987_v61, 0.0  ;;  %v5442_v54 = vpop.f32.mrb[28].mxu1  ;;  %6018 = vmatpush3.bf16.msra.mxu0 %v6017_v41 }
 0x53a   : > { %v1990_v51 = vadd.f32 %v5442_v54, %v6783_v38  ;;  %v1942_v47 = vpop.f32.mrb[29].mxu1  ;;  %6019 = vmatprep.subr.bf16.mxu0 %v6274_v0 }
 0x53b   : > { %v6020_v63 = vpack.c.bf16 %v2020_v44, %v2019_v53  ;;  %v1989_v55 = vadd.f32 %v1942_v47, %v6783_v38 }
 0x53c   : > { %v2022_v6 = vmax.f32 %v1990_v51, 0.0 }
 0x53d   : > { %v2021_v40 = vmax.f32 %v1989_v55, 0.0  ;;  %v5445_v9 = vpop.f32.mrb[30].mxu1  ;;  %6021 = vmatpush3.bf16.msra.mxu0 %v6020_v63 }
 0x53e   : > { %v1992_v12 = vadd.f32 %v5445_v9, %v6783_v38  ;;  %v1952_v33 = vpop.f32.mrb[31].mxu1  ;;  %6022 = vmatprep.subr.bf16.mxu0 %v6274_v0 }
 0x53f   : > { %v6023_v16 = vpack.c.bf16 %v2022_v6, %v2021_v40  ;;  %v1991_v10 = vadd.f32 %v1952_v33, %v6783_v38 }
 0x540   : > { %v2024_v30 = vmax.f32 %v1992_v12, 0.0 }
 0x541   : > { %v2023_v60 = vmax.f32 %v1991_v10, 0.0  ;;  %v5448_v41 = vpop.f32.mrb[32].mxu1  ;;  %6024 = vmatpush3.bf16.msra.mxu0 %v6023_v16  ;;  %v2030_v10 = vld [vmem:[%s8017_s8] sm:$0xff] }
 0x542   : > { %v1994_v61 = vadd.f32 %v5448_v41, %v6783_v38  ;;  %v1962_v44 = vpop.f32.mrb[33].mxu1  ;;  %6025 = vmatprep.subr.bf16.mxu0 %v6274_v0 }
 0x543   : > { %v6026_v53 = vpack.c.bf16 %v2024_v30, %v2023_v60  ;;  %v1993_v54 = vadd.f32 %v1962_v44, %v6783_v38 }
 0x544   : > { %v2026_v51 = vmax.f32 %v1994_v61, 0.0 }
 0x545   : > { %v2025_v47 = vmax.f32 %v1993_v54, 0.0  ;;  %v5451_v63 = vpop.f32.mrb[34].mxu1  ;;  %6027 = vmatpush3.bf16.msra.mxu0 %v6026_v53 }
 0x546   : > { %v1996_v55 = vadd.f32 %v5451_v63, %v6783_v38  ;;  %v1972_v6 = vpop.f32.mrb[35].mxu1  ;;  %6028 = vmatprep.subr.bf16.mxu0 %v6274_v0 }
 0x547   : > { %v6029_v40 = vpack.c.bf16 %v2026_v51, %v2025_v47  ;;  %v1995_v9 = vadd.f32 %v1972_v6, %v6783_v38  ;;  %v2105_v38 = vpop.permute.xlu0 %2104 }
 0x548   : > { %v2028_v12 = vmax.f32 %v1996_v55, 0.0 }
 0x549   : > { %v2027_v33 = vmax.f32 %v1995_v9, 0.0  ;;  %6030 = vmatpush3.bf16.msra.mxu0 %v6029_v40 }
 0x54a   : > { %6031 = vmatprep.subr.bf16.mxu0 %v6274_v0 }
 0x54b   : > { %v6032_v16 = vpack.c.bf16 %v2028_v12, %v2027_v33 }
 0x54d   : > { %6033 = vmatpush3.bf16.msra.mxu0 %v6032_v16 }
 0x54e   : > { %5522 = vmatprep.subr.msk.mxu0 %vm6437_vm2, %v6278_v35 }
 0x550   : > { %5485 = vmatmul.mubr.f32.vlgmr.msra.gmra.mrb[36].mxu0 %v2030_v10 }
 0x551   : > { %5523 = vmatpush3.msk.msra.mxu0 %vm6437_vm2, %v6278_v35 }
 0x552   : > { %6058 = vmatprep.subr.bf16.mxu0 %v6274_v0 }
 0x584   : > { %v2173_v30 = vpop.f32.mrb[36].mxu1 }
 0x585   : > { %v6957_v60 = vadd.f32 %v2173_v30, %v2105_v38  ;;  %v5521_v41 = vpop.f32.mrb[37].mxu1 }
 0x587   : > { %2404 = vrot.lane.b32.xlu0 %v6957_v60, %s8018_s9  ;;  %2402 = vrot.lane.b32.xlu1 %v6957_v60, %s8003_s2 }
 0x588   : > { %5550 = vmatprep.mubr.msk.f32.mxu1 %vm951_vm3, %v6957_v60 }
 0x58b   : > { %2408 = vrot.lane.b32.xlu0 %v6957_v60, %s8009_s28  ;;  %2406 = vrot.lane.b32.xlu1 %v6957_v60, %s8010_s4 }
 0x58f   : > { %2412 = vrot.lane.b32.xlu0 %v6957_v60, %s8011_s25  ;;  %2410 = vrot.lane.b32.xlu1 %v6957_v60, %s8012_s24 }
 0x593   : > { %2416 = vrot.lane.b32.xlu0 %v6957_v60, %s7998_s23  ;;  %2414 = vrot.lane.b32.xlu1 %v6957_v60, %s8004_s21 }
 0x597   : > { %2420 = vrot.lane.b32.xlu0 %v6957_v60, %s8013_s26  ;;  %2418 = vrot.lane.b32.xlu1 %v6957_v60, %s7999_s27 }
 0x59b   : > { %2424 = vrot.lane.b32.xlu0 %v6957_v60, %s8014_s5  ;;  %2422 = vrot.lane.b32.xlu1 %v6957_v60, %s8005_s3 }
 0x59f   : > { %2428 = vrot.lane.b32.xlu0 %v6957_v60, %s8006_s30  ;;  %2426 = vrot.lane.b32.xlu1 %v6957_v60, %s8007_s29 }
 0x5a3   : > { %2430 = vrot.lane.b32.xlu1 %v6957_v60, %s8000_s0 }
 0x5f9   : > { %v2405_v61 = vpop.permute.xlu0 %2404  ;;  %v2403_v44 = vpop.permute.xlu1 %2402 }
 0x5fa   : > { %5551 = vmatmul.mubr.msk.f32.vlgmr.msra.gmra.mrb[38].mxu1 %vm951_vm3, %v2403_v44 }
 0x5fb   : > { %5553 = vmatprep.mubr.msk.f32.mxu1 %vm951_vm3, %v2405_v61 }
 0x5fd   : > { %v2409_v53 = vpop.permute.xlu0 %2408  ;;  %v2407_v54 = vpop.permute.xlu1 %2406 }
 0x5fe   : > { %5554 = vmatmul.mubr.msk.f32.gmra.mrb[40].mxu1 %vm951_vm3, %v2407_v54 }
 0x5ff   : > { %5556 = vmatprep.mubr.msk.f32.mxu1 %vm951_vm3, %v2409_v53 }
 0x601   : > { %v2413_v51 = vpop.permute.xlu0 %2412  ;;  %v2411_v47 = vpop.permute.xlu1 %2410 }
 0x602   : > { %5557 = vmatmul.mubr.msk.f32.gmra.mrb[42].mxu1 %vm951_vm3, %v2411_v47 }
 0x603   : > { %5559 = vmatprep.mubr.msk.f32.mxu1 %vm951_vm3, %v2413_v51 }
 0x605   : > { %v2417_v63 = vpop.permute.xlu0 %2416  ;;  %v2415_v55 = vpop.permute.xlu1 %2414 }
 0x606   : > { %5560 = vmatmul.mubr.msk.f32.gmra.mrb[44].mxu1 %vm951_vm3, %v2415_v55 }
 0x607   : > { %5562 = vmatprep.mubr.msk.f32.mxu1 %vm951_vm3, %v2417_v63 }
 0x609   : > { %v2421_v6 = vpop.permute.xlu0 %2420  ;;  %v2419_v40 = vpop.permute.xlu1 %2418 }
 0x60a   : > { %5563 = vmatmul.mubr.msk.f32.gmra.mrb[46].mxu1 %vm951_vm3, %v2419_v40 }
 0x60b   : > { %5565 = vmatprep.mubr.msk.f32.mxu1 %vm951_vm3, %v2421_v6 }
 0x60d   : > { %v2425_v9 = vpop.permute.xlu0 %2424  ;;  %v2423_v12 = vpop.permute.xlu1 %2422 }
 0x60e   : > { %5566 = vmatmul.mubr.msk.f32.gmra.mrb[48].mxu1 %vm951_vm3, %v2423_v12 }
 0x60f   : > { %5568 = vmatprep.mubr.msk.f32.mxu1 %vm951_vm3, %v2425_v9 }
 0x611   : > { %v2429_v33 = vpop.permute.xlu0 %2428  ;;  %v2427_v16 = vpop.permute.xlu1 %2426 }
 0x612   : > { %5569 = vmatmul.mubr.msk.f32.gmra.mrb[50].mxu1 %vm951_vm3, %v2427_v16 }
 0x613   : > { %5571 = vmatprep.mubr.msk.f32.mxu1 %vm951_vm3, %v2429_v33 }
 0x615   : > { %v2431_v10 = vpop.permute.xlu1 %2430 }
 0x616   : > { %5572 = vmatmul.mubr.msk.f32.gmra.mrb[52].mxu1 %vm951_vm3, %v2431_v10 }
 0x617   : > { %5641 = vmatprep.mubr.msk.f32.mxu1 %vm6275_vm0, %v6276_v1 }
 0x623   : > { %v7008_v38 = vpop.f32.mrb[36].mxu0 }
 0x624   : > { %2178 = vrot.lane.b32.xlu0 %v7008_v38, %s8003_s2  ;;  %2180 = vrot.lane.b32.xlu1 %v7008_v38, %s8018_s9  ;;  %v5486_v30 = vpop.f32.mrb[37].mxu0 }
 0x625   : > { %5524 = vmatprep.mubr.msk.f32.mxu0 %vm951_vm3, %v7008_v38 }
 0x628   : > { %2182 = vrot.lane.b32.xlu0 %v7008_v38, %s8010_s4  ;;  %2184 = vrot.lane.b32.xlu1 %v7008_v38, %s8009_s28 }
 0x62c   : > { %2186 = vrot.lane.b32.xlu0 %v7008_v38, %s8012_s24  ;;  %2188 = vrot.lane.b32.xlu1 %v7008_v38, %s8011_s25 }
 0x630   : > { %2190 = vrot.lane.b32.xlu0 %v7008_v38, %s8004_s21  ;;  %2192 = vrot.lane.b32.xlu1 %v7008_v38, %s7998_s23 }
 0x634   : > { %2194 = vrot.lane.b32.xlu0 %v7008_v38, %s7999_s27  ;;  %2196 = vrot.lane.b32.xlu1 %v7008_v38, %s8013_s26 }
 0x638   : > { %2198 = vrot.lane.b32.xlu0 %v7008_v38, %s8005_s3  ;;  %2200 = vrot.lane.b32.xlu1 %v7008_v38, %s8014_s5 }
 0x63c   : > { %2202 = vrot.lane.b32.xlu0 %v7008_v38, %s8007_s29  ;;  %2204 = vrot.lane.b32.xlu1 %v7008_v38, %s8006_s30 }
 0x640   : > { %2206 = vrot.lane.b32.xlu0 %v7008_v38, %s8000_s0 }
 0x696   : > { %v2179_v41 = vpop.permute.xlu0 %2178  ;;  %v2181_v61 = vpop.permute.xlu1 %2180 }
 0x697   : > { %5525 = vmatmul.mubr.msk.f32.vlgmr.msra.gmra.mrb[38].mxu0 %vm951_vm3, %v2179_v41 }
 0x698   : > { %5527 = vmatprep.mubr.msk.f32.mxu0 %vm951_vm3, %v2181_v61 }
 0x69a   : > { %v2183_v44 = vpop.permute.xlu0 %2182  ;;  %v2185_v53 = vpop.permute.xlu1 %2184 }
 0x69b   : > { %5528 = vmatmul.mubr.msk.f32.gmra.mrb[40].mxu0 %vm951_vm3, %v2183_v44 }
 0x69c   : > { %5530 = vmatprep.mubr.msk.f32.mxu0 %vm951_vm3, %v2185_v53 }
 0x69e   : > { %v2187_v54 = vpop.permute.xlu0 %2186  ;;  %v2189_v51 = vpop.permute.xlu1 %2188 }
 0x69f   : > { %5531 = vmatmul.mubr.msk.f32.gmra.mrb[42].mxu0 %vm951_vm3, %v2187_v54 }
 0x6a0   : > { %5533 = vmatprep.mubr.msk.f32.mxu0 %vm951_vm3, %v2189_v51 }
 0x6a2   : > { %v2191_v47 = vpop.permute.xlu0 %2190  ;;  %v2193_v63 = vpop.permute.xlu1 %2192 }
 0x6a3   : > { %5534 = vmatmul.mubr.msk.f32.gmra.mrb[44].mxu0 %vm951_vm3, %v2191_v47 }
 0x6a4   : > { %5536 = vmatprep.mubr.msk.f32.mxu0 %vm951_vm3, %v2193_v63 }
 0x6a6   : > { %v2195_v55 = vpop.permute.xlu0 %2194  ;;  %v2197_v6 = vpop.permute.xlu1 %2196 }
 0x6a7   : > { %5537 = vmatmul.mubr.msk.f32.gmra.mrb[46].mxu0 %vm951_vm3, %v2195_v55 }
 0x6a8   : > { %5539 = vmatprep.mubr.msk.f32.mxu0 %vm951_vm3, %v2197_v6 }
 0x6aa   : > { %v2199_v40 = vpop.permute.xlu0 %2198  ;;  %v2201_v9 = vpop.permute.xlu1 %2200 }
 0x6ab   : > { %5540 = vmatmul.mubr.msk.f32.gmra.mrb[48].mxu0 %vm951_vm3, %v2199_v40 }
 0x6ac   : > { %5542 = vmatprep.mubr.msk.f32.mxu0 %vm951_vm3, %v2201_v9 }
 0x6ae   : > { %v2203_v12 = vpop.permute.xlu0 %2202  ;;  %v2205_v33 = vpop.permute.xlu1 %2204 }
 0x6af   : > { %5543 = vmatmul.mubr.msk.f32.gmra.mrb[50].mxu0 %vm951_vm3, %v2203_v12 }
 0x6b0   : > { %5545 = vmatprep.mubr.msk.f32.mxu0 %vm951_vm3, %v2205_v33 }
 0x6b2   : > { %v2207_v16 = vpop.permute.xlu0 %2206 }
 0x6b3   : > { %5546 = vmatmul.mubr.msk.f32.gmra.mrb[52].mxu0 %vm951_vm3, %v2207_v16 }
 0x6b4   : > { %5606 = vmatprep.mubr.msk.f32.mxu0 %vm6275_vm0, %v6276_v1 }
 0x6cd   : > { %v5552_v10 = vpop.f32.mrb[38].mxu1 }
 0x6ce   : > { %v2610_v30 = vadd.f32 %v5552_v10, %v7008_v38  ;;  %v2530_v41 = vpop.f32.mrb[39].mxu1 }
 0x6cf   : > { %v2609_v61 = vadd.f32 %v2530_v41, %v7008_v38 }
 0x6d0   : > { %v7063_v44 = vadd.f32 %v2610_v30, %v1386_v14 }
 0x6d1   : > { %v7067_v53 = vadd.f32 %v2609_v61, %v1385_v15  ;;  %v5555_v54 = vpop.f32.mrb[40].mxu1 }
 0x6d2   : > { %v2674_v51 = vmax.f32 %v7063_v44, 0.0  ;;  %v2612_v47 = vadd.f32 %v5555_v54, %v7008_v38  ;;  %v2540_v63 = vpop.f32.mrb[41].mxu1 }
 0x6d3   : > { %v2673_v55 = vmax.f32 %v7067_v53, 0.0  ;;  %v2611_v6 = vadd.f32 %v2540_v63, %v7008_v38 }
 0x6d4   : > { %v7075_v40 = vadd.f32 %v2612_v47, %v1388_v21 }
 0x6d5   : > { %v6059_v11 = vpack.c.bf16 %v2674_v51, %v2673_v55  ;;  %v7083_v13 = vadd.f32 %v2611_v6, %v1387_v22  ;;  %v5558_v14 = vpop.f32.mrb[42].mxu1 }
 0x6d6   : > { %v2676_v15 = vmax.f32 %v7075_v40, 0.0  ;;  %v2614_v9 = vadd.f32 %v5558_v14, %v7008_v38  ;;  %v2550_v12 = vpop.f32.mrb[43].mxu1 }
 0x6d7   : > { %v2675_v33 = vmax.f32 %v7083_v13, 0.0  ;;  %v2613_v17 = vadd.f32 %v2550_v12, %v7008_v38  ;;  %6060 = vmatpush3.bf16.msra.mxu0 %v6059_v11 }
 0x6d8   : > { %v7091_v21 = vadd.f32 %v2614_v9, %v1390_v28  ;;  %6061 = vmatprep.subr.bf16.mxu0 %v6274_v0 }
 0x6d9   : > { %v6062_v20 = vpack.c.bf16 %v2676_v15, %v2675_v33  ;;  %v7100_v22 = vadd.f32 %v2613_v17, %v1389_v29  ;;  %v5561_v16 = vpop.f32.mrb[44].mxu1 }
 0x6da   : > { %v2678_v10 = vmax.f32 %v7091_v21, 0.0  ;;  %v2616_v30 = vadd.f32 %v5561_v16, %v7008_v38  ;;  %v2560_v41 = vpop.f32.mrb[45].mxu1  ;;  %v8020_v16 = vmax.f32 %v6617_v49, 0.0 }
 0x6db   : > { %v2677_v24 = vmax.f32 %v7100_v22, 0.0  ;;  %v2615_v28 = vadd.f32 %v2560_v41, %v7008_v38  ;;  %6063 = vmatpush3.bf16.msra.mxu0 %v6062_v20  ;;  %v8021_v41 = vmax.f32 %v6625_v52, 0.0 }
 0x6dc   : > { %v7108_v61 = vadd.f32 %v2616_v30, %v1392_v37  ;;  %6064 = vmatprep.subr.bf16.mxu0 %v6274_v0 }
 0x6dd   : > { %v6065_v27 = vpack.c.bf16 %v2678_v10, %v2677_v24  ;;  %v7117_v29 = vadd.f32 %v2615_v28, %v1391_v39  ;;  %v5564_v54 = vpop.f32.mrb[46].mxu1  ;;  %v8019_v39 = vmax.f32 %v6612_v45, 0.0 }
 0x6de   : > { %v2680_v47 = vmax.f32 %v7108_v61, 0.0  ;;  %v2618_v63 = vadd.f32 %v5564_v54, %v7008_v38  ;;  %v2570_v6 = vpop.f32.mrb[47].mxu1 }
 0x6df   : > { %v2679_v31 = vmax.f32 %v7117_v29, 0.0  ;;  %v2617_v37 = vadd.f32 %v2570_v6, %v7008_v38  ;;  %6066 = vmatpush3.bf16.msra.mxu0 %v6065_v27 }
 0x6e0   : > { %v7125_v11 = vadd.f32 %v2618_v63, %v1394_v46  ;;  %6067 = vmatprep.subr.bf16.mxu0 %v6274_v0 }
 0x6e1   : > { %v6068_v36 = vpack.c.bf16 %v2680_v47, %v2679_v31  ;;  %v7134_v14 = vadd.f32 %v2617_v37, %v8019_v39  ;;  %v5567_v9 = vpop.f32.mrb[48].mxu1 }
 0x6e2   : > { %v2682_v12 = vmax.f32 %v7125_v11, 0.0  ;;  %v2620_v17 = vadd.f32 %v5567_v9, %v7008_v38  ;;  %v2580_v20 = vpop.f32.mrb[49].mxu1  ;;  %v8023_v9 = vmax.f32 %v6638_v59, 0.0 }
 0x6e3   : > { %v2681_v42 = vmax.f32 %v7134_v14, 0.0  ;;  %v2619_v46 = vadd.f32 %v2580_v20, %v7008_v38  ;;  %6069 = vmatpush3.bf16.msra.mxu0 %v6068_v36  ;;  %v8022_v36 = vmax.f32 %v6630_v56, 0.0 }
 0x6e4   : > { %v7142_v30 = vadd.f32 %v2620_v17, %v8020_v16  ;;  %6070 = vmatprep.subr.bf16.mxu0 %v6274_v0 }
 0x6e5   : > { %v6071_v45 = vpack.c.bf16 %v2682_v12, %v2681_v42  ;;  %v7151_v28 = vadd.f32 %v2619_v46, %v8021_v41  ;;  %v5570_v27 = vpop.f32.mrb[50].mxu1 }
 0x6e6   : > { %v7979_v54 = vmax.f32 %v7142_v30, 0.0  ;;  %v2622_v63 = vadd.f32 %v5570_v27, %v7008_v38  ;;  %v2590_v6 = vpop.f32.mrb[51].mxu1  ;;  %v8024_v27 = vmax.f32 %v6646_v3, 0.0 }
 0x6e7   : > { %v7978_v49 = vmax.f32 %v7151_v28, 0.0  ;;  %v2621_v37 = vadd.f32 %v2590_v6, %v7008_v38  ;;  %6072 = vmatpush3.bf16.msra.mxu0 %v6071_v45  ;;  %v8025_v6 = vmax.f32 %v6657_v8, 0.0  ;;  %v8043_v11 = vmax.f32 %v7151_v28, 0.0 }
 0x6e8   : > { %v7159_v39 = vadd.f32 %v2622_v63, %v8022_v36  ;;  %6073 = vmatprep.subr.bf16.mxu0 %v6274_v0 }
 0x6e9   : > { %v6074_v52 = vpack.c.bf16 %v7979_v54, %v7978_v49  ;;  %v7168_v17 = vadd.f32 %v2621_v37, %v8023_v9  ;;  %v5573_v20 = vpop.f32.mrb[52].mxu1 }
 0x6ea   : > { %v7977_v46 = vmax.f32 %v7159_v39, 0.0  ;;  %v2624_v16 = vadd.f32 %v5573_v20, %v7008_v38  ;;  %v2600_v45 = vpop.f32.mrb[53].mxu1 }
 0x6eb   : > { %v7960_v56 = vmax.f32 %v7168_v17, 0.0  ;;  %v2623_v41 = vadd.f32 %v2600_v45, %v7008_v38  ;;  %6075 = vmatpush3.bf16.msra.mxu0 %v6074_v52  ;;  %v2690_v52 = vld [vmem:[%s7895_s11] sm:$0xff]  ;;  %v8026_v45 = vmax.f32 %v6643_v2, 0.0 }
 0x6ec   : > { %v7176_v63 = vadd.f32 %v2624_v16, %v8024_v27  ;;  %6076 = vmatprep.subr.bf16.mxu0 %v6274_v0  ;;  %v8027_v27 = vmax.f32 %v6654_v7, 0.0  ;;  %v8029_v7 = vmax.f32 %v6676_v26, 0.0 }
 0x6ed   : > { %v6077_v59 = vpack.c.bf16 %v7977_v46, %v7960_v56  ;;  %v7185_v37 = vadd.f32 %v2623_v41, %v8025_v6 }
 0x6ee   : > { %v7959_v36 = vmax.f32 %v7176_v63, 0.0 }
 0x6ef   : > { %v7958_v38 = vmax.f32 %v7185_v37, 0.0  ;;  %6078 = vmatpush3.bf16.msra.mxu0 %v6077_v59 }
 0x6f0   : > { %6079 = vmatprep.subr.bf16.mxu0 %v6274_v0 }
 0x6f1   : > { %v6080_v3 = vpack.c.bf16 %v7959_v36, %v7958_v38 }
 0x6f3   : > { %6081 = vmatpush3.bf16.msra.mxu0 %v6080_v3 }
 0x6f4   : > { %5644 = vmatprep.subr.msk.mxu0 %vm6437_vm2, %v6278_v35 }
 0x6f6   : > { %5607 = vmatmul.mubr.f32.vlgmr.msra.gmra.mrb[54].mxu0 %v2690_v52 }
 0x6f7   : > { %5645 = vmatpush3.msk.msra.mxu0 %vm6437_vm2, %v6278_v35 }
 0x6f8   : > { %6106 = vmatprep.subr.bf16.mxu0 %v6274_v0 }
 0x76a   : > { %v5526_v8 = vpop.f32.mrb[38].mxu0 }
 0x76b   : > { %v2386_v9 = vadd.f32 %v5526_v8, %v6957_v60  ;;  %v2306_v20 = vpop.f32.mrb[39].mxu0 }
 0x76c   : > { %v2385_v16 = vadd.f32 %v2306_v20, %v6957_v60  ;;  %v8028_v20 = vmax.f32 %v6673_v23, 0.0 }
 0x76d   : > { %v7208_v41 = vadd.f32 %v2386_v9, %v8026_v45 }
 0x76e   : > { %v7212_v59 = vadd.f32 %v2385_v16, %v8027_v27  ;;  %v5529_v6 = vpop.f32.mrb[40].mxu0 }
 0x76f   : > { %v7962_v3 = vmax.f32 %v7208_v41, 0.0  ;;  %v2388_v52 = vadd.f32 %v5529_v6, %v6957_v60  ;;  %v2316_v38 = vpop.f32.mrb[41].mxu0 }
 0x770   : > { %v7961_v36 = vmax.f32 %v7212_v59, 0.0  ;;  %v2387_v8 = vadd.f32 %v2316_v38, %v6957_v60 }
 0x771   : > { %v7220_v56 = vadd.f32 %v2388_v52, %v8028_v20  ;;  %v8030_v52 = vmax.f32 %v6688_v43, 0.0 }
 0x772   : > { %v6083_v2 = vpack.c.bf16 %v7962_v3, %v7961_v36  ;;  %v7228_v9 = vadd.f32 %v2387_v8, %v8029_v7  ;;  %v5532_v16 = vpop.f32.mrb[42].mxu0  ;;  %v8031_v8 = vmax.f32 %v6695_v50, 0.0 }
 0x773   : > { %v7964_v45 = vmax.f32 %v7220_v56, 0.0  ;;  %v2390_v27 = vadd.f32 %v5532_v16, %v6957_v60  ;;  %v2326_v6 = vpop.f32.mrb[43].mxu0 }
 0x774   : > { %v7963_v38 = vmax.f32 %v7228_v9, 0.0  ;;  %v2389_v23 = vadd.f32 %v2326_v6, %v6957_v60  ;;  %6084 = vmatpush3.bf16.msra.mxu1 %v6083_v2 }
 0x775   : > { %v7236_v20 = vadd.f32 %v2390_v27, %v8030_v52  ;;  %6085 = vmatprep.subr.bf16.mxu1 %v6274_v0  ;;  %v8032_v52 = vmax.f32 %v6704_v58, 0.0 }
 0x776   : > { %v6086_v26 = vpack.c.bf16 %v7964_v45, %v7963_v38  ;;  %v7245_v7 = vadd.f32 %v2389_v23, %v8031_v8  ;;  %v5535_v16 = vpop.f32.mrb[44].mxu0  ;;  %v8033_v23 = vmax.f32 %v6712_v4, 0.0 }
 0x777   : > { %v7966_v36 = vmax.f32 %v7236_v20, 0.0  ;;  %v2392_v2 = vadd.f32 %v5535_v16, %v6957_v60  ;;  %v2336_v6 = vpop.f32.mrb[45].mxu0 }
 0x778   : > { %v7965_v43 = vmax.f32 %v7245_v7, 0.0  ;;  %v2391_v27 = vadd.f32 %v2336_v6, %v6957_v60  ;;  %6087 = vmatpush3.bf16.msra.mxu1 %v6086_v26 }
 0x779   : > { %v7253_v3 = vadd.f32 %v2392_v2, %v8032_v52  ;;  %6088 = vmatprep.subr.bf16.mxu1 %v6274_v0  ;;  %v8034_v52 = vmax.f32 %v6717_v19, 0.0 }
 0x77a   : > { %v6089_v50 = vpack.c.bf16 %v7966_v36, %v7965_v43  ;;  %v7262_v8 = vadd.f32 %v2391_v27, %v8033_v23  ;;  %v5538_v16 = vpop.f32.mrb[46].mxu0  ;;  %v8035_v27 = vmax.f32 %v6725_v32, 0.0 }
 0x77b   : > { %v7968_v38 = vmax.f32 %v7253_v3, 0.0  ;;  %v2394_v26 = vadd.f32 %v5538_v16, %v6957_v60  ;;  %v2346_v6 = vpop.f32.mrb[47].mxu0 }
 0x77c   : > { %v7967_v58 = vmax.f32 %v7262_v8, 0.0  ;;  %v2393_v2 = vadd.f32 %v2346_v6, %v6957_v60  ;;  %6090 = vmatpush3.bf16.msra.mxu1 %v6089_v50 }
 0x77d   : > { %v7270_v45 = vadd.f32 %v2394_v26, %v8034_v52  ;;  %6091 = vmatprep.subr.bf16.mxu1 %v6274_v0  ;;  %v8036_v52 = vmax.f32 %v6730_v57, 0.0 }
 0x77e   : > { %v6092_v4 = vpack.c.bf16 %v7968_v38, %v7967_v58  ;;  %v7279_v23 = vadd.f32 %v2393_v2, %v8035_v27  ;;  %v5541_v16 = vpop.f32.mrb[48].mxu0  ;;  %v8037_v2 = vmax.f32 %v6738_v18, 0.0 }
 0x77f   : > { %v7970_v43 = vmax.f32 %v7270_v45, 0.0  ;;  %v2396_v50 = vadd.f32 %v5541_v16, %v6957_v60  ;;  %v2356_v6 = vpop.f32.mrb[49].mxu0 }
 0x780   : > { %v7969_v19 = vmax.f32 %v7279_v23, 0.0  ;;  %v2395_v26 = vadd.f32 %v2356_v6, %v6957_v60  ;;  %6093 = vmatpush3.bf16.msra.mxu1 %v6092_v4 }
 0x781   : > { %v7287_v36 = vadd.f32 %v2396_v50, %v8036_v52  ;;  %6094 = vmatprep.subr.bf16.mxu1 %v6274_v0  ;;  %v8038_v52 = vmax.f32 %v6743_v25, 0.0 }
 0x782   : > { %v6095_v32 = vpack.c.bf16 %v7970_v43, %v7969_v19  ;;  %v7296_v27 = vadd.f32 %v2395_v26, %v8037_v2  ;;  %v5544_v16 = vpop.f32.mrb[50].mxu0  ;;  %v8039_v26 = vmax.f32 %v6751_v62, 0.0 }
 0x783   : > { %v7976_v58 = vmax.f32 %v7287_v36, 0.0  ;;  %v2398_v4 = vadd.f32 %v5544_v16, %v6957_v60  ;;  %v2366_v6 = vpop.f32.mrb[51].mxu0 }
 0x784   : > { %v7975_v57 = vmax.f32 %v7296_v27, 0.0  ;;  %v2397_v50 = vadd.f32 %v2366_v6, %v6957_v60  ;;  %6096 = vmatpush3.bf16.msra.mxu1 %v6095_v32 }
 0x785   : > { %v7304_v38 = vadd.f32 %v2398_v4, %v8038_v52  ;;  %6097 = vmatprep.subr.bf16.mxu1 %v6274_v0  ;;  %v8040_v52 = vmax.f32 %v6756_v5, 0.0 }
 0x786   : > { %v6098_v18 = vpack.c.bf16 %v7976_v58, %v7975_v57  ;;  %v7313_v2 = vadd.f32 %v2397_v50, %v8039_v26  ;;  %v5547_v16 = vpop.f32.mrb[52].mxu0  ;;  %v8041_v50 = vmax.f32 %v6764_v48, 0.0 }
 0x787   : > { %v7974_v19 = vmax.f32 %v7304_v38, 0.0  ;;  %v2400_v32 = vadd.f32 %v5547_v16, %v6957_v60  ;;  %v2376_v6 = vpop.f32.mrb[53].mxu0 }
 0x788   : > { %v7973_v25 = vmax.f32 %v7313_v2, 0.0  ;;  %v2399_v4 = vadd.f32 %v2376_v6, %v6957_v60  ;;  %6099 = vmatpush3.bf16.msra.mxu1 %v6098_v18  ;;  %v2689_v18 = vld [vmem:[%s7896_s12] sm:$0xff] }
 0x789   : > { %v7321_v43 = vadd.f32 %v2400_v32, %v8040_v52  ;;  %6100 = vmatprep.subr.bf16.mxu1 %v6274_v0  ;;  %v2761_v6 = vld [vmem:[%s7897_s13] sm:$0xff] }
 0x78a   : > { %v6101_v62 = vpack.c.bf16 %v7974_v19, %v7973_v25  ;;  %v7330_v26 = vadd.f32 %v2399_v4, %v8041_v50 }
 0x78b   : > { %v7972_v16 = vmax.f32 %v7321_v43, 0.0 }
 0x78c   : > { %v7971_v60 = vmax.f32 %v7330_v26, 0.0  ;;  %6102 = vmatpush3.bf16.msra.mxu1 %v6101_v62 }
 0x78d   : > { %6103 = vmatprep.subr.bf16.mxu1 %v6274_v0 }
 0x78e   : > { %v6104_v5 = vpack.c.bf16 %v7972_v16, %v7971_v60 }
 0x790   : > { %6105 = vmatpush3.bf16.msra.mxu1 %v6104_v5 }
 0x791   : > { %5670 = vmatprep.subr.msk.mxu1 %vm6437_vm2, %v6278_v35 }
 0x793   : > { %5642 = vmatmul.mubr.f32.vlgmr.msra.gmra.mrb[54].mxu1 %v2689_v18 }
 0x794   : > { %5671 = vmatpush3.msk.msra.mxu1 %vm6437_vm2, %v6278_v35 }
 0x795   : > { %6130 = vmatprep.subr.bf16.mxu1 %v6274_v0 }
 0x7c9   : > { %v7349_v48 = vpop.f32.mrb[54].mxu0 }
 0x7ca   : > { %2840 = vrot.lane.b32.xlu0 %v7349_v48, %s8018_s9  ;;  %2838 = vrot.lane.b32.xlu1 %v7349_v48, %s8003_s2  ;;  %v5608_v32 = vpop.f32.mrb[55].mxu0 }
 0x7cb   : > { %5646 = vmatprep.mubr.msk.f32.mxu0 %vm951_vm3, %v7349_v48 }
 0x7ce   : > { %2844 = vrot.lane.b32.xlu0 %v7349_v48, %s8009_s28  ;;  %2842 = vrot.lane.b32.xlu1 %v7349_v48, %s8010_s4 }
 0x7d2   : > { %2848 = vrot.lane.b32.xlu0 %v7349_v48, %s8011_s25  ;;  %2846 = vrot.lane.b32.xlu1 %v7349_v48, %s8012_s24 }
 0x7d6   : > { %2852 = vrot.lane.b32.xlu0 %v7349_v48, %s7998_s23  ;;  %2850 = vrot.lane.b32.xlu1 %v7349_v48, %s8004_s21 }
 0x7da   : > { %2856 = vrot.lane.b32.xlu0 %v7349_v48, %s8013_s26  ;;  %2854 = vrot.lane.b32.xlu1 %v7349_v48, %s7999_s27 }
 0x7de   : > { %2860 = vrot.lane.b32.xlu0 %v7349_v48, %s8014_s5  ;;  %2858 = vrot.lane.b32.xlu1 %v7349_v48, %s8005_s3 }
 0x7e2   : > { %2864 = vrot.lane.b32.xlu0 %v7349_v48, %s8006_s30  ;;  %2862 = vrot.lane.b32.xlu1 %v7349_v48, %s8007_s29 }
 0x7e6   : > { %2764 = vperm.xlu0 %6248, %v2761_v6   ;;  %2866 = vrot.lane.b32.xlu1 %v7349_v48, %s8000_s0 }
 0x83c   : > { %v2841_v4 = vpop.permute.xlu0 %2840  ;;  %v2839_v52 = vpop.permute.xlu1 %2838 }
 0x83d   : > { %5647 = vmatmul.mubr.msk.f32.vlgmr.msra.gmra.mrb[56].mxu0 %vm951_vm3, %v2839_v52 }
 0x83e   : > { %5649 = vmatprep.mubr.msk.f32.mxu0 %vm951_vm3, %v2841_v4 }
 0x840   : > { %v2845_v62 = vpop.permute.xlu0 %2844  ;;  %v2843_v50 = vpop.permute.xlu1 %2842 }
 0x841   : > { %5650 = vmatmul.mubr.msk.f32.gmra.mrb[58].mxu0 %vm951_vm3, %v2843_v50 }
 0x842   : > { %5652 = vmatprep.mubr.msk.f32.mxu0 %vm951_vm3, %v2845_v62 }
 0x844   : > { %v2849_v5 = vpop.permute.xlu0 %2848  ;;  %v2847_v18 = vpop.permute.xlu1 %2846 }
 0x845   : > { %5653 = vmatmul.mubr.msk.f32.gmra.mrb[60].mxu0 %vm951_vm3, %v2847_v18 }
 0x846   : > { %5655 = vmatprep.mubr.msk.f32.mxu0 %vm951_vm3, %v2849_v5 }
 0x848   : > { %v2853_v32 = vpop.permute.xlu0 %2852  ;;  %v2851_v6 = vpop.permute.xlu1 %2850 }
 0x849   : > { %5656 = vmatmul.mubr.msk.f32.gmra.mrb[62].mxu0 %vm951_vm3, %v2851_v6 }
 0x84a   : > { %5658 = vmatprep.mubr.msk.f32.mxu0 %vm951_vm3, %v2853_v32 }
 0x84c   : > { %v2857_v52 = vpop.permute.xlu0 %2856  ;;  %v2855_v4 = vpop.permute.xlu1 %2854 }
 0x84d   : > { %5659 = vmatmul.mubr.msk.f32.gmra.mrb[64].mxu0 %vm951_vm3, %v2855_v4 }
 0x84e   : > { %5661 = vmatprep.mubr.msk.f32.mxu0 %vm951_vm3, %v2857_v52 }
 0x850   : > { %v2861_v50 = vpop.permute.xlu0 %2860  ;;  %v2859_v62 = vpop.permute.xlu1 %2858 }
 0x851   : > { %5662 = vmatmul.mubr.msk.f32.gmra.mrb[66].mxu0 %vm951_vm3, %v2859_v62 }
 0x852   : > { %5664 = vmatprep.mubr.msk.f32.mxu0 %vm951_vm3, %v2861_v50 }
 0x854   : > { %v2865_v18 = vpop.permute.xlu0 %2864  ;;  %v2863_v5 = vpop.permute.xlu1 %2862 }
 0x855   : > { %5665 = vmatmul.mubr.msk.f32.gmra.mrb[68].mxu0 %vm951_vm3, %v2863_v5 }
 0x856   : > { %5667 = vmatprep.mubr.msk.f32.mxu0 %vm951_vm3, %v2865_v18 }
 0x858   : > { %v2867_v6 = vpop.permute.xlu1 %2866 }
 0x859   : > { %5668 = vmatmul.mubr.msk.f32.gmra.mrb[70].mxu0 %vm951_vm3, %v2867_v6 }
 0x85a   : > { %5728 = vmatprep.mubr.msk.f32.mxu0 %vm6275_vm0, %v6276_v1 }
 0x865   : > { %v2765_v32 = vpop.permute.xlu0 %2764 }
 0x866   : > { %v2833_v52 = vpop.f32.mrb[54].mxu1 }
 0x867   : > { %v7403_v4 = vadd.f32 %v2833_v52, %v2765_v32  ;;  %v5643_v60 = vpop.f32.mrb[55].mxu1 }
 0x868   : > { %v3389_v60 = vld [vmem:[%s7900_s16] sm:$0xff] }
 0x869   : > { %3064 = vrot.lane.b32.xlu0 %v7403_v4, %s8018_s9  ;;  %5672 = vmatprep.mubr.msk.f32.mxu1 %vm951_vm3, %v7403_v4 }
 0x86a   : > { %3062 = vrot.lane.b32.xlu1 %v7403_v4, %s8003_s2 }
 0x86d   : > { %3068 = vrot.lane.b32.xlu0 %v7403_v4, %s8009_s28 }
 0x86e   : > { %3066 = vrot.lane.b32.xlu1 %v7403_v4, %s8010_s4 }
 0x871   : > { %3072 = vrot.lane.b32.xlu0 %v7403_v4, %s8011_s25 }
 0x872   : > { %3070 = vrot.lane.b32.xlu1 %v7403_v4, %s8012_s24 }
 0x875   : > { %3076 = vrot.lane.b32.xlu0 %v7403_v4, %s7998_s23 }
 0x876   : > { %3074 = vrot.lane.b32.xlu1 %v7403_v4, %s8004_s21 }
 0x879   : > { %3080 = vrot.lane.b32.xlu0 %v7403_v4, %s8013_s26 }
 0x87a   : > { %3078 = vrot.lane.b32.xlu1 %v7403_v4, %s7999_s27 }
 0x87d   : > { %3084 = vrot.lane.b32.xlu0 %v7403_v4, %s8014_s5 }
 0x87e   : > { %3082 = vrot.lane.b32.xlu1 %v7403_v4, %s8005_s3 }
 0x881   : > { %3088 = vrot.lane.b32.xlu0 %v7403_v4, %s8006_s30 }
 0x882   : > { %3086 = vrot.lane.b32.xlu1 %v7403_v4, %s8007_s29 }
 0x885   : > { %3392 = vperm.xlu0 %6248, %v3389_v60  }
 0x886   : > { %3090 = vrot.lane.b32.xlu1 %v7403_v4, %s8000_s0 }
 0x8db   : > { %v3065_v50 = vpop.permute.xlu0 %3064 }
 0x8dc   : > { %v3063_v62 = vpop.permute.xlu1 %3062 }
 0x8dd   : > { %5673 = vmatmul.mubr.msk.f32.vlgmr.msra.gmra.mrb[56].mxu1 %vm951_vm3, %v3063_v62 }
 0x8de   : > { %5675 = vmatprep.mubr.msk.f32.mxu1 %vm951_vm3, %v3065_v50 }
 0x8df   : > { %v3069_v18 = vpop.permute.xlu0 %3068 }
 0x8e0   : > { %v3067_v5 = vpop.permute.xlu1 %3066 }
 0x8e1   : > { %5676 = vmatmul.mubr.msk.f32.gmra.mrb[58].mxu1 %vm951_vm3, %v3067_v5 }
 0x8e2   : > { %5678 = vmatprep.mubr.msk.f32.mxu1 %vm951_vm3, %v3069_v18 }
 0x8e3   : > { %v3073_v6 = vpop.permute.xlu0 %3072 }
 0x8e4   : > { %v3071_v32 = vpop.permute.xlu1 %3070 }
 0x8e5   : > { %5679 = vmatmul.mubr.msk.f32.gmra.mrb[60].mxu1 %vm951_vm3, %v3071_v32 }
 0x8e6   : > { %5681 = vmatprep.mubr.msk.f32.mxu1 %vm951_vm3, %v3073_v6 }
 0x8e7   : > { %v3077_v52 = vpop.permute.xlu0 %3076 }
 0x8e8   : > { %v3075_v60 = vpop.permute.xlu1 %3074 }
 0x8e9   : > { %5682 = vmatmul.mubr.msk.f32.gmra.mrb[62].mxu1 %vm951_vm3, %v3075_v60 }
 0x8ea   : > { %5684 = vmatprep.mubr.msk.f32.mxu1 %vm951_vm3, %v3077_v52 }
 0x8eb   : > { %v3081_v62 = vpop.permute.xlu0 %3080 }
 0x8ec   : > { %v3079_v50 = vpop.permute.xlu1 %3078 }
 0x8ed   : > { %5685 = vmatmul.mubr.msk.f32.gmra.mrb[64].mxu1 %vm951_vm3, %v3079_v50 }
 0x8ee   : > { %5687 = vmatprep.mubr.msk.f32.mxu1 %vm951_vm3, %v3081_v62 }
 0x8ef   : > { %v3085_v5 = vpop.permute.xlu0 %3084 }
 0x8f0   : > { %v3083_v18 = vpop.permute.xlu1 %3082 }
 0x8f1   : > { %5688 = vmatmul.mubr.msk.f32.gmra.mrb[66].mxu1 %vm951_vm3, %v3083_v18 }
 0x8f2   : > { %5690 = vmatprep.mubr.msk.f32.mxu1 %vm951_vm3, %v3085_v5 }
 0x8f3   : > { %v3089_v32 = vpop.permute.xlu0 %3088 }
 0x8f4   : > { %v3087_v6 = vpop.permute.xlu1 %3086 }
 0x8f5   : > { %5691 = vmatmul.mubr.msk.f32.gmra.mrb[68].mxu1 %vm951_vm3, %v3087_v6 }
 0x8f6   : > { %5693 = vmatprep.mubr.msk.f32.mxu1 %vm951_vm3, %v3089_v32 }
 0x8f8   : > { %v3091_v60 = vpop.permute.xlu1 %3090 }
 0x8f9   : > { %5694 = vmatmul.mubr.msk.f32.gmra.mrb[70].mxu1 %vm951_vm3, %v3091_v60 }
 0x8fa   : > { %5763 = vmatprep.mubr.msk.f32.mxu1 %vm6275_vm0, %v6276_v1 }
 0x910   : > { %v5648_v52 = vpop.f32.mrb[56].mxu0 }
 0x911   : > { %v3046_v62 = vadd.f32 %v5648_v52, %v7403_v4  ;;  %v2966_v50 = vpop.f32.mrb[57].mxu0 }
 0x912   : > { %v3045_v18 = vadd.f32 %v2966_v50, %v7403_v4 }
 0x913   : > { %v3286_v16 = vmax.f32 %v3046_v62, 0.0 }
 0x914   : > { %v3285_v5 = vmax.f32 %v3045_v18, 0.0  ;;  %v5651_v25 = vpop.f32.mrb[58].mxu0 }
 0x915   : > { %v3048_v19 = vadd.f32 %v5651_v25, %v7403_v4  ;;  %v2976_v6 = vpop.f32.mrb[59].mxu0 }
 0x916   : > { %v6131_v57 = vpack.c.bf16 %v3286_v16, %v3285_v5  ;;  %v3047_v32 = vadd.f32 %v2976_v6, %v7403_v4 }
 0x917   : > { %v3288_v58 = vmax.f32 %v3048_v19, 0.0 }
 0x918   : > { %v3287_v60 = vmax.f32 %v3047_v32, 0.0  ;;  %v5654_v46 = vpop.f32.mrb[60].mxu0  ;;  %6132 = vmatpush3.bf16.msra.mxu1 %v6131_v57 }
 0x919   : > { %v3050_v1 = vadd.f32 %v5654_v46, %v7403_v4  ;;  %v2986_v49 = vpop.f32.mrb[61].mxu0  ;;  %6133 = vmatprep.subr.bf16.mxu1 %v6274_v0 }
 0x91a   : > { %v6134_v52 = vpack.c.bf16 %v3288_v58, %v3287_v60  ;;  %v3049_v62 = vadd.f32 %v2986_v49, %v7403_v4 }
 0x91b   : > { %v3290_v50 = vmax.f32 %v3050_v1, 0.0 }
 0x91c   : > { %v3289_v18 = vmax.f32 %v3049_v62, 0.0  ;;  %v5657_v54 = vpop.f32.mrb[62].mxu0  ;;  %6135 = vmatpush3.bf16.msra.mxu1 %v6134_v52 }
 0x91d   : > { %v3052_v25 = vadd.f32 %v5657_v54, %v7403_v4  ;;  %v2996_v16 = vpop.f32.mrb[63].mxu0  ;;  %6136 = vmatprep.subr.bf16.mxu1 %v6274_v0 }
 0x91e   : > { %v6137_v19 = vpack.c.bf16 %v3290_v50, %v3289_v18  ;;  %v3051_v57 = vadd.f32 %v2996_v16, %v7403_v4 }
 0x91f   : > { %v3292_v5 = vmax.f32 %v3052_v25, 0.0 }
 0x920   : > { %v3291_v46 = vmax.f32 %v3051_v57, 0.0  ;;  %v5660_v6 = vpop.f32.mrb[64].mxu0  ;;  %6138 = vmatpush3.bf16.msra.mxu1 %v6137_v19 }
 0x921   : > { %v3054_v58 = vadd.f32 %v5660_v6, %v7403_v4  ;;  %v3006_v32 = vpop.f32.mrb[65].mxu0  ;;  %6139 = vmatprep.subr.bf16.mxu1 %v6274_v0 }
 0x922   : > { %v6140_v49 = vpack.c.bf16 %v3292_v5, %v3291_v46  ;;  %v3053_v60 = vadd.f32 %v3006_v32, %v7403_v4 }
 0x923   : > { %v3294_v1 = vmax.f32 %v3054_v58, 0.0 }
 0x924   : > { %v3293_v54 = vmax.f32 %v3053_v60, 0.0  ;;  %v5663_v52 = vpop.f32.mrb[66].mxu0  ;;  %6141 = vmatpush3.bf16.msra.mxu1 %v6140_v49 }
 0x925   : > { %v3056_v62 = vadd.f32 %v5663_v52, %v7403_v4  ;;  %v3016_v50 = vpop.f32.mrb[67].mxu0  ;;  %6142 = vmatprep.subr.bf16.mxu1 %v6274_v0 }
 0x926   : > { %v6143_v18 = vpack.c.bf16 %v3294_v1, %v3293_v54  ;;  %v3055_v25 = vadd.f32 %v3016_v50, %v7403_v4 }
 0x927   : > { %v3296_v16 = vmax.f32 %v3056_v62, 0.0 }
 0x928   : > { %v3295_v19 = vmax.f32 %v3055_v25, 0.0  ;;  %v5666_v57 = vpop.f32.mrb[68].mxu0  ;;  %6144 = vmatpush3.bf16.msra.mxu1 %v6143_v18 }
 0x929   : > { %v3058_v5 = vadd.f32 %v5666_v57, %v7403_v4  ;;  %v3026_v46 = vpop.f32.mrb[69].mxu0  ;;  %6145 = vmatprep.subr.bf16.mxu1 %v6274_v0 }
 0x92a   : > { %v6146_v6 = vpack.c.bf16 %v3296_v16, %v3295_v19  ;;  %v3057_v58 = vadd.f32 %v3026_v46, %v7403_v4  ;;  %v3317_v16 = vld [vmem:[%s7899_s15] sm:$0xff] }
 0x92b   : > { %v3298_v32 = vmax.f32 %v3058_v5, 0.0 }
 0x92c   : > { %v3297_v49 = vmax.f32 %v3057_v58, 0.0  ;;  %v5669_v60 = vpop.f32.mrb[70].mxu0  ;;  %6147 = vmatpush3.bf16.msra.mxu1 %v6146_v6 }
 0x92d   : > { %v3060_v1 = vadd.f32 %v5669_v60, %v7403_v4  ;;  %v3036_v54 = vpop.f32.mrb[71].mxu0  ;;  %6148 = vmatprep.subr.bf16.mxu1 %v6274_v0 }
 0x92e   : > { %v6149_v52 = vpack.c.bf16 %v3298_v32, %v3297_v49  ;;  %v3059_v62 = vadd.f32 %v3036_v54, %v7403_v4 }
 0x92f   : > { %v3300_v50 = vmax.f32 %v3060_v1, 0.0 }
 0x930   : > { %v3299_v18 = vmax.f32 %v3059_v62, 0.0  ;;  %6150 = vmatpush3.bf16.msra.mxu1 %v6149_v52 }
 0x931   : > { %6151 = vmatprep.subr.bf16.mxu1 %v6274_v0 }
 0x932   : > { %v6152_v25 = vpack.c.bf16 %v3300_v50, %v3299_v18 }
 0x934   : > { %6153 = vmatpush3.bf16.msra.mxu1 %v6152_v25 }
 0x935   : > { %5792 = vmatprep.subr.msk.mxu1 %vm6437_vm2, %v6278_v35 }
 0x937   : > { %5764 = vmatmul.mubr.f32.vlgmr.msra.gmra.mrb[72].mxu1 %v3317_v16 }
 0x938   : > { %5793 = vmatpush3.msk.msra.mxu1 %vm6437_vm2, %v6278_v35 }
 0x9b0   : > { %v5674_v4 = vpop.f32.mrb[56].mxu1 }
 0x9b1   : > { %v3270_v19 = vadd.f32 %v5674_v4, %v7349_v48  ;;  %v3190_v57 = vpop.f32.mrb[57].mxu1 }
 0x9b2   : > { %v3269_v5 = vadd.f32 %v3190_v57, %v7349_v48 }
 0x9b3   : > { %v3302_v46 = vmax.f32 %v3270_v19, 0.0 }
 0x9b4   : > { %v3301_v6 = vmax.f32 %v3269_v5, 0.0  ;;  %v5677_v58 = vpop.f32.mrb[58].mxu1 }
 0x9b5   : > { %v3272_v32 = vadd.f32 %v5677_v58, %v7349_v48  ;;  %v3200_v49 = vpop.f32.mrb[59].mxu1 }
 0x9b6   : > { %v6107_v60 = vpack.c.bf16 %v3302_v46, %v3301_v6  ;;  %v3271_v1 = vadd.f32 %v3200_v49, %v7349_v48 }
 0x9b7   : > { %v3304_v54 = vmax.f32 %v3272_v32, 0.0 }
 0x9b8   : > { %v3303_v52 = vmax.f32 %v3271_v1, 0.0  ;;  %v5680_v62 = vpop.f32.mrb[60].mxu1  ;;  %6108 = vmatpush3.bf16.msra.mxu0 %v6107_v60 }
 0x9b9   : > { %v3274_v50 = vadd.f32 %v5680_v62, %v7349_v48  ;;  %v3210_v18 = vpop.f32.mrb[61].mxu1  ;;  %6109 = vmatprep.subr.bf16.mxu0 %v6274_v0 }
 0x9ba   : > { %v6110_v25 = vpack.c.bf16 %v3304_v54, %v3303_v52  ;;  %v3273_v16 = vadd.f32 %v3210_v18, %v7349_v48 }
 0x9bb   : > { %v3306_v4 = vmax.f32 %v3274_v50, 0.0 }
 0x9bc   : > { %v3305_v19 = vmax.f32 %v3273_v16, 0.0  ;;  %v5683_v57 = vpop.f32.mrb[62].mxu1  ;;  %6111 = vmatpush3.bf16.msra.mxu0 %v6110_v25 }
 0x9bd   : > { %v3276_v5 = vadd.f32 %v5683_v57, %v7349_v48  ;;  %v3220_v46 = vpop.f32.mrb[63].mxu1  ;;  %6112 = vmatprep.subr.bf16.mxu0 %v6274_v0 }
 0x9be   : > { %v6113_v6 = vpack.c.bf16 %v3306_v4, %v3305_v19  ;;  %v3275_v58 = vadd.f32 %v3220_v46, %v7349_v48 }
 0x9bf   : > { %v3308_v32 = vmax.f32 %v3276_v5, 0.0 }
 0x9c0   : > { %v3307_v49 = vmax.f32 %v3275_v58, 0.0  ;;  %v5686_v60 = vpop.f32.mrb[64].mxu1  ;;  %6114 = vmatpush3.bf16.msra.mxu0 %v6113_v6 }
 0x9c1   : > { %v3278_v1 = vadd.f32 %v5686_v60, %v7349_v48  ;;  %v3230_v54 = vpop.f32.mrb[65].mxu1  ;;  %6115 = vmatprep.subr.bf16.mxu0 %v6274_v0 }
 0x9c2   : > { %v6116_v52 = vpack.c.bf16 %v3308_v32, %v3307_v49  ;;  %v3277_v62 = vadd.f32 %v3230_v54, %v7349_v48 }
 0x9c3   : > { %v3310_v50 = vmax.f32 %v3278_v1, 0.0 }
 0x9c4   : > { %v3309_v18 = vmax.f32 %v3277_v62, 0.0  ;;  %v5689_v25 = vpop.f32.mrb[66].mxu1  ;;  %6117 = vmatpush3.bf16.msra.mxu0 %v6116_v52 }
 0x9c5   : > { %v3280_v16 = vadd.f32 %v5689_v25, %v7349_v48  ;;  %v3240_v4 = vpop.f32.mrb[67].mxu1  ;;  %6118 = vmatprep.subr.bf16.mxu0 %v6274_v0 }
 0x9c6   : > { %v6119_v19 = vpack.c.bf16 %v3310_v50, %v3309_v18  ;;  %v3279_v57 = vadd.f32 %v3240_v4, %v7349_v48 }
 0x9c7   : > { %v3312_v5 = vmax.f32 %v3280_v16, 0.0 }
 0x9c8   : > { %v3311_v46 = vmax.f32 %v3279_v57, 0.0  ;;  %v5692_v6 = vpop.f32.mrb[68].mxu1  ;;  %6120 = vmatpush3.bf16.msra.mxu0 %v6119_v19  ;;  %v3318_v57 = vld [vmem:[%s7898_s14] sm:$0xff] }
 0x9c9   : > { %v3282_v58 = vadd.f32 %v5692_v6, %v7349_v48  ;;  %v3250_v32 = vpop.f32.mrb[69].mxu1  ;;  %6121 = vmatprep.subr.bf16.mxu0 %v6274_v0 }
 0x9ca   : > { %v6122_v49 = vpack.c.bf16 %v3312_v5, %v3311_v46  ;;  %v3281_v60 = vadd.f32 %v3250_v32, %v7349_v48 }
 0x9cb   : > { %v3314_v1 = vmax.f32 %v3282_v58, 0.0 }
 0x9cc   : > { %v3313_v54 = vmax.f32 %v3281_v60, 0.0  ;;  %v5695_v52 = vpop.f32.mrb[70].mxu1  ;;  %6123 = vmatpush3.bf16.msra.mxu0 %v6122_v49 }
 0x9cd   : > { %v3284_v62 = vadd.f32 %v5695_v52, %v7349_v48  ;;  %v3260_v50 = vpop.f32.mrb[71].mxu1  ;;  %6124 = vmatprep.subr.bf16.mxu0 %v6274_v0 }
 0x9ce   : > { %v6125_v18 = vpack.c.bf16 %v3314_v1, %v3313_v54  ;;  %v3283_v25 = vadd.f32 %v3260_v50, %v7349_v48  ;;  %v3393_v48 = vpop.permute.xlu0 %3392 }
 0x9cf   : > { %v3316_v16 = vmax.f32 %v3284_v62, 0.0 }
 0x9d0   : > { %v3315_v4 = vmax.f32 %v3283_v25, 0.0  ;;  %6126 = vmatpush3.bf16.msra.mxu0 %v6125_v18 }
 0x9d1   : > { %6127 = vmatprep.subr.bf16.mxu0 %v6274_v0 }
 0x9d2   : > { %v6128_v19 = vpack.c.bf16 %v3316_v16, %v3315_v4 }
 0x9d4   : > { %6129 = vmatpush3.bf16.msra.mxu0 %v6128_v19 }
 0x9d5   : > { %5766 = vmatprep.subr.msk.mxu0 %vm6437_vm2, %v6278_v35 }
 0x9d7   : > { %5729 = vmatmul.mubr.f32.vlgmr.msra.gmra.mrb[72].mxu0 %v3318_v57 }
 0x9d8   : > { %5767 = vmatpush3.msk.msra.mxu0 %vm6437_vm2, %v6278_v35 }
 0xa0a   : > { %v3461_v5 = vpop.f32.mrb[72].mxu1 }
 0xa0b   : > { %v7521_v46 = vadd.f32 %v3461_v5, %v3393_v48  ;;  %v5765_v0 = vpop.f32.mrb[73].mxu1 }
 0xa0d   : > { %3692 = vrot.lane.b32.xlu0 %v7521_v46, %s8018_s9  ;;  %3690 = vrot.lane.b32.xlu1 %v7521_v46, %s8003_s2 }
 0xa0e   : > { %5794 = vmatprep.mubr.msk.f32.mxu1 %vm951_vm3, %v7521_v46 }
 0xa11   : > { %3696 = vrot.lane.b32.xlu0 %v7521_v46, %s8009_s28  ;;  %3694 = vrot.lane.b32.xlu1 %v7521_v46, %s8010_s4 }
 0xa15   : > { %3700 = vrot.lane.b32.xlu0 %v7521_v46, %s8011_s25  ;;  %3698 = vrot.lane.b32.xlu1 %v7521_v46, %s8012_s24 }
 0xa19   : > { %3704 = vrot.lane.b32.xlu0 %v7521_v46, %s7998_s23  ;;  %3702 = vrot.lane.b32.xlu1 %v7521_v46, %s8004_s21 }
 0xa1d   : > { %3708 = vrot.lane.b32.xlu0 %v7521_v46, %s8013_s26  ;;  %3706 = vrot.lane.b32.xlu1 %v7521_v46, %s7999_s27 }
 0xa21   : > { %3712 = vrot.lane.b32.xlu0 %v7521_v46, %s8014_s5  ;;  %3710 = vrot.lane.b32.xlu1 %v7521_v46, %s8005_s3 }
 0xa25   : > { %3716 = vrot.lane.b32.xlu0 %v7521_v46, %s8006_s30  ;;  %3714 = vrot.lane.b32.xlu1 %v7521_v46, %s8007_s29 }
 0xa29   : > { %3718 = vrot.lane.b32.xlu1 %v7521_v46, %s8000_s0 }
 0xa7f   : > { %v3693_v6 = vpop.permute.xlu0 %3692  ;;  %v3691_v58 = vpop.permute.xlu1 %3690 }
 0xa80   : > { %5795 = vmatmul.mubr.msk.f32.vlgmr.msra.gmra.mrb[74].mxu1 %vm951_vm3, %v3691_v58 }
 0xa81   : > { %5797 = vmatprep.mubr.msk.f32.mxu1 %vm951_vm3, %v3693_v6 }
 0xa83   : > { %v3697_v32 = vpop.permute.xlu0 %3696  ;;  %v3695_v49 = vpop.permute.xlu1 %3694 }
 0xa84   : > { %5798 = vmatmul.mubr.msk.f32.gmra.mrb[76].mxu1 %vm951_vm3, %v3695_v49 }
 0xa85   : > { %5800 = vmatprep.mubr.msk.f32.mxu1 %vm951_vm3, %v3697_v32 }
 0xa87   : > { %v3701_v60 = vpop.permute.xlu0 %3700  ;;  %v3699_v1 = vpop.permute.xlu1 %3698 }
 0xa88   : > { %5801 = vmatmul.mubr.msk.f32.gmra.mrb[78].mxu1 %vm951_vm3, %v3699_v1 }
 0xa89   : > { %5803 = vmatprep.mubr.msk.f32.mxu1 %vm951_vm3, %v3701_v60 }
 0xa8b   : > { %v3705_v54 = vpop.permute.xlu0 %3704  ;;  %v3703_v52 = vpop.permute.xlu1 %3702 }
 0xa8c   : > { %5804 = vmatmul.mubr.msk.f32.gmra.mrb[80].mxu1 %vm951_vm3, %v3703_v52 }
 0xa8d   : > { %5806 = vmatprep.mubr.msk.f32.mxu1 %vm951_vm3, %v3705_v54 }
 0xa8f   : > { %v3709_v62 = vpop.permute.xlu0 %3708  ;;  %v3707_v50 = vpop.permute.xlu1 %3706 }
 0xa90   : > { %5807 = vmatmul.mubr.msk.f32.gmra.mrb[82].mxu1 %vm951_vm3, %v3707_v50 }
 0xa91   : > { %5809 = vmatprep.mubr.msk.f32.mxu1 %vm951_vm3, %v3709_v62 }
 0xa93   : > { %v3713_v18 = vpop.permute.xlu0 %3712  ;;  %v3711_v25 = vpop.permute.xlu1 %3710 }
 0xa94   : > { %5810 = vmatmul.mubr.msk.f32.gmra.mrb[84].mxu1 %vm951_vm3, %v3711_v25 }
 0xa95   : > { %5812 = vmatprep.mubr.msk.f32.mxu1 %vm951_vm3, %v3713_v18 }
 0xa97   : > { %v3717_v16 = vpop.permute.xlu0 %3716  ;;  %v3715_v4 = vpop.permute.xlu1 %3714 }
 0xa98   : > { %5813 = vmatmul.mubr.msk.f32.gmra.mrb[86].mxu1 %vm951_vm3, %v3715_v4 }
 0xa99   : > { %5815 = vmatprep.mubr.msk.f32.mxu1 %vm951_vm3, %v3717_v16  ;;  %v3979_v16 = vld [vmem:[%s7901_s17] sm:$0xff] }
 0xa9b   : > { %v3719_v19 = vpop.permute.xlu1 %3718 }
 0xa9c   : > { %5816 = vmatmul.mubr.msk.f32.gmra.mrb[88].mxu1 %vm951_vm3, %v3719_v19 }
 0xaaa   : > { %v7570_v57 = vpop.f32.mrb[72].mxu0 }
 0xaab   : > { %3466 = vrot.lane.b32.xlu0 %v7570_v57, %s8003_s2  ;;  %3468 = vrot.lane.b32.xlu1 %v7570_v57, %s8018_s9  ;;  %v5730_v48 = vpop.f32.mrb[73].mxu0 }
 0xaac   : > { %5768 = vmatprep.mubr.msk.f32.mxu0 %vm951_vm3, %v7570_v57 }
 0xaaf   : > { %3470 = vrot.lane.b32.xlu0 %v7570_v57, %s8010_s4  ;;  %3472 = vrot.lane.b32.xlu1 %v7570_v57, %s8009_s28 }
 0xab3   : > { %3474 = vrot.lane.b32.xlu0 %v7570_v57, %s8012_s24  ;;  %3476 = vrot.lane.b32.xlu1 %v7570_v57, %s8011_s25 }
 0xab7   : > { %3478 = vrot.lane.b32.xlu0 %v7570_v57, %s8004_s21  ;;  %3480 = vrot.lane.b32.xlu1 %v7570_v57, %s7998_s23 }
 0xabb   : > { %3482 = vrot.lane.b32.xlu0 %v7570_v57, %s7999_s27  ;;  %3484 = vrot.lane.b32.xlu1 %v7570_v57, %s8013_s26 }
 0xabf   : > { %3486 = vrot.lane.b32.xlu0 %v7570_v57, %s8005_s3  ;;  %3488 = vrot.lane.b32.xlu1 %v7570_v57, %s8014_s5 }
 0xac3   : > { %3490 = vrot.lane.b32.xlu0 %v7570_v57, %s8007_s29  ;;  %3492 = vrot.lane.b32.xlu1 %v7570_v57, %s8006_s30 }
 0xac7   : > { %3494 = vrot.lane.b32.xlu0 %v7570_v57, %s8000_s0 }
 0xb1d   : > { %v3467_v5 = vpop.permute.xlu0 %3466  ;;  %v3469_v0 = vpop.permute.xlu1 %3468 }
 0xb1e   : > { %5769 = vmatmul.mubr.msk.f32.vlgmr.msra.gmra.mrb[74].mxu0 %vm951_vm3, %v3467_v5 }
 0xb1f   : > { %5771 = vmatprep.mubr.msk.f32.mxu0 %vm951_vm3, %v3469_v0 }
 0xb21   : > { %v3471_v6 = vpop.permute.xlu0 %3470  ;;  %v3473_v58 = vpop.permute.xlu1 %3472 }
 0xb22   : > { %5772 = vmatmul.mubr.msk.f32.gmra.mrb[76].mxu0 %vm951_vm3, %v3471_v6 }
 0xb23   : > { %5774 = vmatprep.mubr.msk.f32.mxu0 %vm951_vm3, %v3473_v58 }
 0xb25   : > { %v3475_v32 = vpop.permute.xlu0 %3474  ;;  %v3477_v49 = vpop.permute.xlu1 %3476 }
 0xb26   : > { %5775 = vmatmul.mubr.msk.f32.gmra.mrb[78].mxu0 %vm951_vm3, %v3475_v32 }
 0xb27   : > { %5777 = vmatprep.mubr.msk.f32.mxu0 %vm951_vm3, %v3477_v49 }
 0xb29   : > { %v3479_v60 = vpop.permute.xlu0 %3478  ;;  %v3481_v1 = vpop.permute.xlu1 %3480 }
 0xb2a   : > { %5778 = vmatmul.mubr.msk.f32.gmra.mrb[80].mxu0 %vm951_vm3, %v3479_v60 }
 0xb2b   : > { %5780 = vmatprep.mubr.msk.f32.mxu0 %vm951_vm3, %v3481_v1 }
 0xb2d   : > { %v3483_v54 = vpop.permute.xlu0 %3482  ;;  %v3485_v52 = vpop.permute.xlu1 %3484 }
 0xb2e   : > { %5781 = vmatmul.mubr.msk.f32.gmra.mrb[82].mxu0 %vm951_vm3, %v3483_v54 }
 0xb2f   : > { %5783 = vmatprep.mubr.msk.f32.mxu0 %vm951_vm3, %v3485_v52 }
 0xb31   : > { %v3487_v62 = vpop.permute.xlu0 %3486  ;;  %v3489_v50 = vpop.permute.xlu1 %3488 }
 0xb32   : > { %5784 = vmatmul.mubr.msk.f32.gmra.mrb[84].mxu0 %vm951_vm3, %v3487_v62 }
 0xb33   : > { %5786 = vmatprep.mubr.msk.f32.mxu0 %vm951_vm3, %v3489_v50 }
 0xb35   : > { %v3491_v18 = vpop.permute.xlu0 %3490  ;;  %v3493_v25 = vpop.permute.xlu1 %3492 }
 0xb36   : > { %5787 = vmatmul.mubr.msk.f32.gmra.mrb[86].mxu0 %vm951_vm3, %v3491_v18 }
 0xb37   : > { %5789 = vmatprep.mubr.msk.f32.mxu0 %vm951_vm3, %v3493_v25 }
 0xb39   : > { %v3495_v4 = vpop.permute.xlu0 %3494 }
 0xb3a   : > { %5790 = vmatmul.mubr.msk.f32.gmra.mrb[88].mxu0 %vm951_vm3, %v3495_v4 }
 0xb3b   : > { %5850 = vmatprep.mubr.f32.mxu0 %v3979_v16 }
 0xb53   : > { %v5796_v19 = vpop.f32.mrb[74].mxu1 }
 0xb54   : > { %v3898_v48 = vadd.f32 %v5796_v19, %v7570_v57  ;;  %v3818_v5 = vpop.f32.mrb[75].mxu1 }
 0xb55   : > { %v3897_v0 = vadd.f32 %v3818_v5, %v7570_v57 }
 0xb56   : > { %v3946_v6 = vadd.f32 %v3898_v48, %v2674_v51 }
 0xb57   : > { %v3945_v58 = vadd.f32 %v3897_v0, %v2673_v55  ;;  %v5799_v32 = vpop.f32.mrb[76].mxu1 }
 0xb58   : > { %v3962_v49 = vmax.f32 %v3946_v6, 0.0  ;;  %v3900_v60 = vadd.f32 %v5799_v32, %v7570_v57  ;;  %v3828_v1 = vpop.f32.mrb[77].mxu1 }
 0xb59   : > { %v3961_v54 = vmax.f32 %v3945_v58, 0.0  ;;  %v3899_v52 = vadd.f32 %v3828_v1, %v7570_v57 }
 0xb5a   : > { %v3948_v62 = vadd.f32 %v3900_v60, %v2676_v15 }
 0xb5b   : > { %v3947_v50 = vadd.f32 %v3899_v52, %v2675_v33  ;;  %v5802_v18 = vpop.f32.mrb[78].mxu1  ;;  %v6154_v44 = vpack.c.bf16 %v3962_v49, %v3961_v54 }
 0xb5c   : > { %v3964_v51 = vmax.f32 %v3948_v62, 0.0  ;;  %v3902_v53 = vadd.f32 %v5802_v18, %v7570_v57  ;;  %v3838_v55 = vpop.f32.mrb[79].mxu1  ;;  %v8042_v18 = vmax.f32 %v7142_v30, 0.0  ;;  %v8045_v30 = vmax.f32 %v7168_v17, 0.0 }
 0xb5d   : > { %v3963_v25 = vmax.f32 %v3947_v50, 0.0  ;;  %v3901_v16 = vadd.f32 %v3838_v55, %v7570_v57  ;;  %6155 = vmatprep.subr.bf16.mxu0 %v6154_v44 }
 0xb5e   : > { %v3950_v4 = vadd.f32 %v3902_v53, %v2678_v10  ;;  %6157 = vmatpush3.bf16.msra.mxu0 %v6154_v44 }
 0xb5f   : > { %v3949_v40 = vadd.f32 %v3901_v16, %v2677_v24  ;;  %v5805_v15 = vpop.f32.mrb[80].mxu1  ;;  %v6158_v13 = vpack.c.bf16 %v3964_v51, %v3963_v25 }
 0xb60   : > { %v3966_v33 = vmax.f32 %v3950_v4, 0.0  ;;  %v3904_v19 = vadd.f32 %v5805_v15, %v7570_v57  ;;  %v3848_v48 = vpop.f32.mrb[81].mxu1  ;;  %v8044_v4 = vmax.f32 %v7159_v39, 0.0  ;;  %v8047_v39 = vmax.f32 %v7185_v37, 0.0 }
 0xb61   : > { %v3965_v5 = vmax.f32 %v3949_v40, 0.0  ;;  %v3903_v0 = vadd.f32 %v3848_v48, %v7570_v57  ;;  %6159 = vmatprep.subr.bf16.mxu0 %v6158_v13 }
 0xb62   : > { %v3952_v6 = vadd.f32 %v3904_v19, %v2680_v47  ;;  %6161 = vmatpush3.bf16.msra.mxu0 %v6158_v13 }
 0xb63   : > { %v3951_v21 = vadd.f32 %v3903_v0, %v2679_v31  ;;  %v5808_v10 = vpop.f32.mrb[82].mxu1  ;;  %v6162_v22 = vpack.c.bf16 %v3966_v33, %v3965_v5 }
 0xb64   : > { %v3968_v24 = vmax.f32 %v3952_v6, 0.0  ;;  %v3906_v58 = vadd.f32 %v5808_v10, %v7570_v57  ;;  %v3858_v32 = vpop.f32.mrb[83].mxu1  ;;  %v8046_v6 = vmax.f32 %v7176_v63, 0.0  ;;  %v3977_v63 = vld [vmem:[%s7902_s18] sm:$0xff] }
 0xb65   : > { %v3967_v49 = vmax.f32 %v3951_v21, 0.0  ;;  %v3905_v60 = vadd.f32 %v3858_v32, %v7570_v57  ;;  %6163 = vmatprep.subr.bf16.mxu0 %v6162_v22  ;;  %5885 = vmatprep.mubr.f32.mxu1 %v3977_v63 }
 0xb66   : > { %v3954_v1 = vadd.f32 %v3906_v58, %v2682_v12  ;;  %6165 = vmatpush3.bf16.msra.mxu0 %v6162_v22 }
 0xb67   : > { %v3953_v61 = vadd.f32 %v3905_v60, %v2681_v42  ;;  %v5811_v47 = vpop.f32.mrb[84].mxu1  ;;  %v6166_v29 = vpack.c.bf16 %v3968_v24, %v3967_v49 }
 0xb68   : > { %v3970_v31 = vmax.f32 %v3954_v1, 0.0  ;;  %v3908_v54 = vadd.f32 %v5811_v47, %v7570_v57  ;;  %v3868_v52 = vpop.f32.mrb[85].mxu1  ;;  %v8048_v1 = vmax.f32 %v7208_v41, 0.0  ;;  %v8049_v47 = vmax.f32 %v7212_v59, 0.0 }
 0xb69   : > { %v3969_v62 = vmax.f32 %v3953_v61, 0.0  ;;  %v3907_v50 = vadd.f32 %v3868_v52, %v7570_v57  ;;  %6167 = vmatprep.subr.bf16.mxu0 %v6166_v29 }
 0xb6a   : > { %v3956_v44 = vadd.f32 %v3908_v54, %v8042_v18  ;;  %6169 = vmatpush3.bf16.msra.mxu0 %v6166_v29 }
 0xb6b   : > { %v3955_v12 = vadd.f32 %v3907_v50, %v8043_v11  ;;  %v5814_v51 = vpop.f32.mrb[86].mxu1  ;;  %v6170_v14 = vpack.c.bf16 %v3970_v31, %v3969_v62 }
 0xb6c   : > { %v3972_v42 = vmax.f32 %v3956_v44, 0.0  ;;  %v3910_v53 = vadd.f32 %v5814_v51, %v7570_v57  ;;  %v3878_v55 = vpop.f32.mrb[87].mxu1  ;;  %v8050_v44 = vmax.f32 %v7220_v56, 0.0  ;;  %v8053_v56 = vmax.f32 %v7245_v7, 0.0 }
 0xb6d   : > { %v3971_v25 = vmax.f32 %v3955_v12, 0.0  ;;  %v3909_v16 = vadd.f32 %v3878_v55, %v7570_v57  ;;  %6171 = vmatprep.subr.bf16.mxu0 %v6170_v14  ;;  %v8051_v12 = vmax.f32 %v7228_v9, 0.0 }
 0xb6e   : > { %v3958_v40 = vadd.f32 %v3910_v53, %v8044_v4  ;;  %6173 = vmatpush3.bf16.msra.mxu0 %v6170_v14 }
 0xb6f   : > { %v3957_v15 = vadd.f32 %v3909_v16, %v8045_v30  ;;  %v5817_v13 = vpop.f32.mrb[88].mxu1  ;;  %v6174_v28 = vpack.c.bf16 %v3972_v42, %v3971_v25  ;;  %v8052_v16 = vmax.f32 %v7236_v20, 0.0  ;;  %v8055_v20 = vmax.f32 %v7262_v8, 0.0 }
 0xb70   : > { %v3974_v33 = vmax.f32 %v3958_v40, 0.0  ;;  %v3912_v19 = vadd.f32 %v5817_v13, %v7570_v57  ;;  %v3888_v48 = vpop.f32.mrb[89].mxu1 }
 0xb71   : > { %v3973_v5 = vmax.f32 %v3957_v15, 0.0  ;;  %v3911_v0 = vadd.f32 %v3888_v48, %v7570_v57  ;;  %6175 = vmatprep.subr.bf16.mxu0 %v6174_v28  ;;  %v3980_v57 = vld [vmem:[%s7901_s17 + $0x8] sm:$0xff]  ;;  %v8054_v48 = vmax.f32 %v7253_v3, 0.0  ;;  %v8057_v3 = vmax.f32 %v7279_v23, 0.0 }
 0xb72   : > { %v3960_v21 = vadd.f32 %v3912_v19, %v8046_v6  ;;  %6177 = vmatpush3.bf16.msra.mxu0 %v6174_v28 }
 0xb73   : > { %v3959_v10 = vadd.f32 %v3911_v0, %v8047_v39  ;;  %v6178_v22 = vpack.c.bf16 %v3974_v33, %v3973_v5 }
 0xb74   : > { %v3976_v17 = vmax.f32 %v3960_v21, 0.0 }
 0xb75   : > { %v3975_v24 = vmax.f32 %v3959_v10, 0.0  ;;  %6179 = vmatprep.subr.bf16.mxu0 %v6178_v22 }
 0xb76   : > { %6181 = vmatpush3.bf16.msra.mxu0 %v6178_v22 }
 0xb77   : > { %v6182_v58 = vpack.c.bf16 %v3976_v17, %v3975_v24  ;;  %v8056_v24 = vmax.f32 %v7270_v45, 0.0  ;;  %v8059_v45 = vmax.f32 %v7296_v27, 0.0 }
 0xb79   : > { %6183 = vmatprep.subr.bf16.mxu0 %v6182_v58 }
 0xb7a   : > { %6185 = vmatpush3.bf16.msra.mxu0 %v6182_v58 }
 0xb7b   : > { %5888 = vmatprep.subr.msk.mxu0 %vm6437_vm2, %v6278_v35 }
 0xb7d   : > { %5851 = vmatmul.mubr.f32.vlgmr.msra.gmra.mrb[90].mxu0 %v3980_v57 }
 0xb7e   : > { %5889 = vmatpush3.msk.msra.mxu0 %vm6437_vm2, %v6278_v35 }
 0xbf1   : > { %v5770_v37 = vpop.f32.mrb[74].mxu0 }
 0xbf2   : > { %v3674_v32 = vadd.f32 %v5770_v37, %v7521_v46  ;;  %v3594_v49 = vpop.f32.mrb[75].mxu0 }
 0xbf3   : > { %v3673_v60 = vadd.f32 %v3594_v49, %v7521_v46 }
 0xbf4   : > { %v3914_v61 = vadd.f32 %v3674_v32, %v8048_v1 }
 0xbf5   : > { %v3913_v29 = vadd.f32 %v3673_v60, %v8049_v47  ;;  %v5773_v31 = vpop.f32.mrb[76].mxu0 }
 0xbf6   : > { %v3930_v54 = vmax.f32 %v3914_v61, 0.0  ;;  %v3676_v52 = vadd.f32 %v5773_v31, %v7521_v46  ;;  %v3604_v62 = vpop.f32.mrb[77].mxu0  ;;  %v8058_v61 = vmax.f32 %v7287_v36, 0.0  ;;  %v8061_v36 = vmax.f32 %v7313_v2, 0.0 }
 0xbf7   : > { %v3929_v50 = vmax.f32 %v3913_v29, 0.0  ;;  %v3675_v18 = vadd.f32 %v3604_v62, %v7521_v46 }
 0xbf8   : > { %v3916_v11 = vadd.f32 %v3676_v52, %v8050_v44  ;;  %v8060_v44 = vmax.f32 %v7304_v38, 0.0  ;;  %v8063_v38 = vmax.f32 %v7330_v26, 0.0 }
 0xbf9   : > { %v3915_v51 = vadd.f32 %v3675_v18, %v8051_v12  ;;  %v5776_v14 = vpop.f32.mrb[78].mxu0  ;;  %v6186_v41 = vpack.c.bf16 %v3930_v54, %v3929_v50 }
 0xbfa   : > { %v3932_v42 = vmax.f32 %v3916_v11, 0.0  ;;  %v3678_v59 = vadd.f32 %v5776_v14, %v7521_v46  ;;  %v3614_v53 = vpop.f32.mrb[79].mxu0 }
 0xbfb   : > { %v3931_v55 = vmax.f32 %v3915_v51, 0.0  ;;  %v3677_v25 = vadd.f32 %v3614_v53, %v7521_v46  ;;  %6187 = vmatprep.subr.bf16.mxu1 %v6186_v41 }
 0xbfc   : > { %v3918_v4 = vadd.f32 %v3678_v59, %v8052_v16  ;;  %6189 = vmatpush3.bf16.msra.mxu1 %v6186_v41 }
 0xbfd   : > { %v3917_v40 = vadd.f32 %v3677_v25, %v8053_v56  ;;  %v5779_v30 = vpop.f32.mrb[80].mxu0  ;;  %v6190_v9 = vpack.c.bf16 %v3932_v42, %v3931_v55  ;;  %v8062_v55 = vmax.f32 %v7321_v43, 0.0 }
 0xbfe   : > { %v3934_v15 = vmax.f32 %v3918_v4, 0.0  ;;  %v3680_v13 = vadd.f32 %v5779_v30, %v7521_v46  ;;  %v3624_v28 = vpop.f32.mrb[81].mxu0 }
 0xbff   : > { %v3933_v33 = vmax.f32 %v3917_v40, 0.0  ;;  %v3679_v19 = vadd.f32 %v3624_v28, %v7521_v46  ;;  %6191 = vmatprep.subr.bf16.mxu1 %v6190_v9 }
 0xc00   : > { %v3920_v5 = vadd.f32 %v3680_v13, %v8054_v48  ;;  %6193 = vmatpush3.bf16.msra.mxu1 %v6190_v9 }
 0xc01   : > { %v3919_v0 = vadd.f32 %v3679_v19, %v8055_v20  ;;  %v5782_v6 = vpop.f32.mrb[82].mxu0  ;;  %v6194_v7 = vpack.c.bf16 %v3934_v15, %v3933_v33 }
 0xc02   : > { %v3936_v21 = vmax.f32 %v3920_v5, 0.0  ;;  %v3682_v39 = vadd.f32 %v5782_v6, %v7521_v46  ;;  %v3634_v10 = vpop.f32.mrb[83].mxu0 }
 0xc03   : > { %v3935_v22 = vmax.f32 %v3919_v0, 0.0  ;;  %v3681_v17 = vadd.f32 %v3634_v10, %v7521_v46  ;;  %6195 = vmatprep.subr.bf16.mxu1 %v6194_v7 }
 0xc04   : > { %v3922_v58 = vadd.f32 %v3682_v39, %v8056_v24  ;;  %6197 = vmatpush3.bf16.msra.mxu1 %v6194_v7 }
 0xc05   : > { %v3921_v57 = vadd.f32 %v3681_v17, %v8057_v3  ;;  %v5785_v63 = vpop.f32.mrb[84].mxu0  ;;  %v6198_v8 = vpack.c.bf16 %v3936_v21, %v3935_v22 }
 0xc06   : > { %v3938_v37 = vmax.f32 %v3922_v58, 0.0  ;;  %v3684_v32 = vadd.f32 %v5785_v63, %v7521_v46  ;;  %v3644_v49 = vpop.f32.mrb[85].mxu0 }
 0xc07   : > { %v3937_v60 = vmax.f32 %v3921_v57, 0.0  ;;  %v3683_v1 = vadd.f32 %v3644_v49, %v7521_v46  ;;  %6199 = vmatprep.subr.bf16.mxu1 %v6198_v8 }
 0xc08   : > { %v3924_v47 = vadd.f32 %v3684_v32, %v8058_v61  ;;  %6201 = vmatpush3.bf16.msra.mxu1 %v6198_v8 }
 0xc09   : > { %v3923_v29 = vadd.f32 %v3683_v1, %v8059_v45  ;;  %v5788_v31 = vpop.f32.mrb[86].mxu0  ;;  %v6202_v23 = vpack.c.bf16 %v3938_v37, %v3937_v60 }
 0xc0a   : > { %v3940_v54 = vmax.f32 %v3924_v47, 0.0  ;;  %v3686_v52 = vadd.f32 %v5788_v31, %v7521_v46  ;;  %v3654_v62 = vpop.f32.mrb[87].mxu0 }
 0xc0b   : > { %v3939_v50 = vmax.f32 %v3923_v29, 0.0  ;;  %v3685_v18 = vadd.f32 %v3654_v62, %v7521_v46  ;;  %6203 = vmatprep.subr.bf16.mxu1 %v6202_v23 }
 0xc0c   : > { %v3926_v11 = vadd.f32 %v3686_v52, %v8060_v44  ;;  %6205 = vmatpush3.bf16.msra.mxu1 %v6202_v23 }
 0xc0d   : > { %v3925_v12 = vadd.f32 %v3685_v18, %v8061_v36  ;;  %v5791_v51 = vpop.f32.mrb[88].mxu0  ;;  %v6206_v27 = vpack.c.bf16 %v3940_v54, %v3939_v50 }
 0xc0e   : > { %v3942_v14 = vmax.f32 %v3926_v11, 0.0  ;;  %v3688_v41 = vadd.f32 %v5791_v51, %v7521_v46  ;;  %v3664_v42 = vpop.f32.mrb[89].mxu0 }
 0xc0f   : > { %v3941_v59 = vmax.f32 %v3925_v12, 0.0  ;;  %v3687_v53 = vadd.f32 %v3664_v42, %v7521_v46  ;;  %6207 = vmatprep.subr.bf16.mxu1 %v6206_v27  ;;  %v3978_v46 = vld [vmem:[%s7902_s18 + $0x8] sm:$0xff] }
 0xc10   : > { %v3928_v25 = vadd.f32 %v3688_v41, %v8062_v55  ;;  %6209 = vmatpush3.bf16.msra.mxu1 %v6206_v27 }
 0xc11   : > { %v3927_v16 = vadd.f32 %v3687_v53, %v8063_v38  ;;  %v6210_v4 = vpack.c.bf16 %v3942_v14, %v3941_v59 }
 0xc12   : > { %v3944_v2 = vmax.f32 %v3928_v25, 0.0 }
 0xc13   : > { %v3943_v56 = vmax.f32 %v3927_v16, 0.0  ;;  %6211 = vmatprep.subr.bf16.mxu1 %v6210_v4 }
 0xc14   : > { %6213 = vmatpush3.bf16.msra.mxu1 %v6210_v4 }
 0xc15   : > { %v6214_v40 = vpack.c.bf16 %v3944_v2, %v3943_v56 }
 0xc17   : > { %6215 = vmatprep.subr.bf16.mxu1 %v6214_v40 }
 0xc18   : > { %6217 = vmatpush3.bf16.msra.mxu1 %v6214_v40 }
 0xc19   : > { %6218 = vmatprep.subr.msk.mxu1 %vm6437_vm2, %v6278_v35 }
 0xc1b   : > { %5886 = vmatmul.mubr.f32.vlgmr.msra.gmra.mrb[90].mxu1 %v3978_v46 }
 0xc1c   : > { %6219 = vmatpush3.msk.msra.mxu1 %vm6437_vm2, %v6278_v35  ;;  %v4056_v35 = vld [vmem:[%s7903_s19] sm:$0xff] }
 0xc50   : > { %v5852_v43 = vpop.f32.mrb[90].mxu0 }
 0xc51   : > { %4147 = vrot.lane.b32.xlu1 %v5852_v43, %s8003_s2  ;;  %4175 = vrot.lane.b32.xlu0 %v5852_v43, %s7998_s23  ;;  %v4047_v26 = vpop.f32.mrb[91].mxu0 }
 0xc52   : > { %5890 = vmatprep.mubr.msk.f32.mxu0 %vm951_vm3, %v4047_v26 }
 0xc53   : > { %5891 = vmatmul.mubr.msk.f32.vlgmr.msra.gmra.mrb[92].mxu0 %vm951_vm3, %v5852_v43 }
 0xc55   : > { %4151 = vrot.lane.b32.xlu1 %v5852_v43, %s8018_s9  ;;  %4179 = vrot.lane.b32.xlu0 %v5852_v43, %s7999_s27 }
 0xc59   : > { %4155 = vrot.lane.b32.xlu1 %v5852_v43, %s8010_s4  ;;  %4183 = vrot.lane.b32.xlu0 %v5852_v43, %s8013_s26 }
 0xc5d   : > { %4159 = vrot.lane.b32.xlu1 %v5852_v43, %s8009_s28  ;;  %4187 = vrot.lane.b32.xlu0 %v5852_v43, %s8005_s3 }
 0xc61   : > { %4163 = vrot.lane.b32.xlu1 %v5852_v43, %s8012_s24  ;;  %4191 = vrot.lane.b32.xlu0 %v5852_v43, %s8014_s5 }
 0xc65   : > { %4167 = vrot.lane.b32.xlu1 %v5852_v43, %s8011_s25  ;;  %4195 = vrot.lane.b32.xlu0 %v5852_v43, %s8007_s29 }
 0xc69   : > { %4199 = vrot.lane.b32.xlu0 %v5852_v43, %s8006_s30  ;;  %4173 = vrot.lane.b32.xlu1 %v4047_v26, %s7998_s23 }
 0xc6d   : > { %4177 = vrot.lane.b32.xlu0 %v4047_v26, %s7999_s27  ;;  %4145 = vrot.lane.b32.xlu1 %v4047_v26, %s8003_s2 }
 0xc71   : > { %4181 = vrot.lane.b32.xlu0 %v4047_v26, %s8013_s26  ;;  %4149 = vrot.lane.b32.xlu1 %v4047_v26, %s8018_s9 }
 0xc75   : > { %4185 = vrot.lane.b32.xlu0 %v4047_v26, %s8005_s3  ;;  %4153 = vrot.lane.b32.xlu1 %v4047_v26, %s8010_s4 }
 0xc79   : > { %4189 = vrot.lane.b32.xlu0 %v4047_v26, %s8014_s5  ;;  %4157 = vrot.lane.b32.xlu1 %v4047_v26, %s8009_s28 }
 0xc7d   : > { %4193 = vrot.lane.b32.xlu0 %v4047_v26, %s8007_s29  ;;  %4161 = vrot.lane.b32.xlu1 %v4047_v26, %s8012_s24  ;;  %s4846_s29 = sshll.u32 %s8065_s22, 8 }
 0xc7e   : > { %s7815_s23 = scalar_lea.vmem %s7904_s20, %s4846_s29 }
 0xc81   : > { %4197 = vrot.lane.b32.xlu0 %v4047_v26, %s8006_s30  ;;  %4165 = vrot.lane.b32.xlu1 %v4047_v26, %s8011_s25 }
 0xc85   : > { %4201 = vrot.lane.b32.xlu0 %v4047_v26, %s8000_s0  ;;  %4169 = vrot.lane.b32.xlu1 %v4047_v26, %s8004_s21 }
 0xc89   : > { %4203 = vrot.lane.b32.xlu0 %v5852_v43, %s8000_s0  ;;  %4171 = vrot.lane.b32.xlu1 %v5852_v43, %s8004_s21 }
 0xc8d   : > { %4065 = vperm.xlu0 %6248, %v4057_v34   ;;  %4060 = vperm.xlu1 %6249, %v4056_v35  }
 0xcc3   : > { %v4148_v30 = vpop.permute.xlu1 %4147  ;;  %v4176_v9 = vpop.permute.xlu0 %4175 }
 0xcc7   : > { %v4152_v15 = vpop.permute.xlu1 %4151  ;;  %v4180_v13 = vpop.permute.xlu0 %4179 }
 0xccb   : > { %v4156_v28 = vpop.permute.xlu1 %4155  ;;  %v4184_v33 = vpop.permute.xlu0 %4183 }
 0xccf   : > { %v4160_v19 = vpop.permute.xlu1 %4159  ;;  %v4188_v48 = vpop.permute.xlu0 %4187 }
 0xcd3   : > { %v4164_v5 = vpop.permute.xlu1 %4163  ;;  %v4192_v20 = vpop.permute.xlu0 %4191 }
 0xcd7   : > { %v4168_v0 = vpop.permute.xlu1 %4167  ;;  %v4196_v6 = vpop.permute.xlu0 %4195 }
 0xcdb   : > { %v4200_v7 = vpop.permute.xlu0 %4199  ;;  %v4174_v21 = vpop.permute.xlu1 %4173 }
 0xcdc   : > { %5914 = vmatprep.mubr.msk.f32.mxu1 %vm951_vm3, %v4174_v21 }
 0xcdd   : > { %5915 = vmatmul.mubr.msk.f32.vlgmr.msra.gmra.mrb[92].mxu1 %vm951_vm3, %v4176_v9 }
 0xcdf   : > { %v4178_v39 = vpop.permute.xlu0 %4177  ;;  %v4146_v10 = vpop.permute.xlu1 %4145 }
 0xce0   : > { %5893 = vmatprep.mubr.msk.f32.mxu0 %vm951_vm3, %v4146_v10  ;;  %5917 = vmatprep.mubr.msk.f32.mxu1 %vm951_vm3, %v4178_v39 }
 0xce1   : > { %5894 = vmatmul.mubr.msk.f32.gmra.mrb[94].mxu0 %vm951_vm3, %v4148_v30  ;;  %5918 = vmatmul.mubr.msk.f32.gmra.mrb[94].mxu1 %vm951_vm3, %v4180_v13 }
 0xce3   : > { %v4182_v22 = vpop.permute.xlu0 %4181  ;;  %v4150_v17 = vpop.permute.xlu1 %4149 }
 0xce4   : > { %5896 = vmatprep.mubr.msk.f32.mxu0 %vm951_vm3, %v4150_v17  ;;  %5920 = vmatprep.mubr.msk.f32.mxu1 %vm951_vm3, %v4182_v22 }
 0xce5   : > { %5897 = vmatmul.mubr.msk.f32.gmra.mrb[96].mxu0 %vm951_vm3, %v4152_v15  ;;  %5921 = vmatmul.mubr.msk.f32.gmra.mrb[96].mxu1 %vm951_vm3, %v4184_v33 }
 0xce7   : > { %v4186_v24 = vpop.permute.xlu0 %4185  ;;  %v4154_v58 = vpop.permute.xlu1 %4153 }
 0xce8   : > { %5899 = vmatprep.mubr.msk.f32.mxu0 %vm951_vm3, %v4154_v58  ;;  %5923 = vmatprep.mubr.msk.f32.mxu1 %vm951_vm3, %v4186_v24 }
 0xce9   : > { %5900 = vmatmul.mubr.msk.f32.gmra.mrb[98].mxu0 %vm951_vm3, %v4156_v28  ;;  %5924 = vmatmul.mubr.msk.f32.gmra.mrb[98].mxu1 %vm951_vm3, %v4188_v48 }
 0xceb   : > { %v4190_v3 = vpop.permute.xlu0 %4189  ;;  %v4158_v57 = vpop.permute.xlu1 %4157 }
 0xcec   : > { %5902 = vmatprep.mubr.msk.f32.mxu0 %vm951_vm3, %v4158_v57  ;;  %5926 = vmatprep.mubr.msk.f32.mxu1 %vm951_vm3, %v4190_v3 }
 0xced   : > { %5903 = vmatmul.mubr.msk.f32.gmra.mrb[100].mxu0 %vm951_vm3, %v4160_v19  ;;  %5927 = vmatmul.mubr.msk.f32.gmra.mrb[100].mxu1 %vm951_vm3, %v4192_v20 }
 0xcee   : > { %v5887_v63 = vpop.f32.mrb[90].mxu1 }
 0xcef   : > { %v4194_v8 = vpop.permute.xlu0 %4193  ;;  %v4162_v37 = vpop.permute.xlu1 %4161 }
 0xcf0   : > { %5905 = vmatprep.mubr.msk.f32.mxu0 %vm951_vm3, %v4162_v37  ;;  %5929 = vmatprep.mubr.msk.f32.mxu1 %vm951_vm3, %v4194_v8  ;;  %v4134_v32 = vpop.f32.mrb[91].mxu1 }
 0xcf1   : > { %5906 = vmatmul.mubr.msk.f32.gmra.mrb[102].mxu0 %vm951_vm3, %v4164_v5  ;;  %5930 = vmatmul.mubr.msk.f32.gmra.mrb[102].mxu1 %vm951_vm3, %v4196_v6 }
 0xcf3   : > { %v4198_v49 = vpop.permute.xlu0 %4197  ;;  %v4166_v60 = vpop.permute.xlu1 %4165 }
 0xcf4   : > { %5908 = vmatprep.mubr.msk.f32.mxu0 %vm951_vm3, %v4166_v60  ;;  %5932 = vmatprep.mubr.msk.f32.mxu1 %vm951_vm3, %v4198_v49 }
 0xcf5   : > { %5909 = vmatmul.mubr.msk.f32.gmra.mrb[104].mxu0 %vm951_vm3, %v4168_v0  ;;  %5933 = vmatmul.mubr.msk.f32.gmra.mrb[104].mxu1 %vm951_vm3, %v4200_v7 }
 0xcf7   : > { %v4202_v1 = vpop.permute.xlu0 %4201  ;;  %v4170_v61 = vpop.permute.xlu1 %4169 }
 0xcf8   : > { %5911 = vmatprep.mubr.msk.f32.mxu0 %vm951_vm3, %v4170_v61  ;;  %5935 = vmatprep.mubr.msk.f32.mxu1 %vm951_vm3, %v4202_v1 }
 0xcfb   : > { %v4204_v47 = vpop.permute.xlu0 %4203  ;;  %v4172_v45 = vpop.permute.xlu1 %4171 }
 0xcfc   : > { %5912 = vmatmul.mubr.msk.f32.gmra.mrb[106].mxu0 %vm951_vm3, %v4172_v45  ;;  %5936 = vmatmul.mubr.msk.f32.gmra.mrb[106].mxu1 %vm951_vm3, %v4204_v47 }
 0xd0c   : > { %v4061_v29 = vpop.permute.xlu1 %4060  ;;  %v4066_v31 = vpop.permute.xlu0 %4065 }
 0xd0d   : > { %v7808_v23 = vadd.f32 %v4134_v32, %v4061_v29  ;;  %v7810_v54 = vadd.f32 %v5887_v63, %v4066_v31 }
 0xd26   : > { %v5892_v52 = vpop.f32.mrb[92].mxu0 }
 0xd27   : > { %v4495_v62 = vadd.f32 %v5892_v52, %v7810_v54  ;;  %v4335_v50 = vpop.f32.mrb[93].mxu0 }
 0xd28   : > { %v4494_v18 = vadd.f32 %v4335_v50, %v7808_v23 }
 0xd29   : > { %4527 = vst [vmem:[%s7815_s23 + $0x8] sm:$0xff] %v4495_v62 }
 0xd2a   : > { %4526 = vst [vmem:[%s7815_s23] sm:$0xff] %v4494_v18 }
 0xdb0   : > { %v5916_v44 = vpop.f32.mrb[92].mxu1 }
 0xdb1   : > { %v4511_v11 = vadd.f32 %v5916_v44, %v7810_v54  ;;  %v4415_v36 = vpop.f32.mrb[93].mxu1 }
 0xdb2   : > { %v4510_v12 = vadd.f32 %v4415_v36, %v7808_v23 }
 0xdb3   : > { %4543 = vst [vmem:[%s7815_s23 + $0x88] sm:$0xff] %v4511_v11 }
 0xdb4   : > { %4542 = vst [vmem:[%s7815_s23 + $0x80] sm:$0xff] %v4510_v12  ;;  %v5895_v51 = vpop.f32.mrb[94].mxu0  ;;  %v5919_v27 = vpop.f32.mrb[94].mxu1 }
 0xdb5   : > { %v4497_v14 = vadd.f32 %v5895_v51, %v7810_v54  ;;  %v4513_v41 = vadd.f32 %v5919_v27, %v7810_v54  ;;  %v4345_v42 = vpop.f32.mrb[95].mxu0  ;;  %v4425_v59 = vpop.f32.mrb[95].mxu1 }
 0xdb6   : > { %v4496_v53 = vadd.f32 %v4345_v42, %v7808_v23  ;;  %v4512_v55 = vadd.f32 %v4425_v59, %v7808_v23 }
 0xdb7   : > { %4529 = vst [vmem:[%s7815_s23 + $0x18] sm:$0xff] %v4497_v14  ;;  %4545 = vst [vmem:[%s7815_s23 + $0x98] sm:$0xff] %v4513_v41 }
 0xdb8   : > { %4528 = vst [vmem:[%s7815_s23 + $0x10] sm:$0xff] %v4496_v53  ;;  %4544 = vst [vmem:[%s7815_s23 + $0x90] sm:$0xff] %v4512_v55  ;;  %v5898_v25 = vpop.f32.mrb[96].mxu0  ;;  %v5922_v38 = vpop.f32.mrb[96].mxu1 }
 0xdb9   : > { %v4499_v16 = vadd.f32 %v5898_v25, %v7810_v54  ;;  %v4515_v4 = vadd.f32 %v5922_v38, %v7810_v54  ;;  %v4355_v2 = vpop.f32.mrb[97].mxu0  ;;  %v4435_v56 = vpop.f32.mrb[97].mxu1 }
 0xdba   : > { %v4498_v40 = vadd.f32 %v4355_v2, %v7808_v23  ;;  %v4514_v46 = vadd.f32 %v4435_v56, %v7808_v23 }
 0xdbb   : > { %4531 = vst [vmem:[%s7815_s23 + $0x28] sm:$0xff] %v4499_v16  ;;  %4547 = vst [vmem:[%s7815_s23 + $0xa8] sm:$0xff] %v4515_v4 }
 0xdbc   : > { %4530 = vst [vmem:[%s7815_s23 + $0x20] sm:$0xff] %v4498_v40  ;;  %4546 = vst [vmem:[%s7815_s23 + $0xa0] sm:$0xff] %v4514_v46  ;;  %v5901_v43 = vpop.f32.mrb[98].mxu0  ;;  %v5925_v26 = vpop.f32.mrb[98].mxu1 }
 0xdbd   : > { %v4501_v34 = vadd.f32 %v5901_v43, %v7810_v54  ;;  %v4517_v35 = vadd.f32 %v5925_v26, %v7810_v54  ;;  %v4365_v30 = vpop.f32.mrb[99].mxu0  ;;  %v4445_v9 = vpop.f32.mrb[99].mxu1 }
 0xdbe   : > { %v4500_v15 = vadd.f32 %v4365_v30, %v7808_v23  ;;  %v4516_v13 = vadd.f32 %v4445_v9, %v7808_v23 }
 0xdbf   : > { %4533 = vst [vmem:[%s7815_s23 + $0x38] sm:$0xff] %v4501_v34  ;;  %4549 = vst [vmem:[%s7815_s23 + $0xb8] sm:$0xff] %v4517_v35 }
 0xdc0   : > { %4532 = vst [vmem:[%s7815_s23 + $0x30] sm:$0xff] %v4500_v15  ;;  %4548 = vst [vmem:[%s7815_s23 + $0xb0] sm:$0xff] %v4516_v13  ;;  %v5904_v28 = vpop.f32.mrb[100].mxu0  ;;  %v5928_v33 = vpop.f32.mrb[100].mxu1 }
 0xdc1   : > { %v4503_v19 = vadd.f32 %v5904_v28, %v7810_v54  ;;  %v4519_v48 = vadd.f32 %v5928_v33, %v7810_v54  ;;  %v4375_v5 = vpop.f32.mrb[101].mxu0  ;;  %v4455_v20 = vpop.f32.mrb[101].mxu1 }
 0xdc2   : > { %v4502_v0 = vadd.f32 %v4375_v5, %v7808_v23  ;;  %v4518_v6 = vadd.f32 %v4455_v20, %v7808_v23 }
 0xdc3   : > { %4535 = vst [vmem:[%s7815_s23 + $0x48] sm:$0xff] %v4503_v19  ;;  %4551 = vst [vmem:[%s7815_s23 + $0xc8] sm:$0xff] %v4519_v48 }
 0xdc4   : > { %4534 = vst [vmem:[%s7815_s23 + $0x40] sm:$0xff] %v4502_v0  ;;  %4550 = vst [vmem:[%s7815_s23 + $0xc0] sm:$0xff] %v4518_v6  ;;  %v5907_v7 = vpop.f32.mrb[102].mxu0  ;;  %v5931_v21 = vpop.f32.mrb[102].mxu1 }
 0xdc5   : > { %v4505_v39 = vadd.f32 %v5907_v7, %v7810_v54  ;;  %v4521_v10 = vadd.f32 %v5931_v21, %v7810_v54  ;;  %v4385_v22 = vpop.f32.mrb[103].mxu0  ;;  %v4465_v17 = vpop.f32.mrb[103].mxu1 }
 0xdc6   : > { %v4504_v24 = vadd.f32 %v4385_v22, %v7808_v23  ;;  %v4520_v58 = vadd.f32 %v4465_v17, %v7808_v23 }
 0xdc7   : > { %4537 = vst [vmem:[%s7815_s23 + $0x58] sm:$0xff] %v4505_v39  ;;  %4553 = vst [vmem:[%s7815_s23 + $0xd8] sm:$0xff] %v4521_v10 }
 0xdc8   : > { %4536 = vst [vmem:[%s7815_s23 + $0x50] sm:$0xff] %v4504_v24  ;;  %4552 = vst [vmem:[%s7815_s23 + $0xd0] sm:$0xff] %v4520_v58  ;;  %v5910_v3 = vpop.f32.mrb[104].mxu0  ;;  %v5934_v57 = vpop.f32.mrb[104].mxu1 }
 0xdc9   : > { %v4507_v63 = vadd.f32 %v5910_v3, %v7810_v54  ;;  %v4523_v8 = vadd.f32 %v5934_v57, %v7810_v54  ;;  %v4395_v37 = vpop.f32.mrb[105].mxu0  ;;  %v4475_v32 = vpop.f32.mrb[105].mxu1 }
 0xdca   : > { %v4506_v49 = vadd.f32 %v4395_v37, %v7808_v23  ;;  %v4522_v60 = vadd.f32 %v4475_v32, %v7808_v23 }
 0xdcb   : > { %4539 = vst [vmem:[%s7815_s23 + $0x68] sm:$0xff] %v4507_v63  ;;  %4555 = vst [vmem:[%s7815_s23 + $0xe8] sm:$0xff] %v4523_v8 }
 0xdcc   : > { %4538 = vst [vmem:[%s7815_s23 + $0x60] sm:$0xff] %v4506_v49  ;;  %4554 = vst [vmem:[%s7815_s23 + $0xe0] sm:$0xff] %v4522_v60 }
 0xdcf   : > { %v5913_v1 = vpop.f32.mrb[106].mxu0  ;;  %v5937_v61 = vpop.f32.mrb[106].mxu1 }
 0xdd0   : > { %v4509_v47 = vadd.f32 %v5913_v1, %v7810_v54  ;;  %v4525_v45 = vadd.f32 %v5937_v61, %v7810_v54  ;;  %v4405_v29 = vpop.f32.mrb[107].mxu0  ;;  %v4485_v31 = vpop.f32.mrb[107].mxu1 }
 0xdd1   : > { %v4508_v52 = vadd.f32 %v4405_v29, %v7808_v23  ;;  %v4524_v62 = vadd.f32 %v4485_v31, %v7808_v23 }
 0xdd2   : > { %4541 = vst [vmem:[%s7815_s23 + $0x78] sm:$0xff] %v4509_v47  ;;  %4557 = vst [vmem:[%s7815_s23 + $0xf8] sm:$0xff] %v4525_v45 }
 0xdd3   : > { %4540 = vst [vmem:[%s7815_s23 + $0x70] sm:$0xff] %v4508_v52  ;;  %4556 = vst [vmem:[%s7815_s23 + $0xf0] sm:$0xff] %v4524_v62 }
 0xdd4 PF: > { %s30_s1 = sadd.s32 1, %s6272_s1  }
 0xdd5   : > { %p27_p4 = scmp.ge.s32.totalorder %s30_s1, 4  }
 0xdd7   :  { %29 = sbr.rel (!%p27_p4) target bundleno = 12 (0xc), region = 133 }

</bundles_post_ra>
